<compile_context>
chip_gen: v7x
topology: tpu7x:2x2x1
jax: 0.10.0
libtpu: 0.0.40
codegen_flags: <defaults>
</compile_context>

<pallas_src>
import functools

import jax
import jax.numpy as jnp
from jax.experimental import pallas as pl
from jax.experimental.pallas import tpu as pltpu

PART = 6
LANE = 128
SUBLANE = 8


def _ceil_to(x, m):
    return (x + m - 1) // m * m


def _pcb_kernel_fused(x_ref, pool_ref, w1_ref, scale_ref, shift_ref, w2_ref,
                      b2_ref, o_ref, *, bw, compute_dtype):
    # x_ref:     (TN, C, H*W)    batch tile of the NCHW feature map (flat spatial)
    # pool_ref:  (H*W, PART)     0/1 bin-membership matrix (column p marks bin p)
    # w1_ref:    (PART, C, B)    pre-transposed 1x1-conv weights (in, out), compute dtype
    # scale_ref: (PART, 1, B)    folded BN scale = gamma / sqrt(var + eps)   (f32)
    # shift_ref: (PART, 1, B)    folded BN shift = beta - mean * scale       (f32)
    # w2_ref:    (PART, B, Kp)   pre-transposed Linear weights, K padded, compute dtype
    # b2_ref:    (PART, 1, Kp)   Linear bias (padded, f32)
    # o_ref:     (PART, TN, Kp)  logits per part (f32)
    tn, _, _ = x_ref.shape
    inv_bw = 1.0 / bw
    for i in range(tn):                         # static unroll over the batch tile
        # AdaptiveAvgPool2d((6,1)): ALL six bin sums in one pass over x[i].
        # The segmented spatial reduction is a matmul against the 0/1 bin
        # matrix, so each x vreg is loaded exactly once and the reduce rides
        # the MXU instead of issuing 6 masked cross-lane XLU reductions.
        s = jnp.dot(x_ref[i], pool_ref[...],
                    preferred_element_type=jnp.float32)          # (C, PART) sums
        s = s.T * inv_bw                                         # (PART, C) means, f32
        for p in range(PART):                   # static unroll: 6 parts
            pooled = s[p:p + 1, :]                               # (1, C)
            # 1x1 Conv2d(C -> B, bias=False) on (N, C, 1, 1) == matmul.
            h = jnp.dot(pooled.astype(compute_dtype), w1_ref[p],
                        preferred_element_type=jnp.float32)      # (1, B)
            # BatchNorm2d (eval mode, folded) + ReLU, in f32.
            h = h * scale_ref[p] + shift_ref[p]
            h = jnp.maximum(h, 0.0)
            # torch.squeeze -> (1, B); Linear(B -> K), K lane-padded to 128.
            out = jnp.dot(h.astype(compute_dtype), w2_ref[p],
                          preferred_element_type=jnp.float32) + b2_ref[p]
            o_ref[p, i:i + 1, :] = out.astype(o_ref.dtype)


def _pcb_kernel_sliced(x_ref, pool_ref, w1_ref, scale_ref, shift_ref, w2_ref,
                       b2_ref, o_ref, *, bw, compute_dtype):
    # Fallback body (v1-style per-part spatial slices + vector-unit reduce).
    # Only used if the fused body fails to lower on the installed JAX.
    del pool_ref
    inv_bw = 1.0 / bw
    for p in range(PART):
        xb = x_ref[:, :, p * bw:(p + 1) * bw]                    # (TN, C, bw)
        pooled = jnp.sum(xb.astype(jnp.float32), axis=-1) * inv_bw   # (TN, C)
        h = jnp.dot(pooled.astype(compute_dtype), w1_ref[p],
                    preferred_element_type=jnp.float32)
        h = h * scale_ref[p] + shift_ref[p]
        h = jnp.maximum(h, 0.0)
        out = jnp.dot(h.astype(compute_dtype), w2_ref[p],
                      preferred_element_type=jnp.float32) + b2_ref[p]
        o_ref[p] = out.astype(o_ref.dtype)


def pcb_heads(x_nchw, w1, bn_scale, bn_shift, w2, b2, *, tile_n=None,
              compute_dtype=jnp.bfloat16, vmem_limit_bytes=None):
    """Runs the PCB head over a backbone feature map.

    x_nchw:   (N, C, H, W), H % 6 == 0, C % 8 == 0.  bf16 input recommended —
              the kernel is HBM-read-bound on x.  (Do NOT cast f32->bf16 here:
              that would add an extra HBM pass; have the backbone emit bf16.)
    w1:       (PART, B, C)   1x1 conv weights (out, in)
    bn_scale: (PART, 1, B)   folded BN scale  = gamma / sqrt(var + eps)
    bn_shift: (PART, 1, B)   folded BN shift  = beta - mean * scale
    w2:       (PART, K, B)   Linear weights (out, in)
    b2:       (PART, 1, K)   Linear bias
    returns:  (PART, N, K) float32 logits, stacked (out[i] == part-i classifier)
    """
    N, C, H, W = x_nchw.shape
    assert H % PART == 0, "adaptive pooling here assumes H divisible by 6"
    assert C % SUBLANE == 0, "channel dim must be a multiple of 8"
    bin_h = H // PART
    bw = bin_h * W
    hw = H * W
    B = w1.shape[1]
    K = w2.shape[1]
    kp = _ceil_to(K, LANE)          # lane-dense output (pad class dim to 128)
    x_dt = x_nchw.dtype
    cdt = jnp.dtype(compute_dtype)

    # Free view of the contiguous NCHW tensor -- no transpose, no extra HBM pass.
    x_r = x_nchw.reshape(N, C, hw)

    # 0/1 bin-membership matrix: flattened spatial index i belongs to part i // bw.
    pool = (jnp.arange(hw)[:, None] // bw ==
            jnp.arange(PART)[None, :]).astype(x_dt)              # (HW, PART)

    # One-time tiny weight re-layouts: transpose (kills in-kernel relayouts),
    # pad class dim (lane-dense stores), cast to bf16 MXU operands.
    w1t = jnp.transpose(w1, (0, 2, 1)).astype(cdt)               # (PART, C, B)
    w2t = jnp.transpose(w2, (0, 2, 1))                           # (PART, B, K)
    if kp != K:
        w2t = jnp.pad(w2t, ((0, 0), (0, 0), (0, kp - K)))        # (PART, B, Kp)
        b2p = jnp.pad(b2, ((0, 0), (0, 0), (0, kp - K)))         # (PART, 1, Kp)
    else:
        b2p = b2
    w2t = w2t.astype(cdt)
    scale = bn_scale.astype(jnp.float32)
    shift = bn_shift.astype(jnp.float32)
    b2p = b2p.astype(jnp.float32)

    # --- batch tiling: lane/sublane-padded footprint, >=2 grid steps for v7x ---
    hw_pad = _ceil_to(hw, LANE)
    row_bytes = C * hw_pad * x_dt.itemsize       # per-sample padded x footprint
    if tile_n is None:
        budget = 12 << 20                        # per x buffer (double-buffered)
        if N <= SUBLANE:
            tile_n = N
        else:
            cand = max(SUBLANE, (budget // row_bytes) // SUBLANE * SUBLANE)
            cand = min(cand, (N // SUBLANE) * SUBLANE)
            # v7x has 2 TensorCores: prefer >= 4 (else >= 2) grid steps so the
            # "parallel" grid axis can actually be sharded across them.
            if N >= 4 * SUBLANE:
                cand = min(cand, max(SUBLANE, (N // 4) // SUBLANE * SUBLANE))
            elif N >= 2 * SUBLANE:
                cand = min(cand, max(SUBLANE, (N // 2) // SUBLANE * SUBLANE))
            tile_n = cand
    grid = (pl.cdiv(N, tile_n),)

    # --- scoped VMEM: always set it, from the actual (padded) block footprints ---
    if vmem_limit_bytes is None:
        x_blk = tile_n * C * hw_pad * x_dt.itemsize
        w_blk = (PART * C * _ceil_to(B, LANE) * cdt.itemsize               # w1t
                 + PART * _ceil_to(B, SUBLANE) * kp * cdt.itemsize         # w2t
                 + 2 * PART * SUBLANE * _ceil_to(B, LANE) * 4              # scale/shift
                 + PART * SUBLANE * kp * 4                                 # b2
                 + _ceil_to(hw, SUBLANE) * LANE * x_dt.itemsize)           # pool
        out_blk = PART * _ceil_to(tile_n, SUBLANE) * kp * 4
        tmp_blk = tile_n * C * LANE * 4          # in-kernel pooled-sum temporaries
        need = 2 * x_blk + 2 * w_blk + 2 * out_blk + tmp_blk + (4 << 20)
        try:
            phys = pltpu.get_tpu_info().vmem_capacity_bytes
        except Exception:
            phys = 64 << 20                      # v7x has the smallest VMEM (64 MiB/TC)
        vmem_limit_bytes = max(16 << 20, min(int(need), int(phys * 0.9)))

    operands = (x_r, pool, w1t, scale, shift, w2t, b2p)

    def build(kernel_fn, single_buffer_params):
        kernel = functools.partial(kernel_fn, bw=bw, compute_dtype=cdt)
        # Constant-index parameters are DMA'd once and stay VMEM resident;
        # single-buffering them drops the wasted 2nd pipeline buffer.
        pm = {"pipeline_mode": pl.Buffered(1)} if single_buffer_params else {}
        return pl.pallas_call(
            kernel,
            out_shape=jax.ShapeDtypeStruct((PART, N, kp), jnp.float32),
            grid=grid,
            in_specs=[
                # x: one block per batch tile; read from HBM exactly once.
                pl.BlockSpec((tile_n, C, hw), lambda n: (n, 0, 0)),
                pl.BlockSpec((hw, PART), lambda n: (0, 0), **pm),
                pl.BlockSpec((PART, C, B), lambda n: (0, 0, 0), **pm),
                pl.BlockSpec((PART, 1, B), lambda n: (0, 0, 0), **pm),
                pl.BlockSpec((PART, 1, B), lambda n: (0, 0, 0), **pm),
                pl.BlockSpec((PART, B, kp), lambda n: (0, 0, 0), **pm),
                pl.BlockSpec((PART, 1, kp), lambda n: (0, 0, 0), **pm),
            ],
            out_specs=pl.BlockSpec((PART, tile_n, kp), lambda n: (0, n, 0)),
            compiler_params=pltpu.CompilerParams(
                dimension_semantics=("parallel",),
                vmem_limit_bytes=vmem_limit_bytes),
        )

    # Preferred: fused pooling + single-buffered params.  Fall back gracefully
    # if the installed Pallas rejects Buffered(1) or the fused body.
    attempts = (
        (_pcb_kernel_fused, True),
        (_pcb_kernel_fused, False),
        (_pcb_kernel_sliced, True),
        (_pcb_kernel_sliced, False),
    )
    out = None
    last_err = None
    for kernel_fn, single_buf in attempts:
        try:
            out = build(kernel_fn, single_buf)(*operands)
            break
        except Exception as err:  # lowering/compile-time failure -> next variant
            last_err = err
    if out is None:
        raise last_err

    # Stacked (PART, N, K) logits: one slice, no per-part XLA copies.
    return out[:, :, :K]


def pcb_heads_reference(x_nchw, w1, bn_scale, bn_shift, w2, b2):
    """Plain-JAX reference of the same forward pass (for verification)."""
    N, C, H, W = x_nchw.shape
    bin_h = H // PART
    outs = []
    for i in range(PART):
        xb = x_nchw[:, :, i * bin_h:(i + 1) * bin_h, :]
        pooled = xb.mean(axis=(2, 3))                 # (N, C)
        h = pooled @ w1[i].T                          # (N, B)
        h = h * bn_scale[i, 0] + bn_shift[i, 0]
        h = jnp.maximum(h, 0.0)
        outs.append(h @ w2[i].T + b2[i, 0])           # (N, K)
    return outs


if __name__ == "__main__":
    # Small shapes consistent with the module (scaled down from C=2048, B=256).
    N, C, H, W = 2, 32, 12, 4     # backbone feature map (NCHW)
    BOTTLENECK = 16               # ClassBlock num_bottleneck (256 in original)
    CLASS_NUM = 8

    key = jax.random.PRNGKey(0)
    kx, k1, k2 = jax.random.split(key, 3)

    # Backbone feature map stand-in (see TODO(synk) above).
    x = jax.random.normal(kx, (N, C, H, W), dtype=jnp.float32)

    # Conv2d(C, BOTTLENECK, 1, bias=False): kaiming_normal_ fan_out, relu.
    w1 = jax.random.normal(k1, (PART, BOTTLENECK, C), dtype=jnp.float32) \
        * jnp.sqrt(2.0 / BOTTLENECK)

    # BatchNorm2d(BOTTLENECK): gamma=1, beta=0, running_mean=0, running_var=1.
    eps = 1e-5
    gamma = jnp.ones((PART, 1, BOTTLENECK), jnp.float32)
    beta = jnp.zeros((PART, 1, BOTTLENECK), jnp.float32)
    running_mean = jnp.zeros((PART, 1, BOTTLENECK), jnp.float32)
    running_var = jnp.ones((PART, 1, BOTTLENECK), jnp.float32)
    bn_scale = gamma / jnp.sqrt(running_var + eps)
    bn_shift = beta - running_mean * bn_scale

    # Linear(BOTTLENECK, CLASS_NUM): normal(std=0.001) weight, zero bias.
    w2 = jax.random.normal(k2, (PART, CLASS_NUM, BOTTLENECK), dtype=jnp.float32) * 0.001
    b2 = jnp.zeros((PART, 1, CLASS_NUM), jnp.float32)

    # TODO(synk): Dropout(p=0.5) is stochastic in train mode; implemented as
    # identity (eval-mode semantics).

    refs = pcb_heads_reference(x, w1, bn_scale, bn_shift, w2, b2)

    # 1) Exactness check: f32 compute path (same arithmetic as the reference).
    out_f32 = jax.block_until_ready(
        pcb_heads(x, w1, bn_scale, bn_shift, w2, b2, compute_dtype=jnp.float32))
    assert out_f32.shape == (PART, N, CLASS_NUM)
    for i in range(PART):
        assert float(jnp.max(jnp.abs(out_f32[i] - refs[i]))) < 1e-4, "f32 mismatch"

    # 2) Performance-default path: bf16 MXU operands, f32 accumulation.
    out_bf16 = jax.block_until_ready(
        pcb_heads(x, w1, bn_scale, bn_shift, w2, b2))
    assert out_bf16.shape == (PART, N, CLASS_NUM)
    for i in range(PART):
        assert float(jnp.max(jnp.abs(out_bf16[i] - refs[i]))) < 2e-3, "bf16 mismatch"

    print("KERNEL_OK")
</pallas_src>

<mosaic_0001>
module attributes {stable_mosaic.version = 11 : i64} {
  func.func @_pcb_kernel_fused(%arg0: i32, %arg1: memref<2x32x48xf32, #tpu.memory_space<vmem>>, %arg2: memref<48x6xf32, #tpu.memory_space<vmem>>, %arg3: memref<6x32x16xf32, #tpu.memory_space<vmem>>, %arg4: memref<6x1x16xf32, #tpu.memory_space<vmem>>, %arg5: memref<6x1x16xf32, #tpu.memory_space<vmem>>, %arg6: memref<6x16x128xf32, #tpu.memory_space<vmem>>, %arg7: memref<6x1x128xf32, #tpu.memory_space<vmem>>, %arg8: memref<6x2x128xf32, #tpu.memory_space<vmem>>) attributes {dimension_semantics = [#tpu.dimension_semantics<parallel>], iteration_bounds = array<i64: 1>, scalar_prefetch = 0 : i64, scratch_operands = 0 : i64, tpu.core_type = #tpu.core_type<tc>, window_params = [{transform_indices = @transform_0, window_bounds = array<i64: 2, 32, 48>}, {pipeline_mode = #tpu.pipeline_mode<synchronous>, transform_indices = @transform_1, window_bounds = array<i64: 48, 6>}, {pipeline_mode = #tpu.pipeline_mode<synchronous>, transform_indices = @transform_2, window_bounds = array<i64: 6, 32, 16>}, {pipeline_mode = #tpu.pipeline_mode<synchronous>, transform_indices = @transform_3, window_bounds = array<i64: 6, 1, 16>}, {pipeline_mode = #tpu.pipeline_mode<synchronous>, transform_indices = @transform_4, window_bounds = array<i64: 6, 1, 16>}, {pipeline_mode = #tpu.pipeline_mode<synchronous>, transform_indices = @transform_5, window_bounds = array<i64: 6, 16, 128>}, {pipeline_mode = #tpu.pipeline_mode<synchronous>, transform_indices = @transform_6, window_bounds = array<i64: 6, 1, 128>}, {transform_indices = @transform_7, window_bounds = array<i64: 6, 2, 128>}]} {
    %c0 = arith.constant 0 : index
    %c0_0 = arith.constant 0 : index
    %c0_1 = arith.constant 0 : index
    %0 = vector.load %arg1[%c0, %c0_0, %c0_1] : memref<2x32x48xf32, #tpu.memory_space<vmem>>, vector<1x32x48xf32>
    %1 = vector.shape_cast %0 : vector<1x32x48xf32> to vector<32x48xf32>
    %c0_2 = arith.constant 0 : index
    %c0_3 = arith.constant 0 : index
    %2 = vector.load %arg2[%c0_2, %c0_3] : memref<48x6xf32, #tpu.memory_space<vmem>>, vector<48x6xf32>
    %cst = arith.constant dense<0.000000e+00> : vector<32x6xf32>
    %3 = tpu.matmul %1, %2, %cst {dimension_numbers = #tpu.dot_dimension_numbers<[1], [0], [0], [1], [0, 0, 1, 1], [], []>} : vector<32x48xf32>, vector<48x6xf32>, vector<32x6xf32> -> vector<32x6xf32>
    %4 = tpu.transpose %3, [1, 0] : vector<32x6xf32> -> vector<6x32xf32>
    %cst_4 = arith.constant 1.250000e-01 : f32
    %5 = vector.broadcast %cst_4 : f32 to vector<6x32xf32>
    %6 = arith.mulf %4, %5 : vector<6x32xf32>
    %7 = vector.extract_strided_slice %6 {offsets = [0, 0], sizes = [1, 32], strides = [1, 1]} : vector<6x32xf32> to vector<1x32xf32>
    %c0_5 = arith.constant 0 : index
    %c0_6 = arith.constant 0 : index
    %c0_7 = arith.constant 0 : index
    %8 = vector.load %arg3[%c0_5, %c0_6, %c0_7] : memref<6x32x16xf32, #tpu.memory_space<vmem>>, vector<1x32x16xf32>
    %9 = vector.shape_cast %8 : vector<1x32x16xf32> to vector<32x16xf32>
    %cst_8 = arith.constant dense<0.000000e+00> : vector<1x16xf32>
    %10 = tpu.matmul %7, %9, %cst_8 {dimension_numbers = #tpu.dot_dimension_numbers<[1], [0], [0], [1], [0, 0, 1, 1], [], []>} : vector<1x32xf32>, vector<32x16xf32>, vector<1x16xf32> -> vector<1x16xf32>
    %c0_9 = arith.constant 0 : index
    %c0_10 = arith.constant 0 : index
    %c0_11 = arith.constant 0 : index
    %11 = vector.load %arg4[%c0_9, %c0_10, %c0_11] : memref<6x1x16xf32, #tpu.memory_space<vmem>>, vector<1x1x16xf32>
    %12 = vector.shape_cast %11 : vector<1x1x16xf32> to vector<1x16xf32>
    %13 = arith.mulf %10, %12 : vector<1x16xf32>
    %c0_12 = arith.constant 0 : index
    %c0_13 = arith.constant 0 : index
    %c0_14 = arith.constant 0 : index
    %14 = vector.load %arg5[%c0_12, %c0_13, %c0_14] : memref<6x1x16xf32, #tpu.memory_space<vmem>>, vector<1x1x16xf32>
    %15 = vector.shape_cast %14 : vector<1x1x16xf32> to vector<1x16xf32>
    %16 = arith.addf %13, %15 : vector<1x16xf32>
    %cst_15 = arith.constant 0.000000e+00 : f32
    %17 = vector.broadcast %cst_15 : f32 to vector<1x16xf32>
    %18 = arith.maximumf %16, %17 : vector<1x16xf32>
    %c0_16 = arith.constant 0 : index
    %c0_17 = arith.constant 0 : index
    %c0_18 = arith.constant 0 : index
    %19 = vector.load %arg6[%c0_16, %c0_17, %c0_18] : memref<6x16x128xf32, #tpu.memory_space<vmem>>, vector<1x16x128xf32>
    %20 = vector.shape_cast %19 : vector<1x16x128xf32> to vector<16x128xf32>
    %cst_19 = arith.constant dense<0.000000e+00> : vector<1x128xf32>
    %21 = tpu.matmul %18, %20, %cst_19 {dimension_numbers = #tpu.dot_dimension_numbers<[1], [0], [0], [1], [0, 0, 1, 1], [], []>} : vector<1x16xf32>, vector<16x128xf32>, vector<1x128xf32> -> vector<1x128xf32>
    %c0_20 = arith.constant 0 : index
    %c0_21 = arith.constant 0 : index
    %c0_22 = arith.constant 0 : index
    %22 = vector.load %arg7[%c0_20, %c0_21, %c0_22] : memref<6x1x128xf32, #tpu.memory_space<vmem>>, vector<1x1x128xf32>
    %23 = vector.shape_cast %22 : vector<1x1x128xf32> to vector<1x128xf32>
    %24 = arith.addf %21, %23 : vector<1x128xf32>
    %c0_23 = arith.constant 0 : index
    %c0_24 = arith.constant 0 : index
    %c0_25 = arith.constant 0 : index
    %25 = vector.load %arg8[%c0_23, %c0_24, %c0_25] : memref<6x2x128xf32, #tpu.memory_space<vmem>>, vector<1x1x128xf32>
    %26 = vector.shape_cast %25 : vector<1x1x128xf32> to vector<1x128xf32>
    %27 = vector.shape_cast %24 : vector<1x128xf32> to vector<1x1x128xf32>
    tpu.vector_store %arg8[%c0_23, %c0_24, %c0_25], %27 {strides = array<i32>} : memref<6x2x128xf32, #tpu.memory_space<vmem>>, vector<1x1x128xf32>,
    %28 = vector.extract_strided_slice %6 {offsets = [1, 0], sizes = [1, 32], strides = [1, 1]} : vector<6x32xf32> to vector<1x32xf32>
    %c1 = arith.constant 1 : index
    %c0_26 = arith.constant 0 : index
    %c0_27 = arith.constant 0 : index
    %29 = vector.load %arg3[%c1, %c0_26, %c0_27] : memref<6x32x16xf32, #tpu.memory_space<vmem>>, vector<1x32x16xf32>
    %30 = vector.shape_cast %29 : vector<1x32x16xf32> to vector<32x16xf32>
    %cst_28 = arith.constant dense<0.000000e+00> : vector<1x16xf32>
    %31 = tpu.matmul %28, %30, %cst_28 {dimension_numbers = #tpu.dot_dimension_numbers<[1], [0], [0], [1], [0, 0, 1, 1], [], []>} : vector<1x32xf32>, vector<32x16xf32>, vector<1x16xf32> -> vector<1x16xf32>
    %c1_29 = arith.constant 1 : index
    %c0_30 = arith.constant 0 : index
    %c0_31 = arith.constant 0 : index
    %32 = vector.load %arg4[%c1_29, %c0_30, %c0_31] : memref<6x1x16xf32, #tpu.memory_space<vmem>>, vector<1x1x16xf32>
    %33 = vector.shape_cast %32 : vector<1x1x16xf32> to vector<1x16xf32>
    %34 = arith.mulf %31, %33 : vector<1x16xf32>
    %c1_32 = arith.constant 1 : index
    %c0_33 = arith.constant 0 : index
    %c0_34 = arith.constant 0 : index
    %35 = vector.load %arg5[%c1_32, %c0_33, %c0_34] : memref<6x1x16xf32, #tpu.memory_space<vmem>>, vector<1x1x16xf32>
    %36 = vector.shape_cast %35 : vector<1x1x16xf32> to vector<1x16xf32>
    %37 = arith.addf %34, %36 : vector<1x16xf32>
    %cst_35 = arith.constant 0.000000e+00 : f32
    %38 = vector.broadcast %cst_35 : f32 to vector<1x16xf32>
    %39 = arith.maximumf %37, %38 : vector<1x16xf32>
    %c1_36 = arith.constant 1 : index
    %c0_37 = arith.constant 0 : index
    %c0_38 = arith.constant 0 : index
    %40 = vector.load %arg6[%c1_36, %c0_37, %c0_38] : memref<6x16x128xf32, #tpu.memory_space<vmem>>, vector<1x16x128xf32>
    %41 = vector.shape_cast %40 : vector<1x16x128xf32> to vector<16x128xf32>
    %cst_39 = arith.constant dense<0.000000e+00> : vector<1x128xf32>
    %42 = tpu.matmul %39, %41, %cst_39 {dimension_numbers = #tpu.dot_dimension_numbers<[1], [0], [0], [1], [0, 0, 1, 1], [], []>} : vector<1x16xf32>, vector<16x128xf32>, vector<1x128xf32> -> vector<1x128xf32>
    %c1_40 = arith.constant 1 : index
    %c0_41 = arith.constant 0 : index
    %c0_42 = arith.constant 0 : index
    %43 = vector.load %arg7[%c1_40, %c0_41, %c0_42] : memref<6x1x128xf32, #tpu.memory_space<vmem>>, vector<1x1x128xf32>
    %44 = vector.shape_cast %43 : vector<1x1x128xf32> to vector<1x128xf32>
    %45 = arith.addf %42, %44 : vector<1x128xf32>
    %c1_43 = arith.constant 1 : index
    %c0_44 = arith.constant 0 : index
    %c0_45 = arith.constant 0 : index
    %46 = vector.load %arg8[%c1_43, %c0_44, %c0_45] : memref<6x2x128xf32, #tpu.memory_space<vmem>>, vector<1x1x128xf32>
    %47 = vector.shape_cast %46 : vector<1x1x128xf32> to vector<1x128xf32>
    %48 = vector.shape_cast %45 : vector<1x128xf32> to vector<1x1x128xf32>
    tpu.vector_store %arg8[%c1_43, %c0_44, %c0_45], %48 {strides = array<i32>} : memref<6x2x128xf32, #tpu.memory_space<vmem>>, vector<1x1x128xf32>,
    %49 = vector.extract_strided_slice %6 {offsets = [2, 0], sizes = [1, 32], strides = [1, 1]} : vector<6x32xf32> to vector<1x32xf32>
    %c2 = arith.constant 2 : index
    %c0_46 = arith.constant 0 : index
    %c0_47 = arith.constant 0 : index
    %50 = vector.load %arg3[%c2, %c0_46, %c0_47] : memref<6x32x16xf32, #tpu.memory_space<vmem>>, vector<1x32x16xf32>
    %51 = vector.shape_cast %50 : vector<1x32x16xf32> to vector<32x16xf32>
    %cst_48 = arith.constant dense<0.000000e+00> : vector<1x16xf32>
    %52 = tpu.matmul %49, %51, %cst_48 {dimension_numbers = #tpu.dot_dimension_numbers<[1], [0], [0], [1], [0, 0, 1, 1], [], []>} : vector<1x32xf32>, vector<32x16xf32>, vector<1x16xf32> -> vector<1x16xf32>
    %c2_49 = arith.constant 2 : index
    %c0_50 = arith.constant 0 : index
    %c0_51 = arith.constant 0 : index
    %53 = vector.load %arg4[%c2_49, %c0_50, %c0_51] : memref<6x1x16xf32, #tpu.memory_space<vmem>>, vector<1x1x16xf32>
    %54 = vector.shape_cast %53 : vector<1x1x16xf32> to vector<1x16xf32>
    %55 = arith.mulf %52, %54 : vector<1x16xf32>
    %c2_52 = arith.constant 2 : index
    %c0_53 = arith.constant 0 : index
    %c0_54 = arith.constant 0 : index
    %56 = vector.load %arg5[%c2_52, %c0_53, %c0_54] : memref<6x1x16xf32, #tpu.memory_space<vmem>>, vector<1x1x16xf32>
    %57 = vector.shape_cast %56 : vector<1x1x16xf32> to vector<1x16xf32>
    %58 = arith.addf %55, %57 : vector<1x16xf32>
    %cst_55 = arith.constant 0.000000e+00 : f32
    %59 = vector.broadcast %cst_55 : f32 to vector<1x16xf32>
    %60 = arith.maximumf %58, %59 : vector<1x16xf32>
    %c2_56 = arith.constant 2 : index
    %c0_57 = arith.constant 0 : index
    %c0_58 = arith.constant 0 : index
    %61 = vector.load %arg6[%c2_56, %c0_57, %c0_58] : memref<6x16x128xf32, #tpu.memory_space<vmem>>, vector<1x16x128xf32>
    %62 = vector.shape_cast %61 : vector<1x16x128xf32> to vector<16x128xf32>
    %cst_59 = arith.constant dense<0.000000e+00> : vector<1x128xf32>
    %63 = tpu.matmul %60, %62, %cst_59 {dimension_numbers = #tpu.dot_dimension_numbers<[1], [0], [0], [1], [0, 0, 1, 1], [], []>} : vector<1x16xf32>, vector<16x128xf32>, vector<1x128xf32> -> vector<1x128xf32>
    %c2_60 = arith.constant 2 : index
    %c0_61 = arith.constant 0 : index
    %c0_62 = arith.constant 0 : index
    %64 = vector.load %arg7[%c2_60, %c0_61, %c0_62] : memref<6x1x128xf32, #tpu.memory_space<vmem>>, vector<1x1x128xf32>
    %65 = vector.shape_cast %64 : vector<1x1x128xf32> to vector<1x128xf32>
    %66 = arith.addf %63, %65 : vector<1x128xf32>
    %c2_63 = arith.constant 2 : index
    %c0_64 = arith.constant 0 : index
    %c0_65 = arith.constant 0 : index
    %67 = vector.load %arg8[%c2_63, %c0_64, %c0_65] : memref<6x2x128xf32, #tpu.memory_space<vmem>>, vector<1x1x128xf32>
    %68 = vector.shape_cast %67 : vector<1x1x128xf32> to vector<1x128xf32>
    %69 = vector.shape_cast %66 : vector<1x128xf32> to vector<1x1x128xf32>
    tpu.vector_store %arg8[%c2_63, %c0_64, %c0_65], %69 {strides = array<i32>} : memref<6x2x128xf32, #tpu.memory_space<vmem>>, vector<1x1x128xf32>,
    %70 = vector.extract_strided_slice %6 {offsets = [3, 0], sizes = [1, 32], strides = [1, 1]} : vector<6x32xf32> to vector<1x32xf32>
    %c3 = arith.constant 3 : index
    %c0_66 = arith.constant 0 : index
    %c0_67 = arith.constant 0 : index
    %71 = vector.load %arg3[%c3, %c0_66, %c0_67] : memref<6x32x16xf32, #tpu.memory_space<vmem>>, vector<1x32x16xf32>
    %72 = vector.shape_cast %71 : vector<1x32x16xf32> to vector<32x16xf32>
    %cst_68 = arith.constant dense<0.000000e+00> : vector<1x16xf32>
    %73 = tpu.matmul %70, %72, %cst_68 {dimension_numbers = #tpu.dot_dimension_numbers<[1], [0], [0], [1], [0, 0, 1, 1], [], []>} : vector<1x32xf32>, vector<32x16xf32>, vector<1x16xf32> -> vector<1x16xf32>
    %c3_69 = arith.constant 3 : index
    %c0_70 = arith.constant 0 : index
    %c0_71 = arith.constant 0 : index
    %74 = vector.load %arg4[%c3_69, %c0_70, %c0_71] : memref<6x1x16xf32, #tpu.memory_space<vmem>>, vector<1x1x16xf32>
    %75 = vector.shape_cast %74 : vector<1x1x16xf32> to vector<1x16xf32>
    %76 = arith.mulf %73, %75 : vector<1x16xf32>
    %c3_72 = arith.constant 3 : index
    %c0_73 = arith.constant 0 : index
    %c0_74 = arith.constant 0 : index
    %77 = vector.load %arg5[%c3_72, %c0_73, %c0_74] : memref<6x1x16xf32, #tpu.memory_space<vmem>>, vector<1x1x16xf32>
    %78 = vector.shape_cast %77 : vector<1x1x16xf32> to vector<1x16xf32>
    %79 = arith.addf %76, %78 : vector<1x16xf32>
    %cst_75 = arith.constant 0.000000e+00 : f32
    %80 = vector.broadcast %cst_75 : f32 to vector<1x16xf32>
    %81 = arith.maximumf %79, %80 : vector<1x16xf32>
    %c3_76 = arith.constant 3 : index
    %c0_77 = arith.constant 0 : index
    %c0_78 = arith.constant 0 : index
    %82 = vector.load %arg6[%c3_76, %c0_77, %c0_78] : memref<6x16x128xf32, #tpu.memory_space<vmem>>, vector<1x16x128xf32>
    %83 = vector.shape_cast %82 : vector<1x16x128xf32> to vector<16x128xf32>
    %cst_79 = arith.constant dense<0.000000e+00> : vector<1x128xf32>
    %84 = tpu.matmul %81, %83, %cst_79 {dimension_numbers = #tpu.dot_dimension_numbers<[1], [0], [0], [1], [0, 0, 1, 1], [], []>} : vector<1x16xf32>, vector<16x128xf32>, vector<1x128xf32> -> vector<1x128xf32>
    %c3_80 = arith.constant 3 : index
    %c0_81 = arith.constant 0 : index
    %c0_82 = arith.constant 0 : index
    %85 = vector.load %arg7[%c3_80, %c0_81, %c0_82] : memref<6x1x128xf32, #tpu.memory_space<vmem>>, vector<1x1x128xf32>
    %86 = vector.shape_cast %85 : vector<1x1x128xf32> to vector<1x128xf32>
    %87 = arith.addf %84, %86 : vector<1x128xf32>
    %c3_83 = arith.constant 3 : index
    %c0_84 = arith.constant 0 : index
    %c0_85 = arith.constant 0 : index
    %88 = vector.load %arg8[%c3_83, %c0_84, %c0_85] : memref<6x2x128xf32, #tpu.memory_space<vmem>>, vector<1x1x128xf32>
    %89 = vector.shape_cast %88 : vector<1x1x128xf32> to vector<1x128xf32>
    %90 = vector.shape_cast %87 : vector<1x128xf32> to vector<1x1x128xf32>
    tpu.vector_store %arg8[%c3_83, %c0_84, %c0_85], %90 {strides = array<i32>} : memref<6x2x128xf32, #tpu.memory_space<vmem>>, vector<1x1x128xf32>,
    %91 = vector.extract_strided_slice %6 {offsets = [4, 0], sizes = [1, 32], strides = [1, 1]} : vector<6x32xf32> to vector<1x32xf32>
    %c4 = arith.constant 4 : index
    %c0_86 = arith.constant 0 : index
    %c0_87 = arith.constant 0 : index
    %92 = vector.load %arg3[%c4, %c0_86, %c0_87] : memref<6x32x16xf32, #tpu.memory_space<vmem>>, vector<1x32x16xf32>
    %93 = vector.shape_cast %92 : vector<1x32x16xf32> to vector<32x16xf32>
    %cst_88 = arith.constant dense<0.000000e+00> : vector<1x16xf32>
    %94 = tpu.matmul %91, %93, %cst_88 {dimension_numbers = #tpu.dot_dimension_numbers<[1], [0], [0], [1], [0, 0, 1, 1], [], []>} : vector<1x32xf32>, vector<32x16xf32>, vector<1x16xf32> -> vector<1x16xf32>
    %c4_89 = arith.constant 4 : index
    %c0_90 = arith.constant 0 : index
    %c0_91 = arith.constant 0 : index
    %95 = vector.load %arg4[%c4_89, %c0_90, %c0_91] : memref<6x1x16xf32, #tpu.memory_space<vmem>>, vector<1x1x16xf32>
    %96 = vector.shape_cast %95 : vector<1x1x16xf32> to vector<1x16xf32>
    %97 = arith.mulf %94, %96 : vector<1x16xf32>
    %c4_92 = arith.constant 4 : index
    %c0_93 = arith.constant 0 : index
    %c0_94 = arith.constant 0 : index
    %98 = vector.load %arg5[%c4_92, %c0_93, %c0_94] : memref<6x1x16xf32, #tpu.memory_space<vmem>>, vector<1x1x16xf32>
    %99 = vector.shape_cast %98 : vector<1x1x16xf32> to vector<1x16xf32>
    %100 = arith.addf %97, %99 : vector<1x16xf32>
    %cst_95 = arith.constant 0.000000e+00 : f32
    %101 = vector.broadcast %cst_95 : f32 to vector<1x16xf32>
    %102 = arith.maximumf %100, %101 : vector<1x16xf32>
    %c4_96 = arith.constant 4 : index
    %c0_97 = arith.constant 0 : index
    %c0_98 = arith.constant 0 : index
    %103 = vector.load %arg6[%c4_96, %c0_97, %c0_98] : memref<6x16x128xf32, #tpu.memory_space<vmem>>, vector<1x16x128xf32>
    %104 = vector.shape_cast %103 : vector<1x16x128xf32> to vector<16x128xf32>
    %cst_99 = arith.constant dense<0.000000e+00> : vector<1x128xf32>
    %105 = tpu.matmul %102, %104, %cst_99 {dimension_numbers = #tpu.dot_dimension_numbers<[1], [0], [0], [1], [0, 0, 1, 1], [], []>} : vector<1x16xf32>, vector<16x128xf32>, vector<1x128xf32> -> vector<1x128xf32>
    %c4_100 = arith.constant 4 : index
    %c0_101 = arith.constant 0 : index
    %c0_102 = arith.constant 0 : index
    %106 = vector.load %arg7[%c4_100, %c0_101, %c0_102] : memref<6x1x128xf32, #tpu.memory_space<vmem>>, vector<1x1x128xf32>
    %107 = vector.shape_cast %106 : vector<1x1x128xf32> to vector<1x128xf32>
    %108 = arith.addf %105, %107 : vector<1x128xf32>
    %c4_103 = arith.constant 4 : index
    %c0_104 = arith.constant 0 : index
    %c0_105 = arith.constant 0 : index
    %109 = vector.load %arg8[%c4_103, %c0_104, %c0_105] : memref<6x2x128xf32, #tpu.memory_space<vmem>>, vector<1x1x128xf32>
    %110 = vector.shape_cast %109 : vector<1x1x128xf32> to vector<1x128xf32>
    %111 = vector.shape_cast %108 : vector<1x128xf32> to vector<1x1x128xf32>
    tpu.vector_store %arg8[%c4_103, %c0_104, %c0_105], %111 {strides = array<i32>} : memref<6x2x128xf32, #tpu.memory_space<vmem>>, vector<1x1x128xf32>,
    %112 = vector.extract_strided_slice %6 {offsets = [5, 0], sizes = [1, 32], strides = [1, 1]} : vector<6x32xf32> to vector<1x32xf32>
    %c5 = arith.constant 5 : index
    %c0_106 = arith.constant 0 : index
    %c0_107 = arith.constant 0 : index
    %113 = vector.load %arg3[%c5, %c0_106, %c0_107] : memref<6x32x16xf32, #tpu.memory_space<vmem>>, vector<1x32x16xf32>
    %114 = vector.shape_cast %113 : vector<1x32x16xf32> to vector<32x16xf32>
    %cst_108 = arith.constant dense<0.000000e+00> : vector<1x16xf32>
    %115 = tpu.matmul %112, %114, %cst_108 {dimension_numbers = #tpu.dot_dimension_numbers<[1], [0], [0], [1], [0, 0, 1, 1], [], []>} : vector<1x32xf32>, vector<32x16xf32>, vector<1x16xf32> -> vector<1x16xf32>
    %c5_109 = arith.constant 5 : index
    %c0_110 = arith.constant 0 : index
    %c0_111 = arith.constant 0 : index
    %116 = vector.load %arg4[%c5_109, %c0_110, %c0_111] : memref<6x1x16xf32, #tpu.memory_space<vmem>>, vector<1x1x16xf32>
    %117 = vector.shape_cast %116 : vector<1x1x16xf32> to vector<1x16xf32>
    %118 = arith.mulf %115, %117 : vector<1x16xf32>
    %c5_112 = arith.constant 5 : index
    %c0_113 = arith.constant 0 : index
    %c0_114 = arith.constant 0 : index
    %119 = vector.load %arg5[%c5_112, %c0_113, %c0_114] : memref<6x1x16xf32, #tpu.memory_space<vmem>>, vector<1x1x16xf32>
    %120 = vector.shape_cast %119 : vector<1x1x16xf32> to vector<1x16xf32>
    %121 = arith.addf %118, %120 : vector<1x16xf32>
    %cst_115 = arith.constant 0.000000e+00 : f32
    %122 = vector.broadcast %cst_115 : f32 to vector<1x16xf32>
    %123 = arith.maximumf %121, %122 : vector<1x16xf32>
    %c5_116 = arith.constant 5 : index
    %c0_117 = arith.constant 0 : index
    %c0_118 = arith.constant 0 : index
    %124 = vector.load %arg6[%c5_116, %c0_117, %c0_118] : memref<6x16x128xf32, #tpu.memory_space<vmem>>, vector<1x16x128xf32>
    %125 = vector.shape_cast %124 : vector<1x16x128xf32> to vector<16x128xf32>
    %cst_119 = arith.constant dense<0.000000e+00> : vector<1x128xf32>
    %126 = tpu.matmul %123, %125, %cst_119 {dimension_numbers = #tpu.dot_dimension_numbers<[1], [0], [0], [1], [0, 0, 1, 1], [], []>} : vector<1x16xf32>, vector<16x128xf32>, vector<1x128xf32> -> vector<1x128xf32>
    %c5_120 = arith.constant 5 : index
    %c0_121 = arith.constant 0 : index
    %c0_122 = arith.constant 0 : index
    %127 = vector.load %arg7[%c5_120, %c0_121, %c0_122] : memref<6x1x128xf32, #tpu.memory_space<vmem>>, vector<1x1x128xf32>
    %128 = vector.shape_cast %127 : vector<1x1x128xf32> to vector<1x128xf32>
    %129 = arith.addf %126, %128 : vector<1x128xf32>
    %c5_123 = arith.constant 5 : index
    %c0_124 = arith.constant 0 : index
    %c0_125 = arith.constant 0 : index
    %130 = vector.load %arg8[%c5_123, %c0_124, %c0_125] : memref<6x2x128xf32, #tpu.memory_space<vmem>>, vector<1x1x128xf32>
    %131 = vector.shape_cast %130 : vector<1x1x128xf32> to vector<1x128xf32>
    %132 = vector.shape_cast %129 : vector<1x128xf32> to vector<1x1x128xf32>
    tpu.vector_store %arg8[%c5_123, %c0_124, %c0_125], %132 {strides = array<i32>} : memref<6x2x128xf32, #tpu.memory_space<vmem>>, vector<1x1x128xf32>,
    %c1_126 = arith.constant 1 : index
    %c0_127 = arith.constant 0 : index
    %c0_128 = arith.constant 0 : index
    %133 = vector.load %arg1[%c1_126, %c0_127, %c0_128] : memref<2x32x48xf32, #tpu.memory_space<vmem>>, vector<1x32x48xf32>
    %134 = vector.shape_cast %133 : vector<1x32x48xf32> to vector<32x48xf32>
    %c0_129 = arith.constant 0 : index
    %c0_130 = arith.constant 0 : index
    %135 = vector.load %arg2[%c0_129, %c0_130] : memref<48x6xf32, #tpu.memory_space<vmem>>, vector<48x6xf32>
    %cst_131 = arith.constant dense<0.000000e+00> : vector<32x6xf32>
    %136 = tpu.matmul %134, %135, %cst_131 {dimension_numbers = #tpu.dot_dimension_numbers<[1], [0], [0], [1], [0, 0, 1, 1], [], []>} : vector<32x48xf32>, vector<48x6xf32>, vector<32x6xf32> -> vector<32x6xf32>
    %137 = tpu.transpose %136, [1, 0] : vector<32x6xf32> -> vector<6x32xf32>
    %cst_132 = arith.constant 1.250000e-01 : f32
    %138 = vector.broadcast %cst_132 : f32 to vector<6x32xf32>
    %139 = arith.mulf %137, %138 : vector<6x32xf32>
    %140 = vector.extract_strided_slice %139 {offsets = [0, 0], sizes = [1, 32], strides = [1, 1]} : vector<6x32xf32> to vector<1x32xf32>
    %c0_133 = arith.constant 0 : index
    %c0_134 = arith.constant 0 : index
    %c0_135 = arith.constant 0 : index
    %141 = vector.load %arg3[%c0_133, %c0_134, %c0_135] : memref<6x32x16xf32, #tpu.memory_space<vmem>>, vector<1x32x16xf32>
    %142 = vector.shape_cast %141 : vector<1x32x16xf32> to vector<32x16xf32>
    %cst_136 = arith.constant dense<0.000000e+00> : vector<1x16xf32>
    %143 = tpu.matmul %140, %142, %cst_136 {dimension_numbers = #tpu.dot_dimension_numbers<[1], [0], [0], [1], [0, 0, 1, 1], [], []>} : vector<1x32xf32>, vector<32x16xf32>, vector<1x16xf32> -> vector<1x16xf32>
    %c0_137 = arith.constant 0 : index
    %c0_138 = arith.constant 0 : index
    %c0_139 = arith.constant 0 : index
    %144 = vector.load %arg4[%c0_137, %c0_138, %c0_139] : memref<6x1x16xf32, #tpu.memory_space<vmem>>, vector<1x1x16xf32>
    %145 = vector.shape_cast %144 : vector<1x1x16xf32> to vector<1x16xf32>
    %146 = arith.mulf %143, %145 : vector<1x16xf32>
    %c0_140 = arith.constant 0 : index
    %c0_141 = arith.constant 0 : index
    %c0_142 = arith.constant 0 : index
    %147 = vector.load %arg5[%c0_140, %c0_141, %c0_142] : memref<6x1x16xf32, #tpu.memory_space<vmem>>, vector<1x1x16xf32>
    %148 = vector.shape_cast %147 : vector<1x1x16xf32> to vector<1x16xf32>
    %149 = arith.addf %146, %148 : vector<1x16xf32>
    %cst_143 = arith.constant 0.000000e+00 : f32
    %150 = vector.broadcast %cst_143 : f32 to vector<1x16xf32>
    %151 = arith.maximumf %149, %150 : vector<1x16xf32>
    %c0_144 = arith.constant 0 : index
    %c0_145 = arith.constant 0 : index
    %c0_146 = arith.constant 0 : index
    %152 = vector.load %arg6[%c0_144, %c0_145, %c0_146] : memref<6x16x128xf32, #tpu.memory_space<vmem>>, vector<1x16x128xf32>
    %153 = vector.shape_cast %152 : vector<1x16x128xf32> to vector<16x128xf32>
    %cst_147 = arith.constant dense<0.000000e+00> : vector<1x128xf32>
    %154 = tpu.matmul %151, %153, %cst_147 {dimension_numbers = #tpu.dot_dimension_numbers<[1], [0], [0], [1], [0, 0, 1, 1], [], []>} : vector<1x16xf32>, vector<16x128xf32>, vector<1x128xf32> -> vector<1x128xf32>
    %c0_148 = arith.constant 0 : index
    %c0_149 = arith.constant 0 : index
    %c0_150 = arith.constant 0 : index
    %155 = vector.load %arg7[%c0_148, %c0_149, %c0_150] : memref<6x1x128xf32, #tpu.memory_space<vmem>>, vector<1x1x128xf32>
    %156 = vector.shape_cast %155 : vector<1x1x128xf32> to vector<1x128xf32>
    %157 = arith.addf %154, %156 : vector<1x128xf32>
    %c0_151 = arith.constant 0 : index
    %c1_152 = arith.constant 1 : index
    %c0_153 = arith.constant 0 : index
    %158 = vector.load %arg8[%c0_151, %c1_152, %c0_153] : memref<6x2x128xf32, #tpu.memory_space<vmem>>, vector<1x1x128xf32>
    %159 = vector.shape_cast %158 : vector<1x1x128xf32> to vector<1x128xf32>
    %160 = vector.shape_cast %157 : vector<1x128xf32> to vector<1x1x128xf32>
    tpu.vector_store %arg8[%c0_151, %c1_152, %c0_153], %160 {strides = array<i32>} : memref<6x2x128xf32, #tpu.memory_space<vmem>>, vector<1x1x128xf32>,
    %161 = vector.extract_strided_slice %139 {offsets = [1, 0], sizes = [1, 32], strides = [1, 1]} : vector<6x32xf32> to vector<1x32xf32>
    %c1_154 = arith.constant 1 : index
    %c0_155 = arith.constant 0 : index
    %c0_156 = arith.constant 0 : index
    %162 = vector.load %arg3[%c1_154, %c0_155, %c0_156] : memref<6x32x16xf32, #tpu.memory_space<vmem>>, vector<1x32x16xf32>
    %163 = vector.shape_cast %162 : vector<1x32x16xf32> to vector<32x16xf32>
    %cst_157 = arith.constant dense<0.000000e+00> : vector<1x16xf32>
    %164 = tpu.matmul %161, %163, %cst_157 {dimension_numbers = #tpu.dot_dimension_numbers<[1], [0], [0], [1], [0, 0, 1, 1], [], []>} : vector<1x32xf32>, vector<32x16xf32>, vector<1x16xf32> -> vector<1x16xf32>
    %c1_158 = arith.constant 1 : index
    %c0_159 = arith.constant 0 : index
    %c0_160 = arith.constant 0 : index
    %165 = vector.load %arg4[%c1_158, %c0_159, %c0_160] : memref<6x1x16xf32, #tpu.memory_space<vmem>>, vector<1x1x16xf32>
    %166 = vector.shape_cast %165 : vector<1x1x16xf32> to vector<1x16xf32>
    %167 = arith.mulf %164, %166 : vector<1x16xf32>
    %c1_161 = arith.constant 1 : index
    %c0_162 = arith.constant 0 : index
    %c0_163 = arith.constant 0 : index
    %168 = vector.load %arg5[%c1_161, %c0_162, %c0_163] : memref<6x1x16xf32, #tpu.memory_space<vmem>>, vector<1x1x16xf32>
    %169 = vector.shape_cast %168 : vector<1x1x16xf32> to vector<1x16xf32>
    %170 = arith.addf %167, %169 : vector<1x16xf32>
    %cst_164 = arith.constant 0.000000e+00 : f32
    %171 = vector.broadcast %cst_164 : f32 to vector<1x16xf32>
    %172 = arith.maximumf %170, %171 : vector<1x16xf32>
    %c1_165 = arith.constant 1 : index
    %c0_166 = arith.constant 0 : index
    %c0_167 = arith.constant 0 : index
    %173 = vector.load %arg6[%c1_165, %c0_166, %c0_167] : memref<6x16x128xf32, #tpu.memory_space<vmem>>, vector<1x16x128xf32>
    %174 = vector.shape_cast %173 : vector<1x16x128xf32> to vector<16x128xf32>
    %cst_168 = arith.constant dense<0.000000e+00> : vector<1x128xf32>
    %175 = tpu.matmul %172, %174, %cst_168 {dimension_numbers = #tpu.dot_dimension_numbers<[1], [0], [0], [1], [0, 0, 1, 1], [], []>} : vector<1x16xf32>, vector<16x128xf32>, vector<1x128xf32> -> vector<1x128xf32>
    %c1_169 = arith.constant 1 : index
    %c0_170 = arith.constant 0 : index
    %c0_171 = arith.constant 0 : index
    %176 = vector.load %arg7[%c1_169, %c0_170, %c0_171] : memref<6x1x128xf32, #tpu.memory_space<vmem>>, vector<1x1x128xf32>
    %177 = vector.shape_cast %176 : vector<1x1x128xf32> to vector<1x128xf32>
    %178 = arith.addf %175, %177 : vector<1x128xf32>
    %c1_172 = arith.constant 1 : index
    %c1_173 = arith.constant 1 : index
    %c0_174 = arith.constant 0 : index
    %179 = vector.load %arg8[%c1_172, %c1_173, %c0_174] : memref<6x2x128xf32, #tpu.memory_space<vmem>>, vector<1x1x128xf32>
    %180 = vector.shape_cast %179 : vector<1x1x128xf32> to vector<1x128xf32>
    %181 = vector.shape_cast %178 : vector<1x128xf32> to vector<1x1x128xf32>
    tpu.vector_store %arg8[%c1_172, %c1_173, %c0_174], %181 {strides = array<i32>} : memref<6x2x128xf32, #tpu.memory_space<vmem>>, vector<1x1x128xf32>,
    %182 = vector.extract_strided_slice %139 {offsets = [2, 0], sizes = [1, 32], strides = [1, 1]} : vector<6x32xf32> to vector<1x32xf32>
    %c2_175 = arith.constant 2 : index
    %c0_176 = arith.constant 0 : index
    %c0_177 = arith.constant 0 : index
    %183 = vector.load %arg3[%c2_175, %c0_176, %c0_177] : memref<6x32x16xf32, #tpu.memory_space<vmem>>, vector<1x32x16xf32>
    %184 = vector.shape_cast %183 : vector<1x32x16xf32> to vector<32x16xf32>
    %cst_178 = arith.constant dense<0.000000e+00> : vector<1x16xf32>
    %185 = tpu.matmul %182, %184, %cst_178 {dimension_numbers = #tpu.dot_dimension_numbers<[1], [0], [0], [1], [0, 0, 1, 1], [], []>} : vector<1x32xf32>, vector<32x16xf32>, vector<1x16xf32> -> vector<1x16xf32>
    %c2_179 = arith.constant 2 : index
    %c0_180 = arith.constant 0 : index
    %c0_181 = arith.constant 0 : index
    %186 = vector.load %arg4[%c2_179, %c0_180, %c0_181] : memref<6x1x16xf32, #tpu.memory_space<vmem>>, vector<1x1x16xf32>
    %187 = vector.shape_cast %186 : vector<1x1x16xf32> to vector<1x16xf32>
    %188 = arith.mulf %185, %187 : vector<1x16xf32>
    %c2_182 = arith.constant 2 : index
    %c0_183 = arith.constant 0 : index
    %c0_184 = arith.constant 0 : index
    %189 = vector.load %arg5[%c2_182, %c0_183, %c0_184] : memref<6x1x16xf32, #tpu.memory_space<vmem>>, vector<1x1x16xf32>
    %190 = vector.shape_cast %189 : vector<1x1x16xf32> to vector<1x16xf32>
    %191 = arith.addf %188, %190 : vector<1x16xf32>
    %cst_185 = arith.constant 0.000000e+00 : f32
    %192 = vector.broadcast %cst_185 : f32 to vector<1x16xf32>
    %193 = arith.maximumf %191, %192 : vector<1x16xf32>
    %c2_186 = arith.constant 2 : index
    %c0_187 = arith.constant 0 : index
    %c0_188 = arith.constant 0 : index
    %194 = vector.load %arg6[%c2_186, %c0_187, %c0_188] : memref<6x16x128xf32, #tpu.memory_space<vmem>>, vector<1x16x128xf32>
    %195 = vector.shape_cast %194 : vector<1x16x128xf32> to vector<16x128xf32>
    %cst_189 = arith.constant dense<0.000000e+00> : vector<1x128xf32>
    %196 = tpu.matmul %193, %195, %cst_189 {dimension_numbers = #tpu.dot_dimension_numbers<[1], [0], [0], [1], [0, 0, 1, 1], [], []>} : vector<1x16xf32>, vector<16x128xf32>, vector<1x128xf32> -> vector<1x128xf32>
    %c2_190 = arith.constant 2 : index
    %c0_191 = arith.constant 0 : index
    %c0_192 = arith.constant 0 : index
    %197 = vector.load %arg7[%c2_190, %c0_191, %c0_192] : memref<6x1x128xf32, #tpu.memory_space<vmem>>, vector<1x1x128xf32>
    %198 = vector.shape_cast %197 : vector<1x1x128xf32> to vector<1x128xf32>
    %199 = arith.addf %196, %198 : vector<1x128xf32>
    %c2_193 = arith.constant 2 : index
    %c1_194 = arith.constant 1 : index
    %c0_195 = arith.constant 0 : index
    %200 = vector.load %arg8[%c2_193, %c1_194, %c0_195] : memref<6x2x128xf32, #tpu.memory_space<vmem>>, vector<1x1x128xf32>
    %201 = vector.shape_cast %200 : vector<1x1x128xf32> to vector<1x128xf32>
    %202 = vector.shape_cast %199 : vector<1x128xf32> to vector<1x1x128xf32>
    tpu.vector_store %arg8[%c2_193, %c1_194, %c0_195], %202 {strides = array<i32>} : memref<6x2x128xf32, #tpu.memory_space<vmem>>, vector<1x1x128xf32>,
    %203 = vector.extract_strided_slice %139 {offsets = [3, 0], sizes = [1, 32], strides = [1, 1]} : vector<6x32xf32> to vector<1x32xf32>
    %c3_196 = arith.constant 3 : index
    %c0_197 = arith.constant 0 : index
    %c0_198 = arith.constant 0 : index
    %204 = vector.load %arg3[%c3_196, %c0_197, %c0_198] : memref<6x32x16xf32, #tpu.memory_space<vmem>>, vector<1x32x16xf32>
    %205 = vector.shape_cast %204 : vector<1x32x16xf32> to vector<32x16xf32>
    %cst_199 = arith.constant dense<0.000000e+00> : vector<1x16xf32>
    %206 = tpu.matmul %203, %205, %cst_199 {dimension_numbers = #tpu.dot_dimension_numbers<[1], [0], [0], [1], [0, 0, 1, 1], [], []>} : vector<1x32xf32>, vector<32x16xf32>, vector<1x16xf32> -> vector<1x16xf32>
    %c3_200 = arith.constant 3 : index
    %c0_201 = arith.constant 0 : index
    %c0_202 = arith.constant 0 : index
    %207 = vector.load %arg4[%c3_200, %c0_201, %c0_202] : memref<6x1x16xf32, #tpu.memory_space<vmem>>, vector<1x1x16xf32>
    %208 = vector.shape_cast %207 : vector<1x1x16xf32> to vector<1x16xf32>
    %209 = arith.mulf %206, %208 : vector<1x16xf32>
    %c3_203 = arith.constant 3 : index
    %c0_204 = arith.constant 0 : index
    %c0_205 = arith.constant 0 : index
    %210 = vector.load %arg5[%c3_203, %c0_204, %c0_205] : memref<6x1x16xf32, #tpu.memory_space<vmem>>, vector<1x1x16xf32>
    %211 = vector.shape_cast %210 : vector<1x1x16xf32> to vector<1x16xf32>
    %212 = arith.addf %209, %211 : vector<1x16xf32>
    %cst_206 = arith.constant 0.000000e+00 : f32
    %213 = vector.broadcast %cst_206 : f32 to vector<1x16xf32>
    %214 = arith.maximumf %212, %213 : vector<1x16xf32>
    %c3_207 = arith.constant 3 : index
    %c0_208 = arith.constant 0 : index
    %c0_209 = arith.constant 0 : index
    %215 = vector.load %arg6[%c3_207, %c0_208, %c0_209] : memref<6x16x128xf32, #tpu.memory_space<vmem>>, vector<1x16x128xf32>
    %216 = vector.shape_cast %215 : vector<1x16x128xf32> to vector<16x128xf32>
    %cst_210 = arith.constant dense<0.000000e+00> : vector<1x128xf32>
    %217 = tpu.matmul %214, %216, %cst_210 {dimension_numbers = #tpu.dot_dimension_numbers<[1], [0], [0], [1], [0, 0, 1, 1], [], []>} : vector<1x16xf32>, vector<16x128xf32>, vector<1x128xf32> -> vector<1x128xf32>
    %c3_211 = arith.constant 3 : index
    %c0_212 = arith.constant 0 : index
    %c0_213 = arith.constant 0 : index
    %218 = vector.load %arg7[%c3_211, %c0_212, %c0_213] : memref<6x1x128xf32, #tpu.memory_space<vmem>>, vector<1x1x128xf32>
    %219 = vector.shape_cast %218 : vector<1x1x128xf32> to vector<1x128xf32>
    %220 = arith.addf %217, %219 : vector<1x128xf32>
    %c3_214 = arith.constant 3 : index
    %c1_215 = arith.constant 1 : index
    %c0_216 = arith.constant 0 : index
    %221 = vector.load %arg8[%c3_214, %c1_215, %c0_216] : memref<6x2x128xf32, #tpu.memory_space<vmem>>, vector<1x1x128xf32>
    %222 = vector.shape_cast %221 : vector<1x1x128xf32> to vector<1x128xf32>
    %223 = vector.shape_cast %220 : vector<1x128xf32> to vector<1x1x128xf32>
    tpu.vector_store %arg8[%c3_214, %c1_215, %c0_216], %223 {strides = array<i32>} : memref<6x2x128xf32, #tpu.memory_space<vmem>>, vector<1x1x128xf32>,
    %224 = vector.extract_strided_slice %139 {offsets = [4, 0], sizes = [1, 32], strides = [1, 1]} : vector<6x32xf32> to vector<1x32xf32>
    %c4_217 = arith.constant 4 : index
    %c0_218 = arith.constant 0 : index
    %c0_219 = arith.constant 0 : index
    %225 = vector.load %arg3[%c4_217, %c0_218, %c0_219] : memref<6x32x16xf32, #tpu.memory_space<vmem>>, vector<1x32x16xf32>
    %226 = vector.shape_cast %225 : vector<1x32x16xf32> to vector<32x16xf32>
    %cst_220 = arith.constant dense<0.000000e+00> : vector<1x16xf32>
    %227 = tpu.matmul %224, %226, %cst_220 {dimension_numbers = #tpu.dot_dimension_numbers<[1], [0], [0], [1], [0, 0, 1, 1], [], []>} : vector<1x32xf32>, vector<32x16xf32>, vector<1x16xf32> -> vector<1x16xf32>
    %c4_221 = arith.constant 4 : index
    %c0_222 = arith.constant 0 : index
    %c0_223 = arith.constant 0 : index
    %228 = vector.load %arg4[%c4_221, %c0_222, %c0_223] : memref<6x1x16xf32, #tpu.memory_space<vmem>>, vector<1x1x16xf32>
    %229 = vector.shape_cast %228 : vector<1x1x16xf32> to vector<1x16xf32>
    %230 = arith.mulf %227, %229 : vector<1x16xf32>
    %c4_224 = arith.constant 4 : index
    %c0_225 = arith.constant 0 : index
    %c0_226 = arith.constant 0 : index
    %231 = vector.load %arg5[%c4_224, %c0_225, %c0_226] : memref<6x1x16xf32, #tpu.memory_space<vmem>>, vector<1x1x16xf32>
    %232 = vector.shape_cast %231 : vector<1x1x16xf32> to vector<1x16xf32>
    %233 = arith.addf %230, %232 : vector<1x16xf32>
    %cst_227 = arith.constant 0.000000e+00 : f32
    %234 = vector.broadcast %cst_227 : f32 to vector<1x16xf32>
    %235 = arith.maximumf %233, %234 : vector<1x16xf32>
    %c4_228 = arith.constant 4 : index
    %c0_229 = arith.constant 0 : index
    %c0_230 = arith.constant 0 : index
    %236 = vector.load %arg6[%c4_228, %c0_229, %c0_230] : memref<6x16x128xf32, #tpu.memory_space<vmem>>, vector<1x16x128xf32>
    %237 = vector.shape_cast %236 : vector<1x16x128xf32> to vector<16x128xf32>
    %cst_231 = arith.constant dense<0.000000e+00> : vector<1x128xf32>
    %238 = tpu.matmul %235, %237, %cst_231 {dimension_numbers = #tpu.dot_dimension_numbers<[1], [0], [0], [1], [0, 0, 1, 1], [], []>} : vector<1x16xf32>, vector<16x128xf32>, vector<1x128xf32> -> vector<1x128xf32>
    %c4_232 = arith.constant 4 : index
    %c0_233 = arith.constant 0 : index
    %c0_234 = arith.constant 0 : index
    %239 = vector.load %arg7[%c4_232, %c0_233, %c0_234] : memref<6x1x128xf32, #tpu.memory_space<vmem>>, vector<1x1x128xf32>
    %240 = vector.shape_cast %239 : vector<1x1x128xf32> to vector<1x128xf32>
    %241 = arith.addf %238, %240 : vector<1x128xf32>
    %c4_235 = arith.constant 4 : index
    %c1_236 = arith.constant 1 : index
    %c0_237 = arith.constant 0 : index
    %242 = vector.load %arg8[%c4_235, %c1_236, %c0_237] : memref<6x2x128xf32, #tpu.memory_space<vmem>>, vector<1x1x128xf32>
    %243 = vector.shape_cast %242 : vector<1x1x128xf32> to vector<1x128xf32>
    %244 = vector.shape_cast %241 : vector<1x128xf32> to vector<1x1x128xf32>
    tpu.vector_store %arg8[%c4_235, %c1_236, %c0_237], %244 {strides = array<i32>} : memref<6x2x128xf32, #tpu.memory_space<vmem>>, vector<1x1x128xf32>,
    %245 = vector.extract_strided_slice %139 {offsets = [5, 0], sizes = [1, 32], strides = [1, 1]} : vector<6x32xf32> to vector<1x32xf32>
    %c5_238 = arith.constant 5 : index
    %c0_239 = arith.constant 0 : index
    %c0_240 = arith.constant 0 : index
    %246 = vector.load %arg3[%c5_238, %c0_239, %c0_240] : memref<6x32x16xf32, #tpu.memory_space<vmem>>, vector<1x32x16xf32>
    %247 = vector.shape_cast %246 : vector<1x32x16xf32> to vector<32x16xf32>
    %cst_241 = arith.constant dense<0.000000e+00> : vector<1x16xf32>
    %248 = tpu.matmul %245, %247, %cst_241 {dimension_numbers = #tpu.dot_dimension_numbers<[1], [0], [0], [1], [0, 0, 1, 1], [], []>} : vector<1x32xf32>, vector<32x16xf32>, vector<1x16xf32> -> vector<1x16xf32>
    %c5_242 = arith.constant 5 : index
    %c0_243 = arith.constant 0 : index
    %c0_244 = arith.constant 0 : index
    %249 = vector.load %arg4[%c5_242, %c0_243, %c0_244] : memref<6x1x16xf32, #tpu.memory_space<vmem>>, vector<1x1x16xf32>
    %250 = vector.shape_cast %249 : vector<1x1x16xf32> to vector<1x16xf32>
    %251 = arith.mulf %248, %250 : vector<1x16xf32>
    %c5_245 = arith.constant 5 : index
    %c0_246 = arith.constant 0 : index
    %c0_247 = arith.constant 0 : index
    %252 = vector.load %arg5[%c5_245, %c0_246, %c0_247] : memref<6x1x16xf32, #tpu.memory_space<vmem>>, vector<1x1x16xf32>
    %253 = vector.shape_cast %252 : vector<1x1x16xf32> to vector<1x16xf32>
    %254 = arith.addf %251, %253 : vector<1x16xf32>
    %cst_248 = arith.constant 0.000000e+00 : f32
    %255 = vector.broadcast %cst_248 : f32 to vector<1x16xf32>
    %256 = arith.maximumf %254, %255 : vector<1x16xf32>
    %c5_249 = arith.constant 5 : index
    %c0_250 = arith.constant 0 : index
    %c0_251 = arith.constant 0 : index
    %257 = vector.load %arg6[%c5_249, %c0_250, %c0_251] : memref<6x16x128xf32, #tpu.memory_space<vmem>>, vector<1x16x128xf32>
    %258 = vector.shape_cast %257 : vector<1x16x128xf32> to vector<16x128xf32>
    %cst_252 = arith.constant dense<0.000000e+00> : vector<1x128xf32>
    %259 = tpu.matmul %256, %258, %cst_252 {dimension_numbers = #tpu.dot_dimension_numbers<[1], [0], [0], [1], [0, 0, 1, 1], [], []>} : vector<1x16xf32>, vector<16x128xf32>, vector<1x128xf32> -> vector<1x128xf32>
    %c5_253 = arith.constant 5 : index
    %c0_254 = arith.constant 0 : index
    %c0_255 = arith.constant 0 : index
    %260 = vector.load %arg7[%c5_253, %c0_254, %c0_255] : memref<6x1x128xf32, #tpu.memory_space<vmem>>, vector<1x1x128xf32>
    %261 = vector.shape_cast %260 : vector<1x1x128xf32> to vector<1x128xf32>
    %262 = arith.addf %259, %261 : vector<1x128xf32>
    %c5_256 = arith.constant 5 : index
    %c1_257 = arith.constant 1 : index
    %c0_258 = arith.constant 0 : index
    %263 = vector.load %arg8[%c5_256, %c1_257, %c0_258] : memref<6x2x128xf32, #tpu.memory_space<vmem>>, vector<1x1x128xf32>
    %264 = vector.shape_cast %263 : vector<1x1x128xf32> to vector<1x128xf32>
    %265 = vector.shape_cast %262 : vector<1x128xf32> to vector<1x1x128xf32>
    tpu.vector_store %arg8[%c5_256, %c1_257, %c0_258], %265 {strides = array<i32>} : memref<6x2x128xf32, #tpu.memory_space<vmem>>, vector<1x1x128xf32>,
    return
  }
  func.func @transform_0(%arg0: i32) -> (i32, i32, i32) {
    %c0_i32 = arith.constant 0 : i32
    %c0_i32_0 = arith.constant 0 : i32
    %c0_i32_1 = arith.constant 0 : i32
    return %arg0, %c0_i32, %c0_i32_0 : i32, i32, i32
  }
  func.func @transform_1(%arg0: i32) -> (i32, i32) {
    %c0_i32 = arith.constant 0 : i32
    %c0_i32_0 = arith.constant 0 : i32
    %c0_i32_1 = arith.constant 0 : i32
    return %c0_i32, %c0_i32_0 : i32, i32
  }
  func.func @transform_2(%arg0: i32) -> (i32, i32, i32) {
    %c0_i32 = arith.constant 0 : i32
    %c0_i32_0 = arith.constant 0 : i32
    %c0_i32_1 = arith.constant 0 : i32
    %c0_i32_2 = arith.constant 0 : i32
    return %c0_i32, %c0_i32_0, %c0_i32_1 : i32, i32, i32
  }
  func.func @transform_3(%arg0: i32) -> (i32, i32, i32) {
    %c0_i32 = arith.constant 0 : i32
    %c0_i32_0 = arith.constant 0 : i32
    %c0_i32_1 = arith.constant 0 : i32
    %c0_i32_2 = arith.constant 0 : i32
    return %c0_i32, %c0_i32_0, %c0_i32_1 : i32, i32, i32
  }
  func.func @transform_4(%arg0: i32) -> (i32, i32, i32) {
    %c0_i32 = arith.constant 0 : i32
    %c0_i32_0 = arith.constant 0 : i32
    %c0_i32_1 = arith.constant 0 : i32
    %c0_i32_2 = arith.constant 0 : i32
    return %c0_i32, %c0_i32_0, %c0_i32_1 : i32, i32, i32
  }
  func.func @transform_5(%arg0: i32) -> (i32, i32, i32) {
    %c0_i32 = arith.constant 0 : i32
    %c0_i32_0 = arith.constant 0 : i32
    %c0_i32_1 = arith.constant 0 : i32
    %c0_i32_2 = arith.constant 0 : i32
    return %c0_i32, %c0_i32_0, %c0_i32_1 : i32, i32, i32
  }
  func.func @transform_6(%arg0: i32) -> (i32, i32, i32) {
    %c0_i32 = arith.constant 0 : i32
    %c0_i32_0 = arith.constant 0 : i32
    %c0_i32_1 = arith.constant 0 : i32
    %c0_i32_2 = arith.constant 0 : i32
    return %c0_i32, %c0_i32_0, %c0_i32_1 : i32, i32, i32
  }
  func.func @transform_7(%arg0: i32) -> (i32, i32, i32) {
    %c0_i32 = arith.constant 0 : i32
    %c0_i32_0 = arith.constant 0 : i32
    %c0_i32_1 = arith.constant 0 : i32
    return %c0_i32, %arg0, %c0_i32_0 : i32, i32, i32
  }
}

module attributes {stable_mosaic.version = 11 : i64} {
  func.func @_pcb_kernel_fused(%arg0: i32, %arg1: memref<2x32x48xf32, #tpu.memory_space<vmem>>, %arg2: memref<48x6xf32, #tpu.memory_space<vmem>>, %arg3: memref<6x32x16xf32, #tpu.memory_space<vmem>>, %arg4: memref<6x1x16xf32, #tpu.memory_space<vmem>>, %arg5: memref<6x1x16xf32, #tpu.memory_space<vmem>>, %arg6: memref<6x16x128xf32, #tpu.memory_space<vmem>>, %arg7: memref<6x1x128xf32, #tpu.memory_space<vmem>>, %arg8: memref<6x2x128xf32, #tpu.memory_space<vmem>>) attributes {dimension_semantics = [#tpu.dimension_semantics<parallel>], iteration_bounds = array<i64: 1>, scalar_prefetch = 0 : i64, scratch_operands = 0 : i64, tpu.core_type = #tpu.core_type<tc>, window_params = [{transform_indices = @transform_0, window_bounds = array<i64: 2, 32, 48>}, {pipeline_mode = #tpu.pipeline_mode<synchronous>, transform_indices = @transform_1, window_bounds = array<i64: 48, 6>}, {pipeline_mode = #tpu.pipeline_mode<synchronous>, transform_indices = @transform_2, window_bounds = array<i64: 6, 32, 16>}, {pipeline_mode = #tpu.pipeline_mode<synchronous>, transform_indices = @transform_3, window_bounds = array<i64: 6, 1, 16>}, {pipeline_mode = #tpu.pipeline_mode<synchronous>, transform_indices = @transform_4, window_bounds = array<i64: 6, 1, 16>}, {pipeline_mode = #tpu.pipeline_mode<synchronous>, transform_indices = @transform_5, window_bounds = array<i64: 6, 16, 128>}, {pipeline_mode = #tpu.pipeline_mode<synchronous>, transform_indices = @transform_6, window_bounds = array<i64: 6, 1, 128>}, {transform_indices = @transform_7, window_bounds = array<i64: 6, 2, 128>}]} {
    %c0 = arith.constant 0 : index
    %c0_0 = arith.constant 0 : index
    %c0_1 = arith.constant 0 : index
    %0 = vector.load %arg1[%c0, %c0_0, %c0_1] : memref<2x32x48xf32, #tpu.memory_space<vmem>>, vector<1x32x48xf32>
    %1 = vector.shape_cast %0 : vector<1x32x48xf32> to vector<32x48xf32>
    %c0_2 = arith.constant 0 : index
    %c0_3 = arith.constant 0 : index
    %2 = vector.load %arg2[%c0_2, %c0_3] : memref<48x6xf32, #tpu.memory_space<vmem>>, vector<48x6xf32>
    %cst = arith.constant dense<0.000000e+00> : vector<32x6xf32>
    %3 = tpu.matmul %1, %2, %cst {dimension_numbers = #tpu.dot_dimension_numbers<[1], [0], [0], [1], [0, 0, 1, 1], [], []>} : vector<32x48xf32>, vector<48x6xf32>, vector<32x6xf32> -> vector<32x6xf32>
    %4 = tpu.transpose %3, [1, 0] : vector<32x6xf32> -> vector<6x32xf32>
    %cst_4 = arith.constant 1.250000e-01 : f32
    %5 = vector.broadcast %cst_4 : f32 to vector<6x32xf32>
    %6 = arith.mulf %4, %5 : vector<6x32xf32>
    %7 = vector.extract_strided_slice %6 {offsets = [0, 0], sizes = [1, 32], strides = [1, 1]} : vector<6x32xf32> to vector<1x32xf32>
    %c0_5 = arith.constant 0 : index
    %c0_6 = arith.constant 0 : index
    %c0_7 = arith.constant 0 : index
    %8 = vector.load %arg3[%c0_5, %c0_6, %c0_7] : memref<6x32x16xf32, #tpu.memory_space<vmem>>, vector<1x32x16xf32>
    %9 = vector.shape_cast %8 : vector<1x32x16xf32> to vector<32x16xf32>
    %cst_8 = arith.constant dense<0.000000e+00> : vector<1x16xf32>
    %10 = tpu.matmul %7, %9, %cst_8 {dimension_numbers = #tpu.dot_dimension_numbers<[1], [0], [0], [1], [0, 0, 1, 1], [], []>} : vector<1x32xf32>, vector<32x16xf32>, vector<1x16xf32> -> vector<1x16xf32>
    %c0_9 = arith.constant 0 : index
    %c0_10 = arith.constant 0 : index
    %c0_11 = arith.constant 0 : index
    %11 = vector.load %arg4[%c0_9, %c0_10, %c0_11] : memref<6x1x16xf32, #tpu.memory_space<vmem>>, vector<1x1x16xf32>
    %12 = vector.shape_cast %11 : vector<1x1x16xf32> to vector<1x16xf32>
    %13 = arith.mulf %10, %12 : vector<1x16xf32>
    %c0_12 = arith.constant 0 : index
    %c0_13 = arith.constant 0 : index
    %c0_14 = arith.constant 0 : index
    %14 = vector.load %arg5[%c0_12, %c0_13, %c0_14] : memref<6x1x16xf32, #tpu.memory_space<vmem>>, vector<1x1x16xf32>
    %15 = vector.shape_cast %14 : vector<1x1x16xf32> to vector<1x16xf32>
    %16 = arith.addf %13, %15 : vector<1x16xf32>
    %cst_15 = arith.constant 0.000000e+00 : f32
    %17 = vector.broadcast %cst_15 : f32 to vector<1x16xf32>
    %18 = arith.maximumf %16, %17 : vector<1x16xf32>
    %c0_16 = arith.constant 0 : index
    %c0_17 = arith.constant 0 : index
    %c0_18 = arith.constant 0 : index
    %19 = vector.load %arg6[%c0_16, %c0_17, %c0_18] : memref<6x16x128xf32, #tpu.memory_space<vmem>>, vector<1x16x128xf32>
    %20 = vector.shape_cast %19 : vector<1x16x128xf32> to vector<16x128xf32>
    %cst_19 = arith.constant dense<0.000000e+00> : vector<1x128xf32>
    %21 = tpu.matmul %18, %20, %cst_19 {dimension_numbers = #tpu.dot_dimension_numbers<[1], [0], [0], [1], [0, 0, 1, 1], [], []>} : vector<1x16xf32>, vector<16x128xf32>, vector<1x128xf32> -> vector<1x128xf32>
    %c0_20 = arith.constant 0 : index
    %c0_21 = arith.constant 0 : index
    %c0_22 = arith.constant 0 : index
    %22 = vector.load %arg7[%c0_20, %c0_21, %c0_22] : memref<6x1x128xf32, #tpu.memory_space<vmem>>, vector<1x1x128xf32>
    %23 = vector.shape_cast %22 : vector<1x1x128xf32> to vector<1x128xf32>
    %24 = arith.addf %21, %23 : vector<1x128xf32>
    %c0_23 = arith.constant 0 : index
    %c0_24 = arith.constant 0 : index
    %c0_25 = arith.constant 0 : index
    %25 = vector.load %arg8[%c0_23, %c0_24, %c0_25] : memref<6x2x128xf32, #tpu.memory_space<vmem>>, vector<1x1x128xf32>
    %26 = vector.shape_cast %25 : vector<1x1x128xf32> to vector<1x128xf32>
    %27 = vector.shape_cast %24 : vector<1x128xf32> to vector<1x1x128xf32>
    tpu.vector_store %arg8[%c0_23, %c0_24, %c0_25], %27 {strides = array<i32>} : memref<6x2x128xf32, #tpu.memory_space<vmem>>, vector<1x1x128xf32>,
    %28 = vector.extract_strided_slice %6 {offsets = [1, 0], sizes = [1, 32], strides = [1, 1]} : vector<6x32xf32> to vector<1x32xf32>
    %c1 = arith.constant 1 : index
    %c0_26 = arith.constant 0 : index
    %c0_27 = arith.constant 0 : index
    %29 = vector.load %arg3[%c1, %c0_26, %c0_27] : memref<6x32x16xf32, #tpu.memory_space<vmem>>, vector<1x32x16xf32>
    %30 = vector.shape_cast %29 : vector<1x32x16xf32> to vector<32x16xf32>
    %cst_28 = arith.constant dense<0.000000e+00> : vector<1x16xf32>
    %31 = tpu.matmul %28, %30, %cst_28 {dimension_numbers = #tpu.dot_dimension_numbers<[1], [0], [0], [1], [0, 0, 1, 1], [], []>} : vector<1x32xf32>, vector<32x16xf32>, vector<1x16xf32> -> vector<1x16xf32>
    %c1_29 = arith.constant 1 : index
    %c0_30 = arith.constant 0 : index
    %c0_31 = arith.constant 0 : index
    %32 = vector.load %arg4[%c1_29, %c0_30, %c0_31] : memref<6x1x16xf32, #tpu.memory_space<vmem>>, vector<1x1x16xf32>
    %33 = vector.shape_cast %32 : vector<1x1x16xf32> to vector<1x16xf32>
    %34 = arith.mulf %31, %33 : vector<1x16xf32>
    %c1_32 = arith.constant 1 : index
    %c0_33 = arith.constant 0 : index
    %c0_34 = arith.constant 0 : index
    %35 = vector.load %arg5[%c1_32, %c0_33, %c0_34] : memref<6x1x16xf32, #tpu.memory_space<vmem>>, vector<1x1x16xf32>
    %36 = vector.shape_cast %35 : vector<1x1x16xf32> to vector<1x16xf32>
    %37 = arith.addf %34, %36 : vector<1x16xf32>
    %cst_35 = arith.constant 0.000000e+00 : f32
    %38 = vector.broadcast %cst_35 : f32 to vector<1x16xf32>
    %39 = arith.maximumf %37, %38 : vector<1x16xf32>
    %c1_36 = arith.constant 1 : index
    %c0_37 = arith.constant 0 : index
    %c0_38 = arith.constant 0 : index
    %40 = vector.load %arg6[%c1_36, %c0_37, %c0_38] : memref<6x16x128xf32, #tpu.memory_space<vmem>>, vector<1x16x128xf32>
    %41 = vector.shape_cast %40 : vector<1x16x128xf32> to vector<16x128xf32>
    %cst_39 = arith.constant dense<0.000000e+00> : vector<1x128xf32>
    %42 = tpu.matmul %39, %41, %cst_39 {dimension_numbers = #tpu.dot_dimension_numbers<[1], [0], [0], [1], [0, 0, 1, 1], [], []>} : vector<1x16xf32>, vector<16x128xf32>, vector<1x128xf32> -> vector<1x128xf32>
    %c1_40 = arith.constant 1 : index
    %c0_41 = arith.constant 0 : index
    %c0_42 = arith.constant 0 : index
    %43 = vector.load %arg7[%c1_40, %c0_41, %c0_42] : memref<6x1x128xf32, #tpu.memory_space<vmem>>, vector<1x1x128xf32>
    %44 = vector.shape_cast %43 : vector<1x1x128xf32> to vector<1x128xf32>
    %45 = arith.addf %42, %44 : vector<1x128xf32>
    %c1_43 = arith.constant 1 : index
    %c0_44 = arith.constant 0 : index
    %c0_45 = arith.constant 0 : index
    %46 = vector.load %arg8[%c1_43, %c0_44, %c0_45] : memref<6x2x128xf32, #tpu.memory_space<vmem>>, vector<1x1x128xf32>
    %47 = vector.shape_cast %46 : vector<1x1x128xf32> to vector<1x128xf32>
    %48 = vector.shape_cast %45 : vector<1x128xf32> to vector<1x1x128xf32>
    tpu.vector_store %arg8[%c1_43, %c0_44, %c0_45], %48 {strides = array<i32>} : memref<6x2x128xf32, #tpu.memory_space<vmem>>, vector<1x1x128xf32>,
    %49 = vector.extract_strided_slice %6 {offsets = [2, 0], sizes = [1, 32], strides = [1, 1]} : vector<6x32xf32> to vector<1x32xf32>
    %c2 = arith.constant 2 : index
    %c0_46 = arith.constant 0 : index
    %c0_47 = arith.constant 0 : index
    %50 = vector.load %arg3[%c2, %c0_46, %c0_47] : memref<6x32x16xf32, #tpu.memory_space<vmem>>, vector<1x32x16xf32>
    %51 = vector.shape_cast %50 : vector<1x32x16xf32> to vector<32x16xf32>
    %cst_48 = arith.constant dense<0.000000e+00> : vector<1x16xf32>
    %52 = tpu.matmul %49, %51, %cst_48 {dimension_numbers = #tpu.dot_dimension_numbers<[1], [0], [0], [1], [0, 0, 1, 1], [], []>} : vector<1x32xf32>, vector<32x16xf32>, vector<1x16xf32> -> vector<1x16xf32>
    %c2_49 = arith.constant 2 : index
    %c0_50 = arith.constant 0 : index
    %c0_51 = arith.constant 0 : index
    %53 = vector.load %arg4[%c2_49, %c0_50, %c0_51] : memref<6x1x16xf32, #tpu.memory_space<vmem>>, vector<1x1x16xf32>
    %54 = vector.shape_cast %53 : vector<1x1x16xf32> to vector<1x16xf32>
    %55 = arith.mulf %52, %54 : vector<1x16xf32>
    %c2_52 = arith.constant 2 : index
    %c0_53 = arith.constant 0 : index
    %c0_54 = arith.constant 0 : index
    %56 = vector.load %arg5[%c2_52, %c0_53, %c0_54] : memref<6x1x16xf32, #tpu.memory_space<vmem>>, vector<1x1x16xf32>
    %57 = vector.shape_cast %56 : vector<1x1x16xf32> to vector<1x16xf32>
    %58 = arith.addf %55, %57 : vector<1x16xf32>
    %cst_55 = arith.constant 0.000000e+00 : f32
    %59 = vector.broadcast %cst_55 : f32 to vector<1x16xf32>
    %60 = arith.maximumf %58, %59 : vector<1x16xf32>
    %c2_56 = arith.constant 2 : index
    %c0_57 = arith.constant 0 : index
    %c0_58 = arith.constant 0 : index
    %61 = vector.load %arg6[%c2_56, %c0_57, %c0_58] : memref<6x16x128xf32, #tpu.memory_space<vmem>>, vector<1x16x128xf32>
    %62 = vector.shape_cast %61 : vector<1x16x128xf32> to vector<16x128xf32>
    %cst_59 = arith.constant dense<0.000000e+00> : vector<1x128xf32>
    %63 = tpu.matmul %60, %62, %cst_59 {dimension_numbers = #tpu.dot_dimension_numbers<[1], [0], [0], [1], [0, 0, 1, 1], [], []>} : vector<1x16xf32>, vector<16x128xf32>, vector<1x128xf32> -> vector<1x128xf32>
    %c2_60 = arith.constant 2 : index
    %c0_61 = arith.constant 0 : index
    %c0_62 = arith.constant 0 : index
    %64 = vector.load %arg7[%c2_60, %c0_61, %c0_62] : memref<6x1x128xf32, #tpu.memory_space<vmem>>, vector<1x1x128xf32>
    %65 = vector.shape_cast %64 : vector<1x1x128xf32> to vector<1x128xf32>
    %66 = arith.addf %63, %65 : vector<1x128xf32>
    %c2_63 = arith.constant 2 : index
    %c0_64 = arith.constant 0 : index
    %c0_65 = arith.constant 0 : index
    %67 = vector.load %arg8[%c2_63, %c0_64, %c0_65] : memref<6x2x128xf32, #tpu.memory_space<vmem>>, vector<1x1x128xf32>
    %68 = vector.shape_cast %67 : vector<1x1x128xf32> to vector<1x128xf32>
    %69 = vector.shape_cast %66 : vector<1x128xf32> to vector<1x1x128xf32>
    tpu.vector_store %arg8[%c2_63, %c0_64, %c0_65], %69 {strides = array<i32>} : memref<6x2x128xf32, #tpu.memory_space<vmem>>, vector<1x1x128xf32>,
    %70 = vector.extract_strided_slice %6 {offsets = [3, 0], sizes = [1, 32], strides = [1, 1]} : vector<6x32xf32> to vector<1x32xf32>
    %c3 = arith.constant 3 : index
    %c0_66 = arith.constant 0 : index
    %c0_67 = arith.constant 0 : index
    %71 = vector.load %arg3[%c3, %c0_66, %c0_67] : memref<6x32x16xf32, #tpu.memory_space<vmem>>, vector<1x32x16xf32>
    %72 = vector.shape_cast %71 : vector<1x32x16xf32> to vector<32x16xf32>
    %cst_68 = arith.constant dense<0.000000e+00> : vector<1x16xf32>
    %73 = tpu.matmul %70, %72, %cst_68 {dimension_numbers = #tpu.dot_dimension_numbers<[1], [0], [0], [1], [0, 0, 1, 1], [], []>} : vector<1x32xf32>, vector<32x16xf32>, vector<1x16xf32> -> vector<1x16xf32>
    %c3_69 = arith.constant 3 : index
    %c0_70 = arith.constant 0 : index
    %c0_71 = arith.constant 0 : index
    %74 = vector.load %arg4[%c3_69, %c0_70, %c0_71] : memref<6x1x16xf32, #tpu.memory_space<vmem>>, vector<1x1x16xf32>
    %75 = vector.shape_cast %74 : vector<1x1x16xf32> to vector<1x16xf32>
    %76 = arith.mulf %73, %75 : vector<1x16xf32>
    %c3_72 = arith.constant 3 : index
    %c0_73 = arith.constant 0 : index
    %c0_74 = arith.constant 0 : index
    %77 = vector.load %arg5[%c3_72, %c0_73, %c0_74] : memref<6x1x16xf32, #tpu.memory_space<vmem>>, vector<1x1x16xf32>
    %78 = vector.shape_cast %77 : vector<1x1x16xf32> to vector<1x16xf32>
    %79 = arith.addf %76, %78 : vector<1x16xf32>
    %cst_75 = arith.constant 0.000000e+00 : f32
    %80 = vector.broadcast %cst_75 : f32 to vector<1x16xf32>
    %81 = arith.maximumf %79, %80 : vector<1x16xf32>
    %c3_76 = arith.constant 3 : index
    %c0_77 = arith.constant 0 : index
    %c0_78 = arith.constant 0 : index
    %82 = vector.load %arg6[%c3_76, %c0_77, %c0_78] : memref<6x16x128xf32, #tpu.memory_space<vmem>>, vector<1x16x128xf32>
    %83 = vector.shape_cast %82 : vector<1x16x128xf32> to vector<16x128xf32>
    %cst_79 = arith.constant dense<0.000000e+00> : vector<1x128xf32>
    %84 = tpu.matmul %81, %83, %cst_79 {dimension_numbers = #tpu.dot_dimension_numbers<[1], [0], [0], [1], [0, 0, 1, 1], [], []>} : vector<1x16xf32>, vector<16x128xf32>, vector<1x128xf32> -> vector<1x128xf32>
    %c3_80 = arith.constant 3 : index
    %c0_81 = arith.constant 0 : index
    %c0_82 = arith.constant 0 : index
    %85 = vector.load %arg7[%c3_80, %c0_81, %c0_82] : memref<6x1x128xf32, #tpu.memory_space<vmem>>, vector<1x1x128xf32>
    %86 = vector.shape_cast %85 : vector<1x1x128xf32> to vector<1x128xf32>
    %87 = arith.addf %84, %86 : vector<1x128xf32>
    %c3_83 = arith.constant 3 : index
    %c0_84 = arith.constant 0 : index
    %c0_85 = arith.constant 0 : index
    %88 = vector.load %arg8[%c3_83, %c0_84, %c0_85] : memref<6x2x128xf32, #tpu.memory_space<vmem>>, vector<1x1x128xf32>
    %89 = vector.shape_cast %88 : vector<1x1x128xf32> to vector<1x128xf32>
    %90 = vector.shape_cast %87 : vector<1x128xf32> to vector<1x1x128xf32>
    tpu.vector_store %arg8[%c3_83, %c0_84, %c0_85], %90 {strides = array<i32>} : memref<6x2x128xf32, #tpu.memory_space<vmem>>, vector<1x1x128xf32>,
    %91 = vector.extract_strided_slice %6 {offsets = [4, 0], sizes = [1, 32], strides = [1, 1]} : vector<6x32xf32> to vector<1x32xf32>
    %c4 = arith.constant 4 : index
    %c0_86 = arith.constant 0 : index
    %c0_87 = arith.constant 0 : index
    %92 = vector.load %arg3[%c4, %c0_86, %c0_87] : memref<6x32x16xf32, #tpu.memory_space<vmem>>, vector<1x32x16xf32>
    %93 = vector.shape_cast %92 : vector<1x32x16xf32> to vector<32x16xf32>
    %cst_88 = arith.constant dense<0.000000e+00> : vector<1x16xf32>
    %94 = tpu.matmul %91, %93, %cst_88 {dimension_numbers = #tpu.dot_dimension_numbers<[1], [0], [0], [1], [0, 0, 1, 1], [], []>} : vector<1x32xf32>, vector<32x16xf32>, vector<1x16xf32> -> vector<1x16xf32>
    %c4_89 = arith.constant 4 : index
    %c0_90 = arith.constant 0 : index
    %c0_91 = arith.constant 0 : index
    %95 = vector.load %arg4[%c4_89, %c0_90, %c0_91] : memref<6x1x16xf32, #tpu.memory_space<vmem>>, vector<1x1x16xf32>
    %96 = vector.shape_cast %95 : vector<1x1x16xf32> to vector<1x16xf32>
    %97 = arith.mulf %94, %96 : vector<1x16xf32>
    %c4_92 = arith.constant 4 : index
    %c0_93 = arith.constant 0 : index
    %c0_94 = arith.constant 0 : index
    %98 = vector.load %arg5[%c4_92, %c0_93, %c0_94] : memref<6x1x16xf32, #tpu.memory_space<vmem>>, vector<1x1x16xf32>
    %99 = vector.shape_cast %98 : vector<1x1x16xf32> to vector<1x16xf32>
    %100 = arith.addf %97, %99 : vector<1x16xf32>
    %cst_95 = arith.constant 0.000000e+00 : f32
    %101 = vector.broadcast %cst_95 : f32 to vector<1x16xf32>
    %102 = arith.maximumf %100, %101 : vector<1x16xf32>
    %c4_96 = arith.constant 4 : index
    %c0_97 = arith.constant 0 : index
    %c0_98 = arith.constant 0 : index
    %103 = vector.load %arg6[%c4_96, %c0_97, %c0_98] : memref<6x16x128xf32, #tpu.memory_space<vmem>>, vector<1x16x128xf32>
    %104 = vector.shape_cast %103 : vector<1x16x128xf32> to vector<16x128xf32>
    %cst_99 = arith.constant dense<0.000000e+00> : vector<1x128xf32>
    %105 = tpu.matmul %102, %104, %cst_99 {dimension_numbers = #tpu.dot_dimension_numbers<[1], [0], [0], [1], [0, 0, 1, 1], [], []>} : vector<1x16xf32>, vector<16x128xf32>, vector<1x128xf32> -> vector<1x128xf32>
    %c4_100 = arith.constant 4 : index
    %c0_101 = arith.constant 0 : index
    %c0_102 = arith.constant 0 : index
    %106 = vector.load %arg7[%c4_100, %c0_101, %c0_102] : memref<6x1x128xf32, #tpu.memory_space<vmem>>, vector<1x1x128xf32>
    %107 = vector.shape_cast %106 : vector<1x1x128xf32> to vector<1x128xf32>
    %108 = arith.addf %105, %107 : vector<1x128xf32>
    %c4_103 = arith.constant 4 : index
    %c0_104 = arith.constant 0 : index
    %c0_105 = arith.constant 0 : index
    %109 = vector.load %arg8[%c4_103, %c0_104, %c0_105] : memref<6x2x128xf32, #tpu.memory_space<vmem>>, vector<1x1x128xf32>
    %110 = vector.shape_cast %109 : vector<1x1x128xf32> to vector<1x128xf32>
    %111 = vector.shape_cast %108 : vector<1x128xf32> to vector<1x1x128xf32>
    tpu.vector_store %arg8[%c4_103, %c0_104, %c0_105], %111 {strides = array<i32>} : memref<6x2x128xf32, #tpu.memory_space<vmem>>, vector<1x1x128xf32>,
    %112 = vector.extract_strided_slice %6 {offsets = [5, 0], sizes = [1, 32], strides = [1, 1]} : vector<6x32xf32> to vector<1x32xf32>
    %c5 = arith.constant 5 : index
    %c0_106 = arith.constant 0 : index
    %c0_107 = arith.constant 0 : index
    %113 = vector.load %arg3[%c5, %c0_106, %c0_107] : memref<6x32x16xf32, #tpu.memory_space<vmem>>, vector<1x32x16xf32>
    %114 = vector.shape_cast %113 : vector<1x32x16xf32> to vector<32x16xf32>
    %cst_108 = arith.constant dense<0.000000e+00> : vector<1x16xf32>
    %115 = tpu.matmul %112, %114, %cst_108 {dimension_numbers = #tpu.dot_dimension_numbers<[1], [0], [0], [1], [0, 0, 1, 1], [], []>} : vector<1x32xf32>, vector<32x16xf32>, vector<1x16xf32> -> vector<1x16xf32>
    %c5_109 = arith.constant 5 : index
    %c0_110 = arith.constant 0 : index
    %c0_111 = arith.constant 0 : index
    %116 = vector.load %arg4[%c5_109, %c0_110, %c0_111] : memref<6x1x16xf32, #tpu.memory_space<vmem>>, vector<1x1x16xf32>
    %117 = vector.shape_cast %116 : vector<1x1x16xf32> to vector<1x16xf32>
    %118 = arith.mulf %115, %117 : vector<1x16xf32>
    %c5_112 = arith.constant 5 : index
    %c0_113 = arith.constant 0 : index
    %c0_114 = arith.constant 0 : index
    %119 = vector.load %arg5[%c5_112, %c0_113, %c0_114] : memref<6x1x16xf32, #tpu.memory_space<vmem>>, vector<1x1x16xf32>
    %120 = vector.shape_cast %119 : vector<1x1x16xf32> to vector<1x16xf32>
    %121 = arith.addf %118, %120 : vector<1x16xf32>
    %cst_115 = arith.constant 0.000000e+00 : f32
    %122 = vector.broadcast %cst_115 : f32 to vector<1x16xf32>
    %123 = arith.maximumf %121, %122 : vector<1x16xf32>
    %c5_116 = arith.constant 5 : index
    %c0_117 = arith.constant 0 : index
    %c0_118 = arith.constant 0 : index
    %124 = vector.load %arg6[%c5_116, %c0_117, %c0_118] : memref<6x16x128xf32, #tpu.memory_space<vmem>>, vector<1x16x128xf32>
    %125 = vector.shape_cast %124 : vector<1x16x128xf32> to vector<16x128xf32>
    %cst_119 = arith.constant dense<0.000000e+00> : vector<1x128xf32>
    %126 = tpu.matmul %123, %125, %cst_119 {dimension_numbers = #tpu.dot_dimension_numbers<[1], [0], [0], [1], [0, 0, 1, 1], [], []>} : vector<1x16xf32>, vector<16x128xf32>, vector<1x128xf32> -> vector<1x128xf32>
    %c5_120 = arith.constant 5 : index
    %c0_121 = arith.constant 0 : index
    %c0_122 = arith.constant 0 : index
    %127 = vector.load %arg7[%c5_120, %c0_121, %c0_122] : memref<6x1x128xf32, #tpu.memory_space<vmem>>, vector<1x1x128xf32>
    %128 = vector.shape_cast %127 : vector<1x1x128xf32> to vector<1x128xf32>
    %129 = arith.addf %126, %128 : vector<1x128xf32>
    %c5_123 = arith.constant 5 : index
    %c0_124 = arith.constant 0 : index
    %c0_125 = arith.constant 0 : index
    %130 = vector.load %arg8[%c5_123, %c0_124, %c0_125] : memref<6x2x128xf32, #tpu.memory_space<vmem>>, vector<1x1x128xf32>
    %131 = vector.shape_cast %130 : vector<1x1x128xf32> to vector<1x128xf32>
    %132 = vector.shape_cast %129 : vector<1x128xf32> to vector<1x1x128xf32>
    tpu.vector_store %arg8[%c5_123, %c0_124, %c0_125], %132 {strides = array<i32>} : memref<6x2x128xf32, #tpu.memory_space<vmem>>, vector<1x1x128xf32>,
    %c1_126 = arith.constant 1 : index
    %c0_127 = arith.constant 0 : index
    %c0_128 = arith.constant 0 : index
    %133 = vector.load %arg1[%c1_126, %c0_127, %c0_128] : memref<2x32x48xf32, #tpu.memory_space<vmem>>, vector<1x32x48xf32>
    %134 = vector.shape_cast %133 : vector<1x32x48xf32> to vector<32x48xf32>
    %c0_129 = arith.constant 0 : index
    %c0_130 = arith.constant 0 : index
    %135 = vector.load %arg2[%c0_129, %c0_130] : memref<48x6xf32, #tpu.memory_space<vmem>>, vector<48x6xf32>
    %cst_131 = arith.constant dense<0.000000e+00> : vector<32x6xf32>
    %136 = tpu.matmul %134, %135, %cst_131 {dimension_numbers = #tpu.dot_dimension_numbers<[1], [0], [0], [1], [0, 0, 1, 1], [], []>} : vector<32x48xf32>, vector<48x6xf32>, vector<32x6xf32> -> vector<32x6xf32>
    %137 = tpu.transpose %136, [1, 0] : vector<32x6xf32> -> vector<6x32xf32>
    %cst_132 = arith.constant 1.250000e-01 : f32
    %138 = vector.broadcast %cst_132 : f32 to vector<6x32xf32>
    %139 = arith.mulf %137, %138 : vector<6x32xf32>
    %140 = vector.extract_strided_slice %139 {offsets = [0, 0], sizes = [1, 32], strides = [1, 1]} : vector<6x32xf32> to vector<1x32xf32>
    %c0_133 = arith.constant 0 : index
    %c0_134 = arith.constant 0 : index
    %c0_135 = arith.constant 0 : index
    %141 = vector.load %arg3[%c0_133, %c0_134, %c0_135] : memref<6x32x16xf32, #tpu.memory_space<vmem>>, vector<1x32x16xf32>
    %142 = vector.shape_cast %141 : vector<1x32x16xf32> to vector<32x16xf32>
    %cst_136 = arith.constant dense<0.000000e+00> : vector<1x16xf32>
    %143 = tpu.matmul %140, %142, %cst_136 {dimension_numbers = #tpu.dot_dimension_numbers<[1], [0], [0], [1], [0, 0, 1, 1], [], []>} : vector<1x32xf32>, vector<32x16xf32>, vector<1x16xf32> -> vector<1x16xf32>
    %c0_137 = arith.constant 0 : index
    %c0_138 = arith.constant 0 : index
    %c0_139 = arith.constant 0 : index
    %144 = vector.load %arg4[%c0_137, %c0_138, %c0_139] : memref<6x1x16xf32, #tpu.memory_space<vmem>>, vector<1x1x16xf32>
    %145 = vector.shape_cast %144 : vector<1x1x16xf32> to vector<1x16xf32>
    %146 = arith.mulf %143, %145 : vector<1x16xf32>
    %c0_140 = arith.constant 0 : index
    %c0_141 = arith.constant 0 : index
    %c0_142 = arith.constant 0 : index
    %147 = vector.load %arg5[%c0_140, %c0_141, %c0_142] : memref<6x1x16xf32, #tpu.memory_space<vmem>>, vector<1x1x16xf32>
    %148 = vector.shape_cast %147 : vector<1x1x16xf32> to vector<1x16xf32>
    %149 = arith.addf %146, %148 : vector<1x16xf32>
    %cst_143 = arith.constant 0.000000e+00 : f32
    %150 = vector.broadcast %cst_143 : f32 to vector<1x16xf32>
    %151 = arith.maximumf %149, %150 : vector<1x16xf32>
    %c0_144 = arith.constant 0 : index
    %c0_145 = arith.constant 0 : index
    %c0_146 = arith.constant 0 : index
    %152 = vector.load %arg6[%c0_144, %c0_145, %c0_146] : memref<6x16x128xf32, #tpu.memory_space<vmem>>, vector<1x16x128xf32>
    %153 = vector.shape_cast %152 : vector<1x16x128xf32> to vector<16x128xf32>
    %cst_147 = arith.constant dense<0.000000e+00> : vector<1x128xf32>
    %154 = tpu.matmul %151, %153, %cst_147 {dimension_numbers = #tpu.dot_dimension_numbers<[1], [0], [0], [1], [0, 0, 1, 1], [], []>} : vector<1x16xf32>, vector<16x128xf32>, vector<1x128xf32> -> vector<1x128xf32>
    %c0_148 = arith.constant 0 : index
    %c0_149 = arith.constant 0 : index
    %c0_150 = arith.constant 0 : index
    %155 = vector.load %arg7[%c0_148, %c0_149, %c0_150] : memref<6x1x128xf32, #tpu.memory_space<vmem>>, vector<1x1x128xf32>
    %156 = vector.shape_cast %155 : vector<1x1x128xf32> to vector<1x128xf32>
    %157 = arith.addf %154, %156 : vector<1x128xf32>
    %c0_151 = arith.constant 0 : index
    %c1_152 = arith.constant 1 : index
    %c0_153 = arith.constant 0 : index
    %158 = vector.load %arg8[%c0_151, %c1_152, %c0_153] : memref<6x2x128xf32, #tpu.memory_space<vmem>>, vector<1x1x128xf32>
    %159 = vector.shape_cast %158 : vector<1x1x128xf32> to vector<1x128xf32>
    %160 = vector.shape_cast %157 : vector<1x128xf32> to vector<1x1x128xf32>
    tpu.vector_store %arg8[%c0_151, %c1_152, %c0_153], %160 {strides = array<i32>} : memref<6x2x128xf32, #tpu.memory_space<vmem>>, vector<1x1x128xf32>,
    %161 = vector.extract_strided_slice %139 {offsets = [1, 0], sizes = [1, 32], strides = [1, 1]} : vector<6x32xf32> to vector<1x32xf32>
    %c1_154 = arith.constant 1 : index
    %c0_155 = arith.constant 0 : index
    %c0_156 = arith.constant 0 : index
    %162 = vector.load %arg3[%c1_154, %c0_155, %c0_156] : memref<6x32x16xf32, #tpu.memory_space<vmem>>, vector<1x32x16xf32>
    %163 = vector.shape_cast %162 : vector<1x32x16xf32> to vector<32x16xf32>
    %cst_157 = arith.constant dense<0.000000e+00> : vector<1x16xf32>
    %164 = tpu.matmul %161, %163, %cst_157 {dimension_numbers = #tpu.dot_dimension_numbers<[1], [0], [0], [1], [0, 0, 1, 1], [], []>} : vector<1x32xf32>, vector<32x16xf32>, vector<1x16xf32> -> vector<1x16xf32>
    %c1_158 = arith.constant 1 : index
    %c0_159 = arith.constant 0 : index
    %c0_160 = arith.constant 0 : index
    %165 = vector.load %arg4[%c1_158, %c0_159, %c0_160] : memref<6x1x16xf32, #tpu.memory_space<vmem>>, vector<1x1x16xf32>
    %166 = vector.shape_cast %165 : vector<1x1x16xf32> to vector<1x16xf32>
    %167 = arith.mulf %164, %166 : vector<1x16xf32>
    %c1_161 = arith.constant 1 : index
    %c0_162 = arith.constant 0 : index
    %c0_163 = arith.constant 0 : index
    %168 = vector.load %arg5[%c1_161, %c0_162, %c0_163] : memref<6x1x16xf32, #tpu.memory_space<vmem>>, vector<1x1x16xf32>
    %169 = vector.shape_cast %168 : vector<1x1x16xf32> to vector<1x16xf32>
    %170 = arith.addf %167, %169 : vector<1x16xf32>
    %cst_164 = arith.constant 0.000000e+00 : f32
    %171 = vector.broadcast %cst_164 : f32 to vector<1x16xf32>
    %172 = arith.maximumf %170, %171 : vector<1x16xf32>
    %c1_165 = arith.constant 1 : index
    %c0_166 = arith.constant 0 : index
    %c0_167 = arith.constant 0 : index
    %173 = vector.load %arg6[%c1_165, %c0_166, %c0_167] : memref<6x16x128xf32, #tpu.memory_space<vmem>>, vector<1x16x128xf32>
    %174 = vector.shape_cast %173 : vector<1x16x128xf32> to vector<16x128xf32>
    %cst_168 = arith.constant dense<0.000000e+00> : vector<1x128xf32>
    %175 = tpu.matmul %172, %174, %cst_168 {dimension_numbers = #tpu.dot_dimension_numbers<[1], [0], [0], [1], [0, 0, 1, 1], [], []>} : vector<1x16xf32>, vector<16x128xf32>, vector<1x128xf32> -> vector<1x128xf32>
    %c1_169 = arith.constant 1 : index
    %c0_170 = arith.constant 0 : index
    %c0_171 = arith.constant 0 : index
    %176 = vector.load %arg7[%c1_169, %c0_170, %c0_171] : memref<6x1x128xf32, #tpu.memory_space<vmem>>, vector<1x1x128xf32>
    %177 = vector.shape_cast %176 : vector<1x1x128xf32> to vector<1x128xf32>
    %178 = arith.addf %175, %177 : vector<1x128xf32>
    %c1_172 = arith.constant 1 : index
    %c1_173 = arith.constant 1 : index
    %c0_174 = arith.constant 0 : index
    %179 = vector.load %arg8[%c1_172, %c1_173, %c0_174] : memref<6x2x128xf32, #tpu.memory_space<vmem>>, vector<1x1x128xf32>
    %180 = vector.shape_cast %179 : vector<1x1x128xf32> to vector<1x128xf32>
    %181 = vector.shape_cast %178 : vector<1x128xf32> to vector<1x1x128xf32>
    tpu.vector_store %arg8[%c1_172, %c1_173, %c0_174], %181 {strides = array<i32>} : memref<6x2x128xf32, #tpu.memory_space<vmem>>, vector<1x1x128xf32>,
    %182 = vector.extract_strided_slice %139 {offsets = [2, 0], sizes = [1, 32], strides = [1, 1]} : vector<6x32xf32> to vector<1x32xf32>
    %c2_175 = arith.constant 2 : index
    %c0_176 = arith.constant 0 : index
    %c0_177 = arith.constant 0 : index
    %183 = vector.load %arg3[%c2_175, %c0_176, %c0_177] : memref<6x32x16xf32, #tpu.memory_space<vmem>>, vector<1x32x16xf32>
    %184 = vector.shape_cast %183 : vector<1x32x16xf32> to vector<32x16xf32>
    %cst_178 = arith.constant dense<0.000000e+00> : vector<1x16xf32>
    %185 = tpu.matmul %182, %184, %cst_178 {dimension_numbers = #tpu.dot_dimension_numbers<[1], [0], [0], [1], [0, 0, 1, 1], [], []>} : vector<1x32xf32>, vector<32x16xf32>, vector<1x16xf32> -> vector<1x16xf32>
    %c2_179 = arith.constant 2 : index
    %c0_180 = arith.constant 0 : index
    %c0_181 = arith.constant 0 : index
    %186 = vector.load %arg4[%c2_179, %c0_180, %c0_181] : memref<6x1x16xf32, #tpu.memory_space<vmem>>, vector<1x1x16xf32>
    %187 = vector.shape_cast %186 : vector<1x1x16xf32> to vector<1x16xf32>
    %188 = arith.mulf %185, %187 : vector<1x16xf32>
    %c2_182 = arith.constant 2 : index
    %c0_183 = arith.constant 0 : index
    %c0_184 = arith.constant 0 : index
    %189 = vector.load %arg5[%c2_182, %c0_183, %c0_184] : memref<6x1x16xf32, #tpu.memory_space<vmem>>, vector<1x1x16xf32>
    %190 = vector.shape_cast %189 : vector<1x1x16xf32> to vector<1x16xf32>
    %191 = arith.addf %188, %190 : vector<1x16xf32>
    %cst_185 = arith.constant 0.000000e+00 : f32
    %192 = vector.broadcast %cst_185 : f32 to vector<1x16xf32>
    %193 = arith.maximumf %191, %192 : vector<1x16xf32>
    %c2_186 = arith.constant 2 : index
    %c0_187 = arith.constant 0 : index
    %c0_188 = arith.constant 0 : index
    %194 = vector.load %arg6[%c2_186, %c0_187, %c0_188] : memref<6x16x128xf32, #tpu.memory_space<vmem>>, vector<1x16x128xf32>
    %195 = vector.shape_cast %194 : vector<1x16x128xf32> to vector<16x128xf32>
    %cst_189 = arith.constant dense<0.000000e+00> : vector<1x128xf32>
    %196 = tpu.matmul %193, %195, %cst_189 {dimension_numbers = #tpu.dot_dimension_numbers<[1], [0], [0], [1], [0, 0, 1, 1], [], []>} : vector<1x16xf32>, vector<16x128xf32>, vector<1x128xf32> -> vector<1x128xf32>
    %c2_190 = arith.constant 2 : index
    %c0_191 = arith.constant 0 : index
    %c0_192 = arith.constant 0 : index
    %197 = vector.load %arg7[%c2_190, %c0_191, %c0_192] : memref<6x1x128xf32, #tpu.memory_space<vmem>>, vector<1x1x128xf32>
    %198 = vector.shape_cast %197 : vector<1x1x128xf32> to vector<1x128xf32>
    %199 = arith.addf %196, %198 : vector<1x128xf32>
    %c2_193 = arith.constant 2 : index
    %c1_194 = arith.constant 1 : index
    %c0_195 = arith.constant 0 : index
    %200 = vector.load %arg8[%c2_193, %c1_194, %c0_195] : memref<6x2x128xf32, #tpu.memory_space<vmem>>, vector<1x1x128xf32>
    %201 = vector.shape_cast %200 : vector<1x1x128xf32> to vector<1x128xf32>
    %202 = vector.shape_cast %199 : vector<1x128xf32> to vector<1x1x128xf32>
    tpu.vector_store %arg8[%c2_193, %c1_194, %c0_195], %202 {strides = array<i32>} : memref<6x2x128xf32, #tpu.memory_space<vmem>>, vector<1x1x128xf32>,
    %203 = vector.extract_strided_slice %139 {offsets = [3, 0], sizes = [1, 32], strides = [1, 1]} : vector<6x32xf32> to vector<1x32xf32>
    %c3_196 = arith.constant 3 : index
    %c0_197 = arith.constant 0 : index
    %c0_198 = arith.constant 0 : index
    %204 = vector.load %arg3[%c3_196, %c0_197, %c0_198] : memref<6x32x16xf32, #tpu.memory_space<vmem>>, vector<1x32x16xf32>
    %205 = vector.shape_cast %204 : vector<1x32x16xf32> to vector<32x16xf32>
    %cst_199 = arith.constant dense<0.000000e+00> : vector<1x16xf32>
    %206 = tpu.matmul %203, %205, %cst_199 {dimension_numbers = #tpu.dot_dimension_numbers<[1], [0], [0], [1], [0, 0, 1, 1], [], []>} : vector<1x32xf32>, vector<32x16xf32>, vector<1x16xf32> -> vector<1x16xf32>
    %c3_200 = arith.constant 3 : index
    %c0_201 = arith.constant 0 : index
    %c0_202 = arith.constant 0 : index
    %207 = vector.load %arg4[%c3_200, %c0_201, %c0_202] : memref<6x1x16xf32, #tpu.memory_space<vmem>>, vector<1x1x16xf32>
    %208 = vector.shape_cast %207 : vector<1x1x16xf32> to vector<1x16xf32>
    %209 = arith.mulf %206, %208 : vector<1x16xf32>
    %c3_203 = arith.constant 3 : index
    %c0_204 = arith.constant 0 : index
    %c0_205 = arith.constant 0 : index
    %210 = vector.load %arg5[%c3_203, %c0_204, %c0_205] : memref<6x1x16xf32, #tpu.memory_space<vmem>>, vector<1x1x16xf32>
    %211 = vector.shape_cast %210 : vector<1x1x16xf32> to vector<1x16xf32>
    %212 = arith.addf %209, %211 : vector<1x16xf32>
    %cst_206 = arith.constant 0.000000e+00 : f32
    %213 = vector.broadcast %cst_206 : f32 to vector<1x16xf32>
    %214 = arith.maximumf %212, %213 : vector<1x16xf32>
    %c3_207 = arith.constant 3 : index
    %c0_208 = arith.constant 0 : index
    %c0_209 = arith.constant 0 : index
    %215 = vector.load %arg6[%c3_207, %c0_208, %c0_209] : memref<6x16x128xf32, #tpu.memory_space<vmem>>, vector<1x16x128xf32>
    %216 = vector.shape_cast %215 : vector<1x16x128xf32> to vector<16x128xf32>
    %cst_210 = arith.constant dense<0.000000e+00> : vector<1x128xf32>
    %217 = tpu.matmul %214, %216, %cst_210 {dimension_numbers = #tpu.dot_dimension_numbers<[1], [0], [0], [1], [0, 0, 1, 1], [], []>} : vector<1x16xf32>, vector<16x128xf32>, vector<1x128xf32> -> vector<1x128xf32>
    %c3_211 = arith.constant 3 : index
    %c0_212 = arith.constant 0 : index
    %c0_213 = arith.constant 0 : index
    %218 = vector.load %arg7[%c3_211, %c0_212, %c0_213] : memref<6x1x128xf32, #tpu.memory_space<vmem>>, vector<1x1x128xf32>
    %219 = vector.shape_cast %218 : vector<1x1x128xf32> to vector<1x128xf32>
    %220 = arith.addf %217, %219 : vector<1x128xf32>
    %c3_214 = arith.constant 3 : index
    %c1_215 = arith.constant 1 : index
    %c0_216 = arith.constant 0 : index
    %221 = vector.load %arg8[%c3_214, %c1_215, %c0_216] : memref<6x2x128xf32, #tpu.memory_space<vmem>>, vector<1x1x128xf32>
    %222 = vector.shape_cast %221 : vector<1x1x128xf32> to vector<1x128xf32>
    %223 = vector.shape_cast %220 : vector<1x128xf32> to vector<1x1x128xf32>
    tpu.vector_store %arg8[%c3_214, %c1_215, %c0_216], %223 {strides = array<i32>} : memref<6x2x128xf32, #tpu.memory_space<vmem>>, vector<1x1x128xf32>,
    %224 = vector.extract_strided_slice %139 {offsets = [4, 0], sizes = [1, 32], strides = [1, 1]} : vector<6x32xf32> to vector<1x32xf32>
    %c4_217 = arith.constant 4 : index
    %c0_218 = arith.constant 0 : index
    %c0_219 = arith.constant 0 : index
    %225 = vector.load %arg3[%c4_217, %c0_218, %c0_219] : memref<6x32x16xf32, #tpu.memory_space<vmem>>, vector<1x32x16xf32>
    %226 = vector.shape_cast %225 : vector<1x32x16xf32> to vector<32x16xf32>
    %cst_220 = arith.constant dense<0.000000e+00> : vector<1x16xf32>
    %227 = tpu.matmul %224, %226, %cst_220 {dimension_numbers = #tpu.dot_dimension_numbers<[1], [0], [0], [1], [0, 0, 1, 1], [], []>} : vector<1x32xf32>, vector<32x16xf32>, vector<1x16xf32> -> vector<1x16xf32>
    %c4_221 = arith.constant 4 : index
    %c0_222 = arith.constant 0 : index
    %c0_223 = arith.constant 0 : index
    %228 = vector.load %arg4[%c4_221, %c0_222, %c0_223] : memref<6x1x16xf32, #tpu.memory_space<vmem>>, vector<1x1x16xf32>
    %229 = vector.shape_cast %228 : vector<1x1x16xf32> to vector<1x16xf32>
    %230 = arith.mulf %227, %229 : vector<1x16xf32>
    %c4_224 = arith.constant 4 : index
    %c0_225 = arith.constant 0 : index
    %c0_226 = arith.constant 0 : index
    %231 = vector.load %arg5[%c4_224, %c0_225, %c0_226] : memref<6x1x16xf32, #tpu.memory_space<vmem>>, vector<1x1x16xf32>
    %232 = vector.shape_cast %231 : vector<1x1x16xf32> to vector<1x16xf32>
    %233 = arith.addf %230, %232 : vector<1x16xf32>
    %cst_227 = arith.constant 0.000000e+00 : f32
    %234 = vector.broadcast %cst_227 : f32 to vector<1x16xf32>
    %235 = arith.maximumf %233, %234 : vector<1x16xf32>
    %c4_228 = arith.constant 4 : index
    %c0_229 = arith.constant 0 : index
    %c0_230 = arith.constant 0 : index
    %236 = vector.load %arg6[%c4_228, %c0_229, %c0_230] : memref<6x16x128xf32, #tpu.memory_space<vmem>>, vector<1x16x128xf32>
    %237 = vector.shape_cast %236 : vector<1x16x128xf32> to vector<16x128xf32>
    %cst_231 = arith.constant dense<0.000000e+00> : vector<1x128xf32>
    %238 = tpu.matmul %235, %237, %cst_231 {dimension_numbers = #tpu.dot_dimension_numbers<[1], [0], [0], [1], [0, 0, 1, 1], [], []>} : vector<1x16xf32>, vector<16x128xf32>, vector<1x128xf32> -> vector<1x128xf32>
    %c4_232 = arith.constant 4 : index
    %c0_233 = arith.constant 0 : index
    %c0_234 = arith.constant 0 : index
    %239 = vector.load %arg7[%c4_232, %c0_233, %c0_234] : memref<6x1x128xf32, #tpu.memory_space<vmem>>, vector<1x1x128xf32>
    %240 = vector.shape_cast %239 : vector<1x1x128xf32> to vector<1x128xf32>
    %241 = arith.addf %238, %240 : vector<1x128xf32>
    %c4_235 = arith.constant 4 : index
    %c1_236 = arith.constant 1 : index
    %c0_237 = arith.constant 0 : index
    %242 = vector.load %arg8[%c4_235, %c1_236, %c0_237] : memref<6x2x128xf32, #tpu.memory_space<vmem>>, vector<1x1x128xf32>
    %243 = vector.shape_cast %242 : vector<1x1x128xf32> to vector<1x128xf32>
    %244 = vector.shape_cast %241 : vector<1x128xf32> to vector<1x1x128xf32>
    tpu.vector_store %arg8[%c4_235, %c1_236, %c0_237], %244 {strides = array<i32>} : memref<6x2x128xf32, #tpu.memory_space<vmem>>, vector<1x1x128xf32>,
    %245 = vector.extract_strided_slice %139 {offsets = [5, 0], sizes = [1, 32], strides = [1, 1]} : vector<6x32xf32> to vector<1x32xf32>
    %c5_238 = arith.constant 5 : index
    %c0_239 = arith.constant 0 : index
    %c0_240 = arith.constant 0 : index
    %246 = vector.load %arg3[%c5_238, %c0_239, %c0_240] : memref<6x32x16xf32, #tpu.memory_space<vmem>>, vector<1x32x16xf32>
    %247 = vector.shape_cast %246 : vector<1x32x16xf32> to vector<32x16xf32>
    %cst_241 = arith.constant dense<0.000000e+00> : vector<1x16xf32>
    %248 = tpu.matmul %245, %247, %cst_241 {dimension_numbers = #tpu.dot_dimension_numbers<[1], [0], [0], [1], [0, 0, 1, 1], [], []>} : vector<1x32xf32>, vector<32x16xf32>, vector<1x16xf32> -> vector<1x16xf32>
    %c5_242 = arith.constant 5 : index
    %c0_243 = arith.constant 0 : index
    %c0_244 = arith.constant 0 : index
    %249 = vector.load %arg4[%c5_242, %c0_243, %c0_244] : memref<6x1x16xf32, #tpu.memory_space<vmem>>, vector<1x1x16xf32>
    %250 = vector.shape_cast %249 : vector<1x1x16xf32> to vector<1x16xf32>
    %251 = arith.mulf %248, %250 : vector<1x16xf32>
    %c5_245 = arith.constant 5 : index
    %c0_246 = arith.constant 0 : index
    %c0_247 = arith.constant 0 : index
    %252 = vector.load %arg5[%c5_245, %c0_246, %c0_247] : memref<6x1x16xf32, #tpu.memory_space<vmem>>, vector<1x1x16xf32>
    %253 = vector.shape_cast %252 : vector<1x1x16xf32> to vector<1x16xf32>
    %254 = arith.addf %251, %253 : vector<1x16xf32>
    %cst_248 = arith.constant 0.000000e+00 : f32
    %255 = vector.broadcast %cst_248 : f32 to vector<1x16xf32>
    %256 = arith.maximumf %254, %255 : vector<1x16xf32>
    %c5_249 = arith.constant 5 : index
    %c0_250 = arith.constant 0 : index
    %c0_251 = arith.constant 0 : index
    %257 = vector.load %arg6[%c5_249, %c0_250, %c0_251] : memref<6x16x128xf32, #tpu.memory_space<vmem>>, vector<1x16x128xf32>
    %258 = vector.shape_cast %257 : vector<1x16x128xf32> to vector<16x128xf32>
    %cst_252 = arith.constant dense<0.000000e+00> : vector<1x128xf32>
    %259 = tpu.matmul %256, %258, %cst_252 {dimension_numbers = #tpu.dot_dimension_numbers<[1], [0], [0], [1], [0, 0, 1, 1], [], []>} : vector<1x16xf32>, vector<16x128xf32>, vector<1x128xf32> -> vector<1x128xf32>
    %c5_253 = arith.constant 5 : index
    %c0_254 = arith.constant 0 : index
    %c0_255 = arith.constant 0 : index
    %260 = vector.load %arg7[%c5_253, %c0_254, %c0_255] : memref<6x1x128xf32, #tpu.memory_space<vmem>>, vector<1x1x128xf32>
    %261 = vector.shape_cast %260 : vector<1x1x128xf32> to vector<1x128xf32>
    %262 = arith.addf %259, %261 : vector<1x128xf32>
    %c5_256 = arith.constant 5 : index
    %c1_257 = arith.constant 1 : index
    %c0_258 = arith.constant 0 : index
    %263 = vector.load %arg8[%c5_256, %c1_257, %c0_258] : memref<6x2x128xf32, #tpu.memory_space<vmem>>, vector<1x1x128xf32>
    %264 = vector.shape_cast %263 : vector<1x1x128xf32> to vector<1x128xf32>
    %265 = vector.shape_cast %262 : vector<1x128xf32> to vector<1x1x128xf32>
    tpu.vector_store %arg8[%c5_256, %c1_257, %c0_258], %265 {strides = array<i32>} : memref<6x2x128xf32, #tpu.memory_space<vmem>>, vector<1x1x128xf32>,
    return
  }
  func.func @transform_0(%arg0: i32) -> (i32, i32, i32) {
    %c0_i32 = arith.constant 0 : i32
    %c0_i32_0 = arith.constant 0 : i32
    %c0_i32_1 = arith.constant 0 : i32
    return %arg0, %c0_i32, %c0_i32_0 : i32, i32, i32
  }
  func.func @transform_1(%arg0: i32) -> (i32, i32) {
    %c0_i32 = arith.constant 0 : i32
    %c0_i32_0 = arith.constant 0 : i32
    %c0_i32_1 = arith.constant 0 : i32
    return %c0_i32, %c0_i32_0 : i32, i32
  }
  func.func @transform_2(%arg0: i32) -> (i32, i32, i32) {
    %c0_i32 = arith.constant 0 : i32
    %c0_i32_0 = arith.constant 0 : i32
    %c0_i32_1 = arith.constant 0 : i32
    %c0_i32_2 = arith.constant 0 : i32
    return %c0_i32, %c0_i32_0, %c0_i32_1 : i32, i32, i32
  }
  func.func @transform_3(%arg0: i32) -> (i32, i32, i32) {
    %c0_i32 = arith.constant 0 : i32
    %c0_i32_0 = arith.constant 0 : i32
    %c0_i32_1 = arith.constant 0 : i32
    %c0_i32_2 = arith.constant 0 : i32
    return %c0_i32, %c0_i32_0, %c0_i32_1 : i32, i32, i32
  }
  func.func @transform_4(%arg0: i32) -> (i32, i32, i32) {
    %c0_i32 = arith.constant 0 : i32
    %c0_i32_0 = arith.constant 0 : i32
    %c0_i32_1 = arith.constant 0 : i32
    %c0_i32_2 = arith.constant 0 : i32
    return %c0_i32, %c0_i32_0, %c0_i32_1 : i32, i32, i32
  }
  func.func @transform_5(%arg0: i32) -> (i32, i32, i32) {
    %c0_i32 = arith.constant 0 : i32
    %c0_i32_0 = arith.constant 0 : i32
    %c0_i32_1 = arith.constant 0 : i32
    %c0_i32_2 = arith.constant 0 : i32
    return %c0_i32, %c0_i32_0, %c0_i32_1 : i32, i32, i32
  }
  func.func @transform_6(%arg0: i32) -> (i32, i32, i32) {
    %c0_i32 = arith.constant 0 : i32
    %c0_i32_0 = arith.constant 0 : i32
    %c0_i32_1 = arith.constant 0 : i32
    %c0_i32_2 = arith.constant 0 : i32
    return %c0_i32, %c0_i32_0, %c0_i32_1 : i32, i32, i32
  }
  func.func @transform_7(%arg0: i32) -> (i32, i32, i32) {
    %c0_i32 = arith.constant 0 : i32
    %c0_i32_0 = arith.constant 0 : i32
    %c0_i32_1 = arith.constant 0 : i32
    return %c0_i32, %arg0, %c0_i32_0 : i32, i32, i32
  }
}

module attributes {stable_mosaic.version = 11 : i64} {
  func.func @_pcb_kernel_sliced(%arg0: i32, %arg1: memref<2x32x48xf32, #tpu.memory_space<vmem>>, %arg2: memref<48x6xf32, #tpu.memory_space<vmem>>, %arg3: memref<6x32x16xf32, #tpu.memory_space<vmem>>, %arg4: memref<6x1x16xf32, #tpu.memory_space<vmem>>, %arg5: memref<6x1x16xf32, #tpu.memory_space<vmem>>, %arg6: memref<6x16x128xf32, #tpu.memory_space<vmem>>, %arg7: memref<6x1x128xf32, #tpu.memory_space<vmem>>, %arg8: memref<6x2x128xf32, #tpu.memory_space<vmem>>) attributes {dimension_semantics = [#tpu.dimension_semantics<parallel>], iteration_bounds = array<i64: 1>, scalar_prefetch = 0 : i64, scratch_operands = 0 : i64, tpu.core_type = #tpu.core_type<tc>, window_params = [{transform_indices = @transform_0, window_bounds = array<i64: 2, 32, 48>}, {pipeline_mode = #tpu.pipeline_mode<synchronous>, transform_indices = @transform_1, window_bounds = array<i64: 48, 6>}, {pipeline_mode = #tpu.pipeline_mode<synchronous>, transform_indices = @transform_2, window_bounds = array<i64: 6, 32, 16>}, {pipeline_mode = #tpu.pipeline_mode<synchronous>, transform_indices = @transform_3, window_bounds = array<i64: 6, 1, 16>}, {pipeline_mode = #tpu.pipeline_mode<synchronous>, transform_indices = @transform_4, window_bounds = array<i64: 6, 1, 16>}, {pipeline_mode = #tpu.pipeline_mode<synchronous>, transform_indices = @transform_5, window_bounds = array<i64: 6, 16, 128>}, {pipeline_mode = #tpu.pipeline_mode<synchronous>, transform_indices = @transform_6, window_bounds = array<i64: 6, 1, 128>}, {transform_indices = @transform_7, window_bounds = array<i64: 6, 2, 128>}]} {
    %c0 = arith.constant 0 : index
    %c0_0 = arith.constant 0 : index
    %c0_1 = arith.constant 0 : index
    %0 = vector.load %arg1[%c0, %c0_0, %c0_1] : memref<2x32x48xf32, #tpu.memory_space<vmem>>, vector<2x32x8xf32>
    %cst = arith.constant dense<0.000000e+00> : vector<2x32xf32>
    %1 = vector.multi_reduction <add>, %0, %cst [2] : vector<2x32x8xf32> to vector<2x32xf32>
    %cst_2 = arith.constant 1.250000e-01 : f32
    %2 = vector.broadcast %cst_2 : f32 to vector<2x32xf32>
    %3 = arith.mulf %1, %2 : vector<2x32xf32>
    %c0_3 = arith.constant 0 : index
    %c0_4 = arith.constant 0 : index
    %c0_5 = arith.constant 0 : index
    %4 = vector.load %arg3[%c0_3, %c0_4, %c0_5] : memref<6x32x16xf32, #tpu.memory_space<vmem>>, vector<1x32x16xf32>
    %5 = vector.shape_cast %4 : vector<1x32x16xf32> to vector<32x16xf32>
    %cst_6 = arith.constant dense<0.000000e+00> : vector<2x16xf32>
    %6 = tpu.matmul %3, %5, %cst_6 {dimension_numbers = #tpu.dot_dimension_numbers<[1], [0], [0], [1], [0, 0, 1, 1], [], []>} : vector<2x32xf32>, vector<32x16xf32>, vector<2x16xf32> -> vector<2x16xf32>
    %c0_7 = arith.constant 0 : index
    %c0_8 = arith.constant 0 : index
    %c0_9 = arith.constant 0 : index
    %7 = vector.load %arg4[%c0_7, %c0_8, %c0_9] : memref<6x1x16xf32, #tpu.memory_space<vmem>>, vector<1x1x16xf32>
    %8 = vector.shape_cast %7 : vector<1x1x16xf32> to vector<1x16xf32>
    %9 = vector.broadcast %8 : vector<1x16xf32> to vector<2x16xf32>
    %10 = arith.mulf %6, %9 : vector<2x16xf32>
    %c0_10 = arith.constant 0 : index
    %c0_11 = arith.constant 0 : index
    %c0_12 = arith.constant 0 : index
    %11 = vector.load %arg5[%c0_10, %c0_11, %c0_12] : memref<6x1x16xf32, #tpu.memory_space<vmem>>, vector<1x1x16xf32>
    %12 = vector.shape_cast %11 : vector<1x1x16xf32> to vector<1x16xf32>
    %13 = vector.broadcast %12 : vector<1x16xf32> to vector<2x16xf32>
    %14 = arith.addf %10, %13 : vector<2x16xf32>
    %cst_13 = arith.constant 0.000000e+00 : f32
    %15 = vector.broadcast %cst_13 : f32 to vector<2x16xf32>
    %16 = arith.maximumf %14, %15 : vector<2x16xf32>
    %c0_14 = arith.constant 0 : index
    %c0_15 = arith.constant 0 : index
    %c0_16 = arith.constant 0 : index
    %17 = vector.load %arg6[%c0_14, %c0_15, %c0_16] : memref<6x16x128xf32, #tpu.memory_space<vmem>>, vector<1x16x128xf32>
    %18 = vector.shape_cast %17 : vector<1x16x128xf32> to vector<16x128xf32>
    %cst_17 = arith.constant dense<0.000000e+00> : vector<2x128xf32>
    %19 = tpu.matmul %16, %18, %cst_17 {dimension_numbers = #tpu.dot_dimension_numbers<[1], [0], [0], [1], [0, 0, 1, 1], [], []>} : vector<2x16xf32>, vector<16x128xf32>, vector<2x128xf32> -> vector<2x128xf32>
    %c0_18 = arith.constant 0 : index
    %c0_19 = arith.constant 0 : index
    %c0_20 = arith.constant 0 : index
    %20 = vector.load %arg7[%c0_18, %c0_19, %c0_20] : memref<6x1x128xf32, #tpu.memory_space<vmem>>, vector<1x1x128xf32>
    %21 = vector.shape_cast %20 : vector<1x1x128xf32> to vector<1x128xf32>
    %22 = vector.broadcast %21 : vector<1x128xf32> to vector<2x128xf32>
    %23 = arith.addf %19, %22 : vector<2x128xf32>
    %c0_21 = arith.constant 0 : index
    %c0_22 = arith.constant 0 : index
    %c0_23 = arith.constant 0 : index
    %24 = vector.load %arg8[%c0_21, %c0_22, %c0_23] : memref<6x2x128xf32, #tpu.memory_space<vmem>>, vector<1x2x128xf32>
    %25 = vector.shape_cast %24 : vector<1x2x128xf32> to vector<2x128xf32>
    %26 = vector.shape_cast %23 : vector<2x128xf32> to vector<1x2x128xf32>
    tpu.vector_store %arg8[%c0_21, %c0_22, %c0_23], %26 {strides = array<i32>} : memref<6x2x128xf32, #tpu.memory_space<vmem>>, vector<1x2x128xf32>,
    %c0_24 = arith.constant 0 : index
    %c0_25 = arith.constant 0 : index
    %c8 = arith.constant 8 : index
    %27 = vector.load %arg1[%c0_24, %c0_25, %c8] : memref<2x32x48xf32, #tpu.memory_space<vmem>>, vector<2x32x8xf32>
    %cst_26 = arith.constant dense<0.000000e+00> : vector<2x32xf32>
    %28 = vector.multi_reduction <add>, %27, %cst_26 [2] : vector<2x32x8xf32> to vector<2x32xf32>
    %cst_27 = arith.constant 1.250000e-01 : f32
    %29 = vector.broadcast %cst_27 : f32 to vector<2x32xf32>
    %30 = arith.mulf %28, %29 : vector<2x32xf32>
    %c1 = arith.constant 1 : index
    %c0_28 = arith.constant 0 : index
    %c0_29 = arith.constant 0 : index
    %31 = vector.load %arg3[%c1, %c0_28, %c0_29] : memref<6x32x16xf32, #tpu.memory_space<vmem>>, vector<1x32x16xf32>
    %32 = vector.shape_cast %31 : vector<1x32x16xf32> to vector<32x16xf32>
    %cst_30 = arith.constant dense<0.000000e+00> : vector<2x16xf32>
    %33 = tpu.matmul %30, %32, %cst_30 {dimension_numbers = #tpu.dot_dimension_numbers<[1], [0], [0], [1], [0, 0, 1, 1], [], []>} : vector<2x32xf32>, vector<32x16xf32>, vector<2x16xf32> -> vector<2x16xf32>
    %c1_31 = arith.constant 1 : index
    %c0_32 = arith.constant 0 : index
    %c0_33 = arith.constant 0 : index
    %34 = vector.load %arg4[%c1_31, %c0_32, %c0_33] : memref<6x1x16xf32, #tpu.memory_space<vmem>>, vector<1x1x16xf32>
    %35 = vector.shape_cast %34 : vector<1x1x16xf32> to vector<1x16xf32>
    %36 = vector.broadcast %35 : vector<1x16xf32> to vector<2x16xf32>
    %37 = arith.mulf %33, %36 : vector<2x16xf32>
    %c1_34 = arith.constant 1 : index
    %c0_35 = arith.constant 0 : index
    %c0_36 = arith.constant 0 : index
    %38 = vector.load %arg5[%c1_34, %c0_35, %c0_36] : memref<6x1x16xf32, #tpu.memory_space<vmem>>, vector<1x1x16xf32>
    %39 = vector.shape_cast %38 : vector<1x1x16xf32> to vector<1x16xf32>
    %40 = vector.broadcast %39 : vector<1x16xf32> to vector<2x16xf32>
    %41 = arith.addf %37, %40 : vector<2x16xf32>
    %cst_37 = arith.constant 0.000000e+00 : f32
    %42 = vector.broadcast %cst_37 : f32 to vector<2x16xf32>
    %43 = arith.maximumf %41, %42 : vector<2x16xf32>
    %c1_38 = arith.constant 1 : index
    %c0_39 = arith.constant 0 : index
    %c0_40 = arith.constant 0 : index
    %44 = vector.load %arg6[%c1_38, %c0_39, %c0_40] : memref<6x16x128xf32, #tpu.memory_space<vmem>>, vector<1x16x128xf32>
    %45 = vector.shape_cast %44 : vector<1x16x128xf32> to vector<16x128xf32>
    %cst_41 = arith.constant dense<0.000000e+00> : vector<2x128xf32>
    %46 = tpu.matmul %43, %45, %cst_41 {dimension_numbers = #tpu.dot_dimension_numbers<[1], [0], [0], [1], [0, 0, 1, 1], [], []>} : vector<2x16xf32>, vector<16x128xf32>, vector<2x128xf32> -> vector<2x128xf32>
    %c1_42 = arith.constant 1 : index
    %c0_43 = arith.constant 0 : index
    %c0_44 = arith.constant 0 : index
    %47 = vector.load %arg7[%c1_42, %c0_43, %c0_44] : memref<6x1x128xf32, #tpu.memory_space<vmem>>, vector<1x1x128xf32>
    %48 = vector.shape_cast %47 : vector<1x1x128xf32> to vector<1x128xf32>
    %49 = vector.broadcast %48 : vector<1x128xf32> to vector<2x128xf32>
    %50 = arith.addf %46, %49 : vector<2x128xf32>
    %c1_45 = arith.constant 1 : index
    %c0_46 = arith.constant 0 : index
    %c0_47 = arith.constant 0 : index
    %51 = vector.load %arg8[%c1_45, %c0_46, %c0_47] : memref<6x2x128xf32, #tpu.memory_space<vmem>>, vector<1x2x128xf32>
    %52 = vector.shape_cast %51 : vector<1x2x128xf32> to vector<2x128xf32>
    %53 = vector.shape_cast %50 : vector<2x128xf32> to vector<1x2x128xf32>
    tpu.vector_store %arg8[%c1_45, %c0_46, %c0_47], %53 {strides = array<i32>} : memref<6x2x128xf32, #tpu.memory_space<vmem>>, vector<1x2x128xf32>,
    %c0_48 = arith.constant 0 : index
    %c0_49 = arith.constant 0 : index
    %c16 = arith.constant 16 : index
    %54 = vector.load %arg1[%c0_48, %c0_49, %c16] : memref<2x32x48xf32, #tpu.memory_space<vmem>>, vector<2x32x8xf32>
    %cst_50 = arith.constant dense<0.000000e+00> : vector<2x32xf32>
    %55 = vector.multi_reduction <add>, %54, %cst_50 [2] : vector<2x32x8xf32> to vector<2x32xf32>
    %cst_51 = arith.constant 1.250000e-01 : f32
    %56 = vector.broadcast %cst_51 : f32 to vector<2x32xf32>
    %57 = arith.mulf %55, %56 : vector<2x32xf32>
    %c2 = arith.constant 2 : index
    %c0_52 = arith.constant 0 : index
    %c0_53 = arith.constant 0 : index
    %58 = vector.load %arg3[%c2, %c0_52, %c0_53] : memref<6x32x16xf32, #tpu.memory_space<vmem>>, vector<1x32x16xf32>
    %59 = vector.shape_cast %58 : vector<1x32x16xf32> to vector<32x16xf32>
    %cst_54 = arith.constant dense<0.000000e+00> : vector<2x16xf32>
    %60 = tpu.matmul %57, %59, %cst_54 {dimension_numbers = #tpu.dot_dimension_numbers<[1], [0], [0], [1], [0, 0, 1, 1], [], []>} : vector<2x32xf32>, vector<32x16xf32>, vector<2x16xf32> -> vector<2x16xf32>
    %c2_55 = arith.constant 2 : index
    %c0_56 = arith.constant 0 : index
    %c0_57 = arith.constant 0 : index
    %61 = vector.load %arg4[%c2_55, %c0_56, %c0_57] : memref<6x1x16xf32, #tpu.memory_space<vmem>>, vector<1x1x16xf32>
    %62 = vector.shape_cast %61 : vector<1x1x16xf32> to vector<1x16xf32>
    %63 = vector.broadcast %62 : vector<1x16xf32> to vector<2x16xf32>
    %64 = arith.mulf %60, %63 : vector<2x16xf32>
    %c2_58 = arith.constant 2 : index
    %c0_59 = arith.constant 0 : index
    %c0_60 = arith.constant 0 : index
    %65 = vector.load %arg5[%c2_58, %c0_59, %c0_60] : memref<6x1x16xf32, #tpu.memory_space<vmem>>, vector<1x1x16xf32>
    %66 = vector.shape_cast %65 : vector<1x1x16xf32> to vector<1x16xf32>
    %67 = vector.broadcast %66 : vector<1x16xf32> to vector<2x16xf32>
    %68 = arith.addf %64, %67 : vector<2x16xf32>
    %cst_61 = arith.constant 0.000000e+00 : f32
    %69 = vector.broadcast %cst_61 : f32 to vector<2x16xf32>
    %70 = arith.maximumf %68, %69 : vector<2x16xf32>
    %c2_62 = arith.constant 2 : index
    %c0_63 = arith.constant 0 : index
    %c0_64 = arith.constant 0 : index
    %71 = vector.load %arg6[%c2_62, %c0_63, %c0_64] : memref<6x16x128xf32, #tpu.memory_space<vmem>>, vector<1x16x128xf32>
    %72 = vector.shape_cast %71 : vector<1x16x128xf32> to vector<16x128xf32>
    %cst_65 = arith.constant dense<0.000000e+00> : vector<2x128xf32>
    %73 = tpu.matmul %70, %72, %cst_65 {dimension_numbers = #tpu.dot_dimension_numbers<[1], [0], [0], [1], [0, 0, 1, 1], [], []>} : vector<2x16xf32>, vector<16x128xf32>, vector<2x128xf32> -> vector<2x128xf32>
    %c2_66 = arith.constant 2 : index
    %c0_67 = arith.constant 0 : index
    %c0_68 = arith.constant 0 : index
    %74 = vector.load %arg7[%c2_66, %c0_67, %c0_68] : memref<6x1x128xf32, #tpu.memory_space<vmem>>, vector<1x1x128xf32>
    %75 = vector.shape_cast %74 : vector<1x1x128xf32> to vector<1x128xf32>
    %76 = vector.broadcast %75 : vector<1x128xf32> to vector<2x128xf32>
    %77 = arith.addf %73, %76 : vector<2x128xf32>
    %c2_69 = arith.constant 2 : index
    %c0_70 = arith.constant 0 : index
    %c0_71 = arith.constant 0 : index
    %78 = vector.load %arg8[%c2_69, %c0_70, %c0_71] : memref<6x2x128xf32, #tpu.memory_space<vmem>>, vector<1x2x128xf32>
    %79 = vector.shape_cast %78 : vector<1x2x128xf32> to vector<2x128xf32>
    %80 = vector.shape_cast %77 : vector<2x128xf32> to vector<1x2x128xf32>
    tpu.vector_store %arg8[%c2_69, %c0_70, %c0_71], %80 {strides = array<i32>} : memref<6x2x128xf32, #tpu.memory_space<vmem>>, vector<1x2x128xf32>,
    %c0_72 = arith.constant 0 : index
    %c0_73 = arith.constant 0 : index
    %c24 = arith.constant 24 : index
    %81 = vector.load %arg1[%c0_72, %c0_73, %c24] : memref<2x32x48xf32, #tpu.memory_space<vmem>>, vector<2x32x8xf32>
    %cst_74 = arith.constant dense<0.000000e+00> : vector<2x32xf32>
    %82 = vector.multi_reduction <add>, %81, %cst_74 [2] : vector<2x32x8xf32> to vector<2x32xf32>
    %cst_75 = arith.constant 1.250000e-01 : f32
    %83 = vector.broadcast %cst_75 : f32 to vector<2x32xf32>
    %84 = arith.mulf %82, %83 : vector<2x32xf32>
    %c3 = arith.constant 3 : index
    %c0_76 = arith.constant 0 : index
    %c0_77 = arith.constant 0 : index
    %85 = vector.load %arg3[%c3, %c0_76, %c0_77] : memref<6x32x16xf32, #tpu.memory_space<vmem>>, vector<1x32x16xf32>
    %86 = vector.shape_cast %85 : vector<1x32x16xf32> to vector<32x16xf32>
    %cst_78 = arith.constant dense<0.000000e+00> : vector<2x16xf32>
    %87 = tpu.matmul %84, %86, %cst_78 {dimension_numbers = #tpu.dot_dimension_numbers<[1], [0], [0], [1], [0, 0, 1, 1], [], []>} : vector<2x32xf32>, vector<32x16xf32>, vector<2x16xf32> -> vector<2x16xf32>
    %c3_79 = arith.constant 3 : index
    %c0_80 = arith.constant 0 : index
    %c0_81 = arith.constant 0 : index
    %88 = vector.load %arg4[%c3_79, %c0_80, %c0_81] : memref<6x1x16xf32, #tpu.memory_space<vmem>>, vector<1x1x16xf32>
    %89 = vector.shape_cast %88 : vector<1x1x16xf32> to vector<1x16xf32>
    %90 = vector.broadcast %89 : vector<1x16xf32> to vector<2x16xf32>
    %91 = arith.mulf %87, %90 : vector<2x16xf32>
    %c3_82 = arith.constant 3 : index
    %c0_83 = arith.constant 0 : index
    %c0_84 = arith.constant 0 : index
    %92 = vector.load %arg5[%c3_82, %c0_83, %c0_84] : memref<6x1x16xf32, #tpu.memory_space<vmem>>, vector<1x1x16xf32>
    %93 = vector.shape_cast %92 : vector<1x1x16xf32> to vector<1x16xf32>
    %94 = vector.broadcast %93 : vector<1x16xf32> to vector<2x16xf32>
    %95 = arith.addf %91, %94 : vector<2x16xf32>
    %cst_85 = arith.constant 0.000000e+00 : f32
    %96 = vector.broadcast %cst_85 : f32 to vector<2x16xf32>
    %97 = arith.maximumf %95, %96 : vector<2x16xf32>
    %c3_86 = arith.constant 3 : index
    %c0_87 = arith.constant 0 : index
    %c0_88 = arith.constant 0 : index
    %98 = vector.load %arg6[%c3_86, %c0_87, %c0_88] : memref<6x16x128xf32, #tpu.memory_space<vmem>>, vector<1x16x128xf32>
    %99 = vector.shape_cast %98 : vector<1x16x128xf32> to vector<16x128xf32>
    %cst_89 = arith.constant dense<0.000000e+00> : vector<2x128xf32>
    %100 = tpu.matmul %97, %99, %cst_89 {dimension_numbers = #tpu.dot_dimension_numbers<[1], [0], [0], [1], [0, 0, 1, 1], [], []>} : vector<2x16xf32>, vector<16x128xf32>, vector<2x128xf32> -> vector<2x128xf32>
    %c3_90 = arith.constant 3 : index
    %c0_91 = arith.constant 0 : index
    %c0_92 = arith.constant 0 : index
    %101 = vector.load %arg7[%c3_90, %c0_91, %c0_92] : memref<6x1x128xf32, #tpu.memory_space<vmem>>, vector<1x1x128xf32>
    %102 = vector.shape_cast %101 : vector<1x1x128xf32> to vector<1x128xf32>
    %103 = vector.broadcast %102 : vector<1x128xf32> to vector<2x128xf32>
    %104 = arith.addf %100, %103 : vector<2x128xf32>
    %c3_93 = arith.constant 3 : index
    %c0_94 = arith.constant 0 : index
    %c0_95 = arith.constant 0 : index
    %105 = vector.load %arg8[%c3_93, %c0_94, %c0_95] : memref<6x2x128xf32, #tpu.memory_space<vmem>>, vector<1x2x128xf32>
    %106 = vector.shape_cast %105 : vector<1x2x128xf32> to vector<2x128xf32>
    %107 = vector.shape_cast %104 : vector<2x128xf32> to vector<1x2x128xf32>
    tpu.vector_store %arg8[%c3_93, %c0_94, %c0_95], %107 {strides = array<i32>} : memref<6x2x128xf32, #tpu.memory_space<vmem>>, vector<1x2x128xf32>,
    %c0_96 = arith.constant 0 : index
    %c0_97 = arith.constant 0 : index
    %c32 = arith.constant 32 : index
    %108 = vector.load %arg1[%c0_96, %c0_97, %c32] : memref<2x32x48xf32, #tpu.memory_space<vmem>>, vector<2x32x8xf32>
    %cst_98 = arith.constant dense<0.000000e+00> : vector<2x32xf32>
    %109 = vector.multi_reduction <add>, %108, %cst_98 [2] : vector<2x32x8xf32> to vector<2x32xf32>
    %cst_99 = arith.constant 1.250000e-01 : f32
    %110 = vector.broadcast %cst_99 : f32 to vector<2x32xf32>
    %111 = arith.mulf %109, %110 : vector<2x32xf32>
    %c4 = arith.constant 4 : index
    %c0_100 = arith.constant 0 : index
    %c0_101 = arith.constant 0 : index
    %112 = vector.load %arg3[%c4, %c0_100, %c0_101] : memref<6x32x16xf32, #tpu.memory_space<vmem>>, vector<1x32x16xf32>
    %113 = vector.shape_cast %112 : vector<1x32x16xf32> to vector<32x16xf32>
    %cst_102 = arith.constant dense<0.000000e+00> : vector<2x16xf32>
    %114 = tpu.matmul %111, %113, %cst_102 {dimension_numbers = #tpu.dot_dimension_numbers<[1], [0], [0], [1], [0, 0, 1, 1], [], []>} : vector<2x32xf32>, vector<32x16xf32>, vector<2x16xf32> -> vector<2x16xf32>
    %c4_103 = arith.constant 4 : index
    %c0_104 = arith.constant 0 : index
    %c0_105 = arith.constant 0 : index
    %115 = vector.load %arg4[%c4_103, %c0_104, %c0_105] : memref<6x1x16xf32, #tpu.memory_space<vmem>>, vector<1x1x16xf32>
    %116 = vector.shape_cast %115 : vector<1x1x16xf32> to vector<1x16xf32>
    %117 = vector.broadcast %116 : vector<1x16xf32> to vector<2x16xf32>
    %118 = arith.mulf %114, %117 : vector<2x16xf32>
    %c4_106 = arith.constant 4 : index
    %c0_107 = arith.constant 0 : index
    %c0_108 = arith.constant 0 : index
    %119 = vector.load %arg5[%c4_106, %c0_107, %c0_108] : memref<6x1x16xf32, #tpu.memory_space<vmem>>, vector<1x1x16xf32>
    %120 = vector.shape_cast %119 : vector<1x1x16xf32> to vector<1x16xf32>
    %121 = vector.broadcast %120 : vector<1x16xf32> to vector<2x16xf32>
    %122 = arith.addf %118, %121 : vector<2x16xf32>
    %cst_109 = arith.constant 0.000000e+00 : f32
    %123 = vector.broadcast %cst_109 : f32 to vector<2x16xf32>
    %124 = arith.maximumf %122, %123 : vector<2x16xf32>
    %c4_110 = arith.constant 4 : index
    %c0_111 = arith.constant 0 : index
    %c0_112 = arith.constant 0 : index
    %125 = vector.load %arg6[%c4_110, %c0_111, %c0_112] : memref<6x16x128xf32, #tpu.memory_space<vmem>>, vector<1x16x128xf32>
    %126 = vector.shape_cast %125 : vector<1x16x128xf32> to vector<16x128xf32>
    %cst_113 = arith.constant dense<0.000000e+00> : vector<2x128xf32>
    %127 = tpu.matmul %124, %126, %cst_113 {dimension_numbers = #tpu.dot_dimension_numbers<[1], [0], [0], [1], [0, 0, 1, 1], [], []>} : vector<2x16xf32>, vector<16x128xf32>, vector<2x128xf32> -> vector<2x128xf32>
    %c4_114 = arith.constant 4 : index
    %c0_115 = arith.constant 0 : index
    %c0_116 = arith.constant 0 : index
    %128 = vector.load %arg7[%c4_114, %c0_115, %c0_116] : memref<6x1x128xf32, #tpu.memory_space<vmem>>, vector<1x1x128xf32>
    %129 = vector.shape_cast %128 : vector<1x1x128xf32> to vector<1x128xf32>
    %130 = vector.broadcast %129 : vector<1x128xf32> to vector<2x128xf32>
    %131 = arith.addf %127, %130 : vector<2x128xf32>
    %c4_117 = arith.constant 4 : index
    %c0_118 = arith.constant 0 : index
    %c0_119 = arith.constant 0 : index
    %132 = vector.load %arg8[%c4_117, %c0_118, %c0_119] : memref<6x2x128xf32, #tpu.memory_space<vmem>>, vector<1x2x128xf32>
    %133 = vector.shape_cast %132 : vector<1x2x128xf32> to vector<2x128xf32>
    %134 = vector.shape_cast %131 : vector<2x128xf32> to vector<1x2x128xf32>
    tpu.vector_store %arg8[%c4_117, %c0_118, %c0_119], %134 {strides = array<i32>} : memref<6x2x128xf32, #tpu.memory_space<vmem>>, vector<1x2x128xf32>,
    %c0_120 = arith.constant 0 : index
    %c0_121 = arith.constant 0 : index
    %c40 = arith.constant 40 : index
    %135 = vector.load %arg1[%c0_120, %c0_121, %c40] : memref<2x32x48xf32, #tpu.memory_space<vmem>>, vector<2x32x8xf32>
    %cst_122 = arith.constant dense<0.000000e+00> : vector<2x32xf32>
    %136 = vector.multi_reduction <add>, %135, %cst_122 [2] : vector<2x32x8xf32> to vector<2x32xf32>
    %cst_123 = arith.constant 1.250000e-01 : f32
    %137 = vector.broadcast %cst_123 : f32 to vector<2x32xf32>
    %138 = arith.mulf %136, %137 : vector<2x32xf32>
    %c5 = arith.constant 5 : index
    %c0_124 = arith.constant 0 : index
    %c0_125 = arith.constant 0 : index
    %139 = vector.load %arg3[%c5, %c0_124, %c0_125] : memref<6x32x16xf32, #tpu.memory_space<vmem>>, vector<1x32x16xf32>
    %140 = vector.shape_cast %139 : vector<1x32x16xf32> to vector<32x16xf32>
    %cst_126 = arith.constant dense<0.000000e+00> : vector<2x16xf32>
    %141 = tpu.matmul %138, %140, %cst_126 {dimension_numbers = #tpu.dot_dimension_numbers<[1], [0], [0], [1], [0, 0, 1, 1], [], []>} : vector<2x32xf32>, vector<32x16xf32>, vector<2x16xf32> -> vector<2x16xf32>
    %c5_127 = arith.constant 5 : index
    %c0_128 = arith.constant 0 : index
    %c0_129 = arith.constant 0 : index
    %142 = vector.load %arg4[%c5_127, %c0_128, %c0_129] : memref<6x1x16xf32, #tpu.memory_space<vmem>>, vector<1x1x16xf32>
    %143 = vector.shape_cast %142 : vector<1x1x16xf32> to vector<1x16xf32>
    %144 = vector.broadcast %143 : vector<1x16xf32> to vector<2x16xf32>
    %145 = arith.mulf %141, %144 : vector<2x16xf32>
    %c5_130 = arith.constant 5 : index
    %c0_131 = arith.constant 0 : index
    %c0_132 = arith.constant 0 : index
    %146 = vector.load %arg5[%c5_130, %c0_131, %c0_132] : memref<6x1x16xf32, #tpu.memory_space<vmem>>, vector<1x1x16xf32>
    %147 = vector.shape_cast %146 : vector<1x1x16xf32> to vector<1x16xf32>
    %148 = vector.broadcast %147 : vector<1x16xf32> to vector<2x16xf32>
    %149 = arith.addf %145, %148 : vector<2x16xf32>
    %cst_133 = arith.constant 0.000000e+00 : f32
    %150 = vector.broadcast %cst_133 : f32 to vector<2x16xf32>
    %151 = arith.maximumf %149, %150 : vector<2x16xf32>
    %c5_134 = arith.constant 5 : index
    %c0_135 = arith.constant 0 : index
    %c0_136 = arith.constant 0 : index
    %152 = vector.load %arg6[%c5_134, %c0_135, %c0_136] : memref<6x16x128xf32, #tpu.memory_space<vmem>>, vector<1x16x128xf32>
    %153 = vector.shape_cast %152 : vector<1x16x128xf32> to vector<16x128xf32>
    %cst_137 = arith.constant dense<0.000000e+00> : vector<2x128xf32>
    %154 = tpu.matmul %151, %153, %cst_137 {dimension_numbers = #tpu.dot_dimension_numbers<[1], [0], [0], [1], [0, 0, 1, 1], [], []>} : vector<2x16xf32>, vector<16x128xf32>, vector<2x128xf32> -> vector<2x128xf32>
    %c5_138 = arith.constant 5 : index
    %c0_139 = arith.constant 0 : index
    %c0_140 = arith.constant 0 : index
    %155 = vector.load %arg7[%c5_138, %c0_139, %c0_140] : memref<6x1x128xf32, #tpu.memory_space<vmem>>, vector<1x1x128xf32>
    %156 = vector.shape_cast %155 : vector<1x1x128xf32> to vector<1x128xf32>
    %157 = vector.broadcast %156 : vector<1x128xf32> to vector<2x128xf32>
    %158 = arith.addf %154, %157 : vector<2x128xf32>
    %c5_141 = arith.constant 5 : index
    %c0_142 = arith.constant 0 : index
    %c0_143 = arith.constant 0 : index
    %159 = vector.load %arg8[%c5_141, %c0_142, %c0_143] : memref<6x2x128xf32, #tpu.memory_space<vmem>>, vector<1x2x128xf32>
    %160 = vector.shape_cast %159 : vector<1x2x128xf32> to vector<2x128xf32>
    %161 = vector.shape_cast %158 : vector<2x128xf32> to vector<1x2x128xf32>
    tpu.vector_store %arg8[%c5_141, %c0_142, %c0_143], %161 {strides = array<i32>} : memref<6x2x128xf32, #tpu.memory_space<vmem>>, vector<1x2x128xf32>,
    return
  }
  func.func @transform_0(%arg0: i32) -> (i32, i32, i32) {
    %c0_i32 = arith.constant 0 : i32
    %c0_i32_0 = arith.constant 0 : i32
    %c0_i32_1 = arith.constant 0 : i32
    return %arg0, %c0_i32, %c0_i32_0 : i32, i32, i32
  }
  func.func @transform_1(%arg0: i32) -> (i32, i32) {
    %c0_i32 = arith.constant 0 : i32
    %c0_i32_0 = arith.constant 0 : i32
    %c0_i32_1 = arith.constant 0 : i32
    return %c0_i32, %c0_i32_0 : i32, i32
  }
  func.func @transform_2(%arg0: i32) -> (i32, i32, i32) {
    %c0_i32 = arith.constant 0 : i32
    %c0_i32_0 = arith.constant 0 : i32
    %c0_i32_1 = arith.constant 0 : i32
    %c0_i32_2 = arith.constant 0 : i32
    return %c0_i32, %c0_i32_0, %c0_i32_1 : i32, i32, i32
  }
  func.func @transform_3(%arg0: i32) -> (i32, i32, i32) {
    %c0_i32 = arith.constant 0 : i32
    %c0_i32_0 = arith.constant 0 : i32
    %c0_i32_1 = arith.constant 0 : i32
    %c0_i32_2 = arith.constant 0 : i32
    return %c0_i32, %c0_i32_0, %c0_i32_1 : i32, i32, i32
  }
  func.func @transform_4(%arg0: i32) -> (i32, i32, i32) {
    %c0_i32 = arith.constant 0 : i32
    %c0_i32_0 = arith.constant 0 : i32
    %c0_i32_1 = arith.constant 0 : i32
    %c0_i32_2 = arith.constant 0 : i32
    return %c0_i32, %c0_i32_0, %c0_i32_1 : i32, i32, i32
  }
  func.func @transform_5(%arg0: i32) -> (i32, i32, i32) {
    %c0_i32 = arith.constant 0 : i32
    %c0_i32_0 = arith.constant 0 : i32
    %c0_i32_1 = arith.constant 0 : i32
    %c0_i32_2 = arith.constant 0 : i32
    return %c0_i32, %c0_i32_0, %c0_i32_1 : i32, i32, i32
  }
  func.func @transform_6(%arg0: i32) -> (i32, i32, i32) {
    %c0_i32 = arith.constant 0 : i32
    %c0_i32_0 = arith.constant 0 : i32
    %c0_i32_1 = arith.constant 0 : i32
    %c0_i32_2 = arith.constant 0 : i32
    return %c0_i32, %c0_i32_0, %c0_i32_1 : i32, i32, i32
  }
  func.func @transform_7(%arg0: i32) -> (i32, i32, i32) {
    %c0_i32 = arith.constant 0 : i32
    %c0_i32_0 = arith.constant 0 : i32
    %c0_i32_1 = arith.constant 0 : i32
    return %c0_i32, %arg0, %c0_i32_0 : i32, i32, i32
  }
}

module attributes {stable_mosaic.version = 11 : i64} {
  func.func @_pcb_kernel_sliced(%arg0: i32, %arg1: memref<2x32x48xf32, #tpu.memory_space<vmem>>, %arg2: memref<48x6xf32, #tpu.memory_space<vmem>>, %arg3: memref<6x32x16xf32, #tpu.memory_space<vmem>>, %arg4: memref<6x1x16xf32, #tpu.memory_space<vmem>>, %arg5: memref<6x1x16xf32, #tpu.memory_space<vmem>>, %arg6: memref<6x16x128xf32, #tpu.memory_space<vmem>>, %arg7: memref<6x1x128xf32, #tpu.memory_space<vmem>>, %arg8: memref<6x2x128xf32, #tpu.memory_space<vmem>>) attributes {dimension_semantics = [#tpu.dimension_semantics<parallel>], iteration_bounds = array<i64: 1>, scalar_prefetch = 0 : i64, scratch_operands = 0 : i64, tpu.core_type = #tpu.core_type<tc>, window_params = [{transform_indices = @transform_0, window_bounds = array<i64: 2, 32, 48>}, {pipeline_mode = #tpu.pipeline_mode<synchronous>, transform_indices = @transform_1, window_bounds = array<i64: 48, 6>}, {pipeline_mode = #tpu.pipeline_mode<synchronous>, transform_indices = @transform_2, window_bounds = array<i64: 6, 32, 16>}, {pipeline_mode = #tpu.pipeline_mode<synchronous>, transform_indices = @transform_3, window_bounds = array<i64: 6, 1, 16>}, {pipeline_mode = #tpu.pipeline_mode<synchronous>, transform_indices = @transform_4, window_bounds = array<i64: 6, 1, 16>}, {pipeline_mode = #tpu.pipeline_mode<synchronous>, transform_indices = @transform_5, window_bounds = array<i64: 6, 16, 128>}, {pipeline_mode = #tpu.pipeline_mode<synchronous>, transform_indices = @transform_6, window_bounds = array<i64: 6, 1, 128>}, {transform_indices = @transform_7, window_bounds = array<i64: 6, 2, 128>}]} {
    %c0 = arith.constant 0 : index
    %c0_0 = arith.constant 0 : index
    %c0_1 = arith.constant 0 : index
    %0 = vector.load %arg1[%c0, %c0_0, %c0_1] : memref<2x32x48xf32, #tpu.memory_space<vmem>>, vector<2x32x8xf32>
    %cst = arith.constant dense<0.000000e+00> : vector<2x32xf32>
    %1 = vector.multi_reduction <add>, %0, %cst [2] : vector<2x32x8xf32> to vector<2x32xf32>
    %cst_2 = arith.constant 1.250000e-01 : f32
    %2 = vector.broadcast %cst_2 : f32 to vector<2x32xf32>
    %3 = arith.mulf %1, %2 : vector<2x32xf32>
    %c0_3 = arith.constant 0 : index
    %c0_4 = arith.constant 0 : index
    %c0_5 = arith.constant 0 : index
    %4 = vector.load %arg3[%c0_3, %c0_4, %c0_5] : memref<6x32x16xf32, #tpu.memory_space<vmem>>, vector<1x32x16xf32>
    %5 = vector.shape_cast %4 : vector<1x32x16xf32> to vector<32x16xf32>
    %cst_6 = arith.constant dense<0.000000e+00> : vector<2x16xf32>
    %6 = tpu.matmul %3, %5, %cst_6 {dimension_numbers = #tpu.dot_dimension_numbers<[1], [0], [0], [1], [0, 0, 1, 1], [], []>} : vector<2x32xf32>, vector<32x16xf32>, vector<2x16xf32> -> vector<2x16xf32>
    %c0_7 = arith.constant 0 : index
    %c0_8 = arith.constant 0 : index
    %c0_9 = arith.constant 0 : index
    %7 = vector.load %arg4[%c0_7, %c0_8, %c0_9] : memref<6x1x16xf32, #tpu.memory_space<vmem>>, vector<1x1x16xf32>
    %8 = vector.shape_cast %7 : vector<1x1x16xf32> to vector<1x16xf32>
    %9 = vector.broadcast %8 : vector<1x16xf32> to vector<2x16xf32>
    %10 = arith.mulf %6, %9 : vector<2x16xf32>
    %c0_10 = arith.constant 0 : index
    %c0_11 = arith.constant 0 : index
    %c0_12 = arith.constant 0 : index
    %11 = vector.load %arg5[%c0_10, %c0_11, %c0_12] : memref<6x1x16xf32, #tpu.memory_space<vmem>>, vector<1x1x16xf32>
    %12 = vector.shape_cast %11 : vector<1x1x16xf32> to vector<1x16xf32>
    %13 = vector.broadcast %12 : vector<1x16xf32> to vector<2x16xf32>
    %14 = arith.addf %10, %13 : vector<2x16xf32>
    %cst_13 = arith.constant 0.000000e+00 : f32
    %15 = vector.broadcast %cst_13 : f32 to vector<2x16xf32>
    %16 = arith.maximumf %14, %15 : vector<2x16xf32>
    %c0_14 = arith.constant 0 : index
    %c0_15 = arith.constant 0 : index
    %c0_16 = arith.constant 0 : index
    %17 = vector.load %arg6[%c0_14, %c0_15, %c0_16] : memref<6x16x128xf32, #tpu.memory_space<vmem>>, vector<1x16x128xf32>
    %18 = vector.shape_cast %17 : vector<1x16x128xf32> to vector<16x128xf32>
    %cst_17 = arith.constant dense<0.000000e+00> : vector<2x128xf32>
    %19 = tpu.matmul %16, %18, %cst_17 {dimension_numbers = #tpu.dot_dimension_numbers<[1], [0], [0], [1], [0, 0, 1, 1], [], []>} : vector<2x16xf32>, vector<16x128xf32>, vector<2x128xf32> -> vector<2x128xf32>
    %c0_18 = arith.constant 0 : index
    %c0_19 = arith.constant 0 : index
    %c0_20 = arith.constant 0 : index
    %20 = vector.load %arg7[%c0_18, %c0_19, %c0_20] : memref<6x1x128xf32, #tpu.memory_space<vmem>>, vector<1x1x128xf32>
    %21 = vector.shape_cast %20 : vector<1x1x128xf32> to vector<1x128xf32>
    %22 = vector.broadcast %21 : vector<1x128xf32> to vector<2x128xf32>
    %23 = arith.addf %19, %22 : vector<2x128xf32>
    %c0_21 = arith.constant 0 : index
    %c0_22 = arith.constant 0 : index
    %c0_23 = arith.constant 0 : index
    %24 = vector.load %arg8[%c0_21, %c0_22, %c0_23] : memref<6x2x128xf32, #tpu.memory_space<vmem>>, vector<1x2x128xf32>
    %25 = vector.shape_cast %24 : vector<1x2x128xf32> to vector<2x128xf32>
    %26 = vector.shape_cast %23 : vector<2x128xf32> to vector<1x2x128xf32>
    tpu.vector_store %arg8[%c0_21, %c0_22, %c0_23], %26 {strides = array<i32>} : memref<6x2x128xf32, #tpu.memory_space<vmem>>, vector<1x2x128xf32>,
    %c0_24 = arith.constant 0 : index
    %c0_25 = arith.constant 0 : index
    %c8 = arith.constant 8 : index
    %27 = vector.load %arg1[%c0_24, %c0_25, %c8] : memref<2x32x48xf32, #tpu.memory_space<vmem>>, vector<2x32x8xf32>
    %cst_26 = arith.constant dense<0.000000e+00> : vector<2x32xf32>
    %28 = vector.multi_reduction <add>, %27, %cst_26 [2] : vector<2x32x8xf32> to vector<2x32xf32>
    %cst_27 = arith.constant 1.250000e-01 : f32
    %29 = vector.broadcast %cst_27 : f32 to vector<2x32xf32>
    %30 = arith.mulf %28, %29 : vector<2x32xf32>
    %c1 = arith.constant 1 : index
    %c0_28 = arith.constant 0 : index
    %c0_29 = arith.constant 0 : index
    %31 = vector.load %arg3[%c1, %c0_28, %c0_29] : memref<6x32x16xf32, #tpu.memory_space<vmem>>, vector<1x32x16xf32>
    %32 = vector.shape_cast %31 : vector<1x32x16xf32> to vector<32x16xf32>
    %cst_30 = arith.constant dense<0.000000e+00> : vector<2x16xf32>
    %33 = tpu.matmul %30, %32, %cst_30 {dimension_numbers = #tpu.dot_dimension_numbers<[1], [0], [0], [1], [0, 0, 1, 1], [], []>} : vector<2x32xf32>, vector<32x16xf32>, vector<2x16xf32> -> vector<2x16xf32>
    %c1_31 = arith.constant 1 : index
    %c0_32 = arith.constant 0 : index
    %c0_33 = arith.constant 0 : index
    %34 = vector.load %arg4[%c1_31, %c0_32, %c0_33] : memref<6x1x16xf32, #tpu.memory_space<vmem>>, vector<1x1x16xf32>
    %35 = vector.shape_cast %34 : vector<1x1x16xf32> to vector<1x16xf32>
    %36 = vector.broadcast %35 : vector<1x16xf32> to vector<2x16xf32>
    %37 = arith.mulf %33, %36 : vector<2x16xf32>
    %c1_34 = arith.constant 1 : index
    %c0_35 = arith.constant 0 : index
    %c0_36 = arith.constant 0 : index
    %38 = vector.load %arg5[%c1_34, %c0_35, %c0_36] : memref<6x1x16xf32, #tpu.memory_space<vmem>>, vector<1x1x16xf32>
    %39 = vector.shape_cast %38 : vector<1x1x16xf32> to vector<1x16xf32>
    %40 = vector.broadcast %39 : vector<1x16xf32> to vector<2x16xf32>
    %41 = arith.addf %37, %40 : vector<2x16xf32>
    %cst_37 = arith.constant 0.000000e+00 : f32
    %42 = vector.broadcast %cst_37 : f32 to vector<2x16xf32>
    %43 = arith.maximumf %41, %42 : vector<2x16xf32>
    %c1_38 = arith.constant 1 : index
    %c0_39 = arith.constant 0 : index
    %c0_40 = arith.constant 0 : index
    %44 = vector.load %arg6[%c1_38, %c0_39, %c0_40] : memref<6x16x128xf32, #tpu.memory_space<vmem>>, vector<1x16x128xf32>
    %45 = vector.shape_cast %44 : vector<1x16x128xf32> to vector<16x128xf32>
    %cst_41 = arith.constant dense<0.000000e+00> : vector<2x128xf32>
    %46 = tpu.matmul %43, %45, %cst_41 {dimension_numbers = #tpu.dot_dimension_numbers<[1], [0], [0], [1], [0, 0, 1, 1], [], []>} : vector<2x16xf32>, vector<16x128xf32>, vector<2x128xf32> -> vector<2x128xf32>
    %c1_42 = arith.constant 1 : index
    %c0_43 = arith.constant 0 : index
    %c0_44 = arith.constant 0 : index
    %47 = vector.load %arg7[%c1_42, %c0_43, %c0_44] : memref<6x1x128xf32, #tpu.memory_space<vmem>>, vector<1x1x128xf32>
    %48 = vector.shape_cast %47 : vector<1x1x128xf32> to vector<1x128xf32>
    %49 = vector.broadcast %48 : vector<1x128xf32> to vector<2x128xf32>
    %50 = arith.addf %46, %49 : vector<2x128xf32>
    %c1_45 = arith.constant 1 : index
    %c0_46 = arith.constant 0 : index
    %c0_47 = arith.constant 0 : index
    %51 = vector.load %arg8[%c1_45, %c0_46, %c0_47] : memref<6x2x128xf32, #tpu.memory_space<vmem>>, vector<1x2x128xf32>
    %52 = vector.shape_cast %51 : vector<1x2x128xf32> to vector<2x128xf32>
    %53 = vector.shape_cast %50 : vector<2x128xf32> to vector<1x2x128xf32>
    tpu.vector_store %arg8[%c1_45, %c0_46, %c0_47], %53 {strides = array<i32>} : memref<6x2x128xf32, #tpu.memory_space<vmem>>, vector<1x2x128xf32>,
    %c0_48 = arith.constant 0 : index
    %c0_49 = arith.constant 0 : index
    %c16 = arith.constant 16 : index
    %54 = vector.load %arg1[%c0_48, %c0_49, %c16] : memref<2x32x48xf32, #tpu.memory_space<vmem>>, vector<2x32x8xf32>
    %cst_50 = arith.constant dense<0.000000e+00> : vector<2x32xf32>
    %55 = vector.multi_reduction <add>, %54, %cst_50 [2] : vector<2x32x8xf32> to vector<2x32xf32>
    %cst_51 = arith.constant 1.250000e-01 : f32
    %56 = vector.broadcast %cst_51 : f32 to vector<2x32xf32>
    %57 = arith.mulf %55, %56 : vector<2x32xf32>
    %c2 = arith.constant 2 : index
    %c0_52 = arith.constant 0 : index
    %c0_53 = arith.constant 0 : index
    %58 = vector.load %arg3[%c2, %c0_52, %c0_53] : memref<6x32x16xf32, #tpu.memory_space<vmem>>, vector<1x32x16xf32>
    %59 = vector.shape_cast %58 : vector<1x32x16xf32> to vector<32x16xf32>
    %cst_54 = arith.constant dense<0.000000e+00> : vector<2x16xf32>
    %60 = tpu.matmul %57, %59, %cst_54 {dimension_numbers = #tpu.dot_dimension_numbers<[1], [0], [0], [1], [0, 0, 1, 1], [], []>} : vector<2x32xf32>, vector<32x16xf32>, vector<2x16xf32> -> vector<2x16xf32>
    %c2_55 = arith.constant 2 : index
    %c0_56 = arith.constant 0 : index
    %c0_57 = arith.constant 0 : index
    %61 = vector.load %arg4[%c2_55, %c0_56, %c0_57] : memref<6x1x16xf32, #tpu.memory_space<vmem>>, vector<1x1x16xf32>
    %62 = vector.shape_cast %61 : vector<1x1x16xf32> to vector<1x16xf32>
    %63 = vector.broadcast %62 : vector<1x16xf32> to vector<2x16xf32>
    %64 = arith.mulf %60, %63 : vector<2x16xf32>
    %c2_58 = arith.constant 2 : index
    %c0_59 = arith.constant 0 : index
    %c0_60 = arith.constant 0 : index
    %65 = vector.load %arg5[%c2_58, %c0_59, %c0_60] : memref<6x1x16xf32, #tpu.memory_space<vmem>>, vector<1x1x16xf32>
    %66 = vector.shape_cast %65 : vector<1x1x16xf32> to vector<1x16xf32>
    %67 = vector.broadcast %66 : vector<1x16xf32> to vector<2x16xf32>
    %68 = arith.addf %64, %67 : vector<2x16xf32>
    %cst_61 = arith.constant 0.000000e+00 : f32
    %69 = vector.broadcast %cst_61 : f32 to vector<2x16xf32>
    %70 = arith.maximumf %68, %69 : vector<2x16xf32>
    %c2_62 = arith.constant 2 : index
    %c0_63 = arith.constant 0 : index
    %c0_64 = arith.constant 0 : index
    %71 = vector.load %arg6[%c2_62, %c0_63, %c0_64] : memref<6x16x128xf32, #tpu.memory_space<vmem>>, vector<1x16x128xf32>
    %72 = vector.shape_cast %71 : vector<1x16x128xf32> to vector<16x128xf32>
    %cst_65 = arith.constant dense<0.000000e+00> : vector<2x128xf32>
    %73 = tpu.matmul %70, %72, %cst_65 {dimension_numbers = #tpu.dot_dimension_numbers<[1], [0], [0], [1], [0, 0, 1, 1], [], []>} : vector<2x16xf32>, vector<16x128xf32>, vector<2x128xf32> -> vector<2x128xf32>
    %c2_66 = arith.constant 2 : index
    %c0_67 = arith.constant 0 : index
    %c0_68 = arith.constant 0 : index
    %74 = vector.load %arg7[%c2_66, %c0_67, %c0_68] : memref<6x1x128xf32, #tpu.memory_space<vmem>>, vector<1x1x128xf32>
    %75 = vector.shape_cast %74 : vector<1x1x128xf32> to vector<1x128xf32>
    %76 = vector.broadcast %75 : vector<1x128xf32> to vector<2x128xf32>
    %77 = arith.addf %73, %76 : vector<2x128xf32>
    %c2_69 = arith.constant 2 : index
    %c0_70 = arith.constant 0 : index
    %c0_71 = arith.constant 0 : index
    %78 = vector.load %arg8[%c2_69, %c0_70, %c0_71] : memref<6x2x128xf32, #tpu.memory_space<vmem>>, vector<1x2x128xf32>
    %79 = vector.shape_cast %78 : vector<1x2x128xf32> to vector<2x128xf32>
    %80 = vector.shape_cast %77 : vector<2x128xf32> to vector<1x2x128xf32>
    tpu.vector_store %arg8[%c2_69, %c0_70, %c0_71], %80 {strides = array<i32>} : memref<6x2x128xf32, #tpu.memory_space<vmem>>, vector<1x2x128xf32>,
    %c0_72 = arith.constant 0 : index
    %c0_73 = arith.constant 0 : index
    %c24 = arith.constant 24 : index
    %81 = vector.load %arg1[%c0_72, %c0_73, %c24] : memref<2x32x48xf32, #tpu.memory_space<vmem>>, vector<2x32x8xf32>
    %cst_74 = arith.constant dense<0.000000e+00> : vector<2x32xf32>
    %82 = vector.multi_reduction <add>, %81, %cst_74 [2] : vector<2x32x8xf32> to vector<2x32xf32>
    %cst_75 = arith.constant 1.250000e-01 : f32
    %83 = vector.broadcast %cst_75 : f32 to vector<2x32xf32>
    %84 = arith.mulf %82, %83 : vector<2x32xf32>
    %c3 = arith.constant 3 : index
    %c0_76 = arith.constant 0 : index
    %c0_77 = arith.constant 0 : index
    %85 = vector.load %arg3[%c3, %c0_76, %c0_77] : memref<6x32x16xf32, #tpu.memory_space<vmem>>, vector<1x32x16xf32>
    %86 = vector.shape_cast %85 : vector<1x32x16xf32> to vector<32x16xf32>
    %cst_78 = arith.constant dense<0.000000e+00> : vector<2x16xf32>
    %87 = tpu.matmul %84, %86, %cst_78 {dimension_numbers = #tpu.dot_dimension_numbers<[1], [0], [0], [1], [0, 0, 1, 1], [], []>} : vector<2x32xf32>, vector<32x16xf32>, vector<2x16xf32> -> vector<2x16xf32>
    %c3_79 = arith.constant 3 : index
    %c0_80 = arith.constant 0 : index
    %c0_81 = arith.constant 0 : index
    %88 = vector.load %arg4[%c3_79, %c0_80, %c0_81] : memref<6x1x16xf32, #tpu.memory_space<vmem>>, vector<1x1x16xf32>
    %89 = vector.shape_cast %88 : vector<1x1x16xf32> to vector<1x16xf32>
    %90 = vector.broadcast %89 : vector<1x16xf32> to vector<2x16xf32>
    %91 = arith.mulf %87, %90 : vector<2x16xf32>
    %c3_82 = arith.constant 3 : index
    %c0_83 = arith.constant 0 : index
    %c0_84 = arith.constant 0 : index
    %92 = vector.load %arg5[%c3_82, %c0_83, %c0_84] : memref<6x1x16xf32, #tpu.memory_space<vmem>>, vector<1x1x16xf32>
    %93 = vector.shape_cast %92 : vector<1x1x16xf32> to vector<1x16xf32>
    %94 = vector.broadcast %93 : vector<1x16xf32> to vector<2x16xf32>
    %95 = arith.addf %91, %94 : vector<2x16xf32>
    %cst_85 = arith.constant 0.000000e+00 : f32
    %96 = vector.broadcast %cst_85 : f32 to vector<2x16xf32>
    %97 = arith.maximumf %95, %96 : vector<2x16xf32>
    %c3_86 = arith.constant 3 : index
    %c0_87 = arith.constant 0 : index
    %c0_88 = arith.constant 0 : index
    %98 = vector.load %arg6[%c3_86, %c0_87, %c0_88] : memref<6x16x128xf32, #tpu.memory_space<vmem>>, vector<1x16x128xf32>
    %99 = vector.shape_cast %98 : vector<1x16x128xf32> to vector<16x128xf32>
    %cst_89 = arith.constant dense<0.000000e+00> : vector<2x128xf32>
    %100 = tpu.matmul %97, %99, %cst_89 {dimension_numbers = #tpu.dot_dimension_numbers<[1], [0], [0], [1], [0, 0, 1, 1], [], []>} : vector<2x16xf32>, vector<16x128xf32>, vector<2x128xf32> -> vector<2x128xf32>
    %c3_90 = arith.constant 3 : index
    %c0_91 = arith.constant 0 : index
    %c0_92 = arith.constant 0 : index
    %101 = vector.load %arg7[%c3_90, %c0_91, %c0_92] : memref<6x1x128xf32, #tpu.memory_space<vmem>>, vector<1x1x128xf32>
    %102 = vector.shape_cast %101 : vector<1x1x128xf32> to vector<1x128xf32>
    %103 = vector.broadcast %102 : vector<1x128xf32> to vector<2x128xf32>
    %104 = arith.addf %100, %103 : vector<2x128xf32>
    %c3_93 = arith.constant 3 : index
    %c0_94 = arith.constant 0 : index
    %c0_95 = arith.constant 0 : index
    %105 = vector.load %arg8[%c3_93, %c0_94, %c0_95] : memref<6x2x128xf32, #tpu.memory_space<vmem>>, vector<1x2x128xf32>
    %106 = vector.shape_cast %105 : vector<1x2x128xf32> to vector<2x128xf32>
    %107 = vector.shape_cast %104 : vector<2x128xf32> to vector<1x2x128xf32>
    tpu.vector_store %arg8[%c3_93, %c0_94, %c0_95], %107 {strides = array<i32>} : memref<6x2x128xf32, #tpu.memory_space<vmem>>, vector<1x2x128xf32>,
    %c0_96 = arith.constant 0 : index
    %c0_97 = arith.constant 0 : index
    %c32 = arith.constant 32 : index
    %108 = vector.load %arg1[%c0_96, %c0_97, %c32] : memref<2x32x48xf32, #tpu.memory_space<vmem>>, vector<2x32x8xf32>
    %cst_98 = arith.constant dense<0.000000e+00> : vector<2x32xf32>
    %109 = vector.multi_reduction <add>, %108, %cst_98 [2] : vector<2x32x8xf32> to vector<2x32xf32>
    %cst_99 = arith.constant 1.250000e-01 : f32
    %110 = vector.broadcast %cst_99 : f32 to vector<2x32xf32>
    %111 = arith.mulf %109, %110 : vector<2x32xf32>
    %c4 = arith.constant 4 : index
    %c0_100 = arith.constant 0 : index
    %c0_101 = arith.constant 0 : index
    %112 = vector.load %arg3[%c4, %c0_100, %c0_101] : memref<6x32x16xf32, #tpu.memory_space<vmem>>, vector<1x32x16xf32>
    %113 = vector.shape_cast %112 : vector<1x32x16xf32> to vector<32x16xf32>
    %cst_102 = arith.constant dense<0.000000e+00> : vector<2x16xf32>
    %114 = tpu.matmul %111, %113, %cst_102 {dimension_numbers = #tpu.dot_dimension_numbers<[1], [0], [0], [1], [0, 0, 1, 1], [], []>} : vector<2x32xf32>, vector<32x16xf32>, vector<2x16xf32> -> vector<2x16xf32>
    %c4_103 = arith.constant 4 : index
    %c0_104 = arith.constant 0 : index
    %c0_105 = arith.constant 0 : index
    %115 = vector.load %arg4[%c4_103, %c0_104, %c0_105] : memref<6x1x16xf32, #tpu.memory_space<vmem>>, vector<1x1x16xf32>
    %116 = vector.shape_cast %115 : vector<1x1x16xf32> to vector<1x16xf32>
    %117 = vector.broadcast %116 : vector<1x16xf32> to vector<2x16xf32>
    %118 = arith.mulf %114, %117 : vector<2x16xf32>
    %c4_106 = arith.constant 4 : index
    %c0_107 = arith.constant 0 : index
    %c0_108 = arith.constant 0 : index
    %119 = vector.load %arg5[%c4_106, %c0_107, %c0_108] : memref<6x1x16xf32, #tpu.memory_space<vmem>>, vector<1x1x16xf32>
    %120 = vector.shape_cast %119 : vector<1x1x16xf32> to vector<1x16xf32>
    %121 = vector.broadcast %120 : vector<1x16xf32> to vector<2x16xf32>
    %122 = arith.addf %118, %121 : vector<2x16xf32>
    %cst_109 = arith.constant 0.000000e+00 : f32
    %123 = vector.broadcast %cst_109 : f32 to vector<2x16xf32>
    %124 = arith.maximumf %122, %123 : vector<2x16xf32>
    %c4_110 = arith.constant 4 : index
    %c0_111 = arith.constant 0 : index
    %c0_112 = arith.constant 0 : index
    %125 = vector.load %arg6[%c4_110, %c0_111, %c0_112] : memref<6x16x128xf32, #tpu.memory_space<vmem>>, vector<1x16x128xf32>
    %126 = vector.shape_cast %125 : vector<1x16x128xf32> to vector<16x128xf32>
    %cst_113 = arith.constant dense<0.000000e+00> : vector<2x128xf32>
    %127 = tpu.matmul %124, %126, %cst_113 {dimension_numbers = #tpu.dot_dimension_numbers<[1], [0], [0], [1], [0, 0, 1, 1], [], []>} : vector<2x16xf32>, vector<16x128xf32>, vector<2x128xf32> -> vector<2x128xf32>
    %c4_114 = arith.constant 4 : index
    %c0_115 = arith.constant 0 : index
    %c0_116 = arith.constant 0 : index
    %128 = vector.load %arg7[%c4_114, %c0_115, %c0_116] : memref<6x1x128xf32, #tpu.memory_space<vmem>>, vector<1x1x128xf32>
    %129 = vector.shape_cast %128 : vector<1x1x128xf32> to vector<1x128xf32>
    %130 = vector.broadcast %129 : vector<1x128xf32> to vector<2x128xf32>
    %131 = arith.addf %127, %130 : vector<2x128xf32>
    %c4_117 = arith.constant 4 : index
    %c0_118 = arith.constant 0 : index
    %c0_119 = arith.constant 0 : index
    %132 = vector.load %arg8[%c4_117, %c0_118, %c0_119] : memref<6x2x128xf32, #tpu.memory_space<vmem>>, vector<1x2x128xf32>
    %133 = vector.shape_cast %132 : vector<1x2x128xf32> to vector<2x128xf32>
    %134 = vector.shape_cast %131 : vector<2x128xf32> to vector<1x2x128xf32>
    tpu.vector_store %arg8[%c4_117, %c0_118, %c0_119], %134 {strides = array<i32>} : memref<6x2x128xf32, #tpu.memory_space<vmem>>, vector<1x2x128xf32>,
    %c0_120 = arith.constant 0 : index
    %c0_121 = arith.constant 0 : index
    %c40 = arith.constant 40 : index
    %135 = vector.load %arg1[%c0_120, %c0_121, %c40] : memref<2x32x48xf32, #tpu.memory_space<vmem>>, vector<2x32x8xf32>
    %cst_122 = arith.constant dense<0.000000e+00> : vector<2x32xf32>
    %136 = vector.multi_reduction <add>, %135, %cst_122 [2] : vector<2x32x8xf32> to vector<2x32xf32>
    %cst_123 = arith.constant 1.250000e-01 : f32
    %137 = vector.broadcast %cst_123 : f32 to vector<2x32xf32>
    %138 = arith.mulf %136, %137 : vector<2x32xf32>
    %c5 = arith.constant 5 : index
    %c0_124 = arith.constant 0 : index
    %c0_125 = arith.constant 0 : index
    %139 = vector.load %arg3[%c5, %c0_124, %c0_125] : memref<6x32x16xf32, #tpu.memory_space<vmem>>, vector<1x32x16xf32>
    %140 = vector.shape_cast %139 : vector<1x32x16xf32> to vector<32x16xf32>
    %cst_126 = arith.constant dense<0.000000e+00> : vector<2x16xf32>
    %141 = tpu.matmul %138, %140, %cst_126 {dimension_numbers = #tpu.dot_dimension_numbers<[1], [0], [0], [1], [0, 0, 1, 1], [], []>} : vector<2x32xf32>, vector<32x16xf32>, vector<2x16xf32> -> vector<2x16xf32>
    %c5_127 = arith.constant 5 : index
    %c0_128 = arith.constant 0 : index
    %c0_129 = arith.constant 0 : index
    %142 = vector.load %arg4[%c5_127, %c0_128, %c0_129] : memref<6x1x16xf32, #tpu.memory_space<vmem>>, vector<1x1x16xf32>
    %143 = vector.shape_cast %142 : vector<1x1x16xf32> to vector<1x16xf32>
    %144 = vector.broadcast %143 : vector<1x16xf32> to vector<2x16xf32>
    %145 = arith.mulf %141, %144 : vector<2x16xf32>
    %c5_130 = arith.constant 5 : index
    %c0_131 = arith.constant 0 : index
    %c0_132 = arith.constant 0 : index
    %146 = vector.load %arg5[%c5_130, %c0_131, %c0_132] : memref<6x1x16xf32, #tpu.memory_space<vmem>>, vector<1x1x16xf32>
    %147 = vector.shape_cast %146 : vector<1x1x16xf32> to vector<1x16xf32>
    %148 = vector.broadcast %147 : vector<1x16xf32> to vector<2x16xf32>
    %149 = arith.addf %145, %148 : vector<2x16xf32>
    %cst_133 = arith.constant 0.000000e+00 : f32
    %150 = vector.broadcast %cst_133 : f32 to vector<2x16xf32>
    %151 = arith.maximumf %149, %150 : vector<2x16xf32>
    %c5_134 = arith.constant 5 : index
    %c0_135 = arith.constant 0 : index
    %c0_136 = arith.constant 0 : index
    %152 = vector.load %arg6[%c5_134, %c0_135, %c0_136] : memref<6x16x128xf32, #tpu.memory_space<vmem>>, vector<1x16x128xf32>
    %153 = vector.shape_cast %152 : vector<1x16x128xf32> to vector<16x128xf32>
    %cst_137 = arith.constant dense<0.000000e+00> : vector<2x128xf32>
    %154 = tpu.matmul %151, %153, %cst_137 {dimension_numbers = #tpu.dot_dimension_numbers<[1], [0], [0], [1], [0, 0, 1, 1], [], []>} : vector<2x16xf32>, vector<16x128xf32>, vector<2x128xf32> -> vector<2x128xf32>
    %c5_138 = arith.constant 5 : index
    %c0_139 = arith.constant 0 : index
    %c0_140 = arith.constant 0 : index
    %155 = vector.load %arg7[%c5_138, %c0_139, %c0_140] : memref<6x1x128xf32, #tpu.memory_space<vmem>>, vector<1x1x128xf32>
    %156 = vector.shape_cast %155 : vector<1x1x128xf32> to vector<1x128xf32>
    %157 = vector.broadcast %156 : vector<1x128xf32> to vector<2x128xf32>
    %158 = arith.addf %154, %157 : vector<2x128xf32>
    %c5_141 = arith.constant 5 : index
    %c0_142 = arith.constant 0 : index
    %c0_143 = arith.constant 0 : index
    %159 = vector.load %arg8[%c5_141, %c0_142, %c0_143] : memref<6x2x128xf32, #tpu.memory_space<vmem>>, vector<1x2x128xf32>
    %160 = vector.shape_cast %159 : vector<1x2x128xf32> to vector<2x128xf32>
    %161 = vector.shape_cast %158 : vector<2x128xf32> to vector<1x2x128xf32>
    tpu.vector_store %arg8[%c5_141, %c0_142, %c0_143], %161 {strides = array<i32>} : memref<6x2x128xf32, #tpu.memory_space<vmem>>, vector<1x2x128xf32>,
    return
  }
  func.func @transform_0(%arg0: i32) -> (i32, i32, i32) {
    %c0_i32 = arith.constant 0 : i32
    %c0_i32_0 = arith.constant 0 : i32
    %c0_i32_1 = arith.constant 0 : i32
    return %arg0, %c0_i32, %c0_i32_0 : i32, i32, i32
  }
  func.func @transform_1(%arg0: i32) -> (i32, i32) {
    %c0_i32 = arith.constant 0 : i32
    %c0_i32_0 = arith.constant 0 : i32
    %c0_i32_1 = arith.constant 0 : i32
    return %c0_i32, %c0_i32_0 : i32, i32
  }
  func.func @transform_2(%arg0: i32) -> (i32, i32, i32) {
    %c0_i32 = arith.constant 0 : i32
    %c0_i32_0 = arith.constant 0 : i32
    %c0_i32_1 = arith.constant 0 : i32
    %c0_i32_2 = arith.constant 0 : i32
    return %c0_i32, %c0_i32_0, %c0_i32_1 : i32, i32, i32
  }
  func.func @transform_3(%arg0: i32) -> (i32, i32, i32) {
    %c0_i32 = arith.constant 0 : i32
    %c0_i32_0 = arith.constant 0 : i32
    %c0_i32_1 = arith.constant 0 : i32
    %c0_i32_2 = arith.constant 0 : i32
    return %c0_i32, %c0_i32_0, %c0_i32_1 : i32, i32, i32
  }
  func.func @transform_4(%arg0: i32) -> (i32, i32, i32) {
    %c0_i32 = arith.constant 0 : i32
    %c0_i32_0 = arith.constant 0 : i32
    %c0_i32_1 = arith.constant 0 : i32
    %c0_i32_2 = arith.constant 0 : i32
    return %c0_i32, %c0_i32_0, %c0_i32_1 : i32, i32, i32
  }
  func.func @transform_5(%arg0: i32) -> (i32, i32, i32) {
    %c0_i32 = arith.constant 0 : i32
    %c0_i32_0 = arith.constant 0 : i32
    %c0_i32_1 = arith.constant 0 : i32
    %c0_i32_2 = arith.constant 0 : i32
    return %c0_i32, %c0_i32_0, %c0_i32_1 : i32, i32, i32
  }
  func.func @transform_6(%arg0: i32) -> (i32, i32, i32) {
    %c0_i32 = arith.constant 0 : i32
    %c0_i32_0 = arith.constant 0 : i32
    %c0_i32_1 = arith.constant 0 : i32
    %c0_i32_2 = arith.constant 0 : i32
    return %c0_i32, %c0_i32_0, %c0_i32_1 : i32, i32, i32
  }
  func.func @transform_7(%arg0: i32) -> (i32, i32, i32) {
    %c0_i32 = arith.constant 0 : i32
    %c0_i32_0 = arith.constant 0 : i32
    %c0_i32_1 = arith.constant 0 : i32
    return %c0_i32, %arg0, %c0_i32_0 : i32, i32, i32
  }
}

</mosaic_0001>

<bundles_post_ra>
// kernel: tpu_custom_call.1
= control target key start
LH: loop header
LB: loop body
LE: loop exit
PB: predicated region body
PF: predicated region fallthrough
CT: control target
= control target key end

     0   :  { %vm37_vm0 = vcmask 392192   ;;  %s3459_s0 = inlined_call_operand.vmem [shape: f32[2,32,48], index: 0, kind: input, shape index: {}]   ;;  %s3460_s1 = inlined_call_operand.vmem [shape: f32[48,6], index: 1, kind: input, shape index: {}]   ;;  %s3461_s2 = inlined_call_operand.vmem [shape: f32[6,32,16], index: 2, kind: input, shape index: {}]   ;;  %s3462_s3 = inlined_call_operand.vmem [shape: f32[6,1,16], index: 3, kind: input, shape index: {}]   ;;  %s3463_s4 = inlined_call_operand.vmem [shape: f32[6,1,16], index: 4, kind: input, shape index: {}]   ;;  %s3464_s5 = inlined_call_operand.vmem [shape: f32[6,16,128], index: 5, kind: input, shape index: {}]   ;;  %s3465_s6 = inlined_call_operand.vmem [shape: f32[6,1,128], index: 6, kind: input, shape index: {}]   ;;  %s3466_s7 = inlined_call_operand.hbm [shape: f32[6,2,128], index: 7, kind: output, shape index: {}]  }
   0x1   :  { %v31_v0 = vld [vmem:[%s3460_s1] sm:$0xff]  ;;  %v32_v1 = vld [vmem:[%s3460_s1 + $0x8] sm:$0xff]  ;;  %v33_v2 = vld [vmem:[%s3460_s1 + $0x10] sm:$0xff] }
   0x2   :  { %v2976_v3 = vpack.c.bf16 %v32_v1, %v31_v0  ;;  %v34_v4 = vld [vmem:[%s3460_s1 + $0x18] sm:$0xff]  ;;  %v35_v6 = vld [vmem:[%s3460_s1 + $0x20] sm:$0xff]  ;;  %v36_v7 = vld [vmem:[%s3460_s1 + $0x28] sm:$0xff] }
   0x3   :  { %v2981_v5 = vpack.c.bf16 %v34_v4, %v33_v2  ;;  %v27_v8 = vld [vmem:[%s3459_s0] sm:$0xff] }
   0x4   :  { %2760 = vmatprep.subr.bf16.mxu0 %v2976_v3  ;;  %2519 = vmatprep.mubr.msk.f32.mxu0 %vm37_vm0, %v27_v8 }
   0x5   :  { %12 = vsyncpa [#allocation3], 0  ;;  %2762 = vmatpush3.bf16.msra.mxu0 %v2976_v3  ;;  %v2996_v9 = vpack.c.bf16 %v36_v7, %v35_v6  ;;  %v28_v10 = vld [vmem:[%s3459_s0 + $0x8] sm:$0xff]  ;;  %v29_v11 = vld [vmem:[%s3459_s0 + $0x10] sm:$0xff]  ;;  %v2921_v16 = vmov 0.0|0.0   ;;  %vm2922_vm1 = vmmov 0  }
   0x6   :  { %2764 = vmatprep.subr.bf16.mxu0 %v2981_v5  ;;  %v30_v12 = vld [vmem:[%s3459_s0 + $0x18] sm:$0xff]  ;;  %v168_v13 = vld [vmem:[%s3461_s2] sm:$0xff]  ;;  %v169_v14 = vld [vmem:[%s3461_s2 + $0x8] sm:$0xff]  ;;  %2771 = vmatprep.subr.bf16.mxu1 %v2921_v16  ;;  %v2923_v29 = vmov 0.0   ;;  %vm172_vm2 = vcmask 261120   ;;  %vm254_vm3 = vcmask 130048  }
   0x7   :  { %v2271_v15 = vld [vmem:[%s3461_s2 + $0x20] sm:$0xff]  ;;  %v3023_v17 = vpack.c.bf16 %v169_v14, %v168_v13  ;;  %v2272_v18 = vld [vmem:[%s3461_s2 + $0x28] sm:$0xff]  ;;  %v170_v19 = vld [vmem:[%s3461_s2 + $0x10] sm:$0xff]  ;;  %2533 = vmatprep.mubr.msk.f32.mxu1 %vm2922_vm1, %v2923_v29 }
   0x8   :  { %v171_v20 = vld [vmem:[%s3461_s2 + $0x18] sm:$0xff]  ;;  %v3035_v21 = vpack.c.bf16 %v2272_v18, %v2271_v15  ;;  %v2273_v25 = vld [vmem:[%s3461_s2 + $0x30] sm:$0xff]  ;;  %v251_v34 = vld [vmem:[%s3464_s5] sm:$0xff] }
   0x9   :  { %2766 = vmatpush3.bf16.msra.mxu0 %v2981_v5  ;;  %2773 = vmatpush3.bf16.msra.mxu1 %v3023_v17  ;;  %v3038_v22 = vpack.c.bf16 %v171_v20, %v170_v19  ;;  %v2274_v26 = vld [vmem:[%s3461_s2 + $0x38] sm:$0xff]  ;;  %v252_v35 = vld [vmem:[%s3464_s5 + $0x8] sm:$0xff]  ;;  %v246_v37 = vld [vmem:[%s3462_s3] sm:$0x1] }
   0xa   :  { %2768 = vmatprep.subr.bf16.mxu0 %v2996_v9  ;;  %2774 = vmatprep.subr.bf16.mxu1 %v2921_v16  ;;  %v3051_v27 = vpack.c.bf16 %v2274_v26, %v2273_v25  ;;  %v3075_v36 = vpack.c.bf16 %v252_v35, %v251_v34  ;;  %v248_v39 = vld [vmem:[%s3463_s4] sm:$0x1]  ;;  %v2276_v40 = vld [vmem:[%s3462_s3 + $0x1] sm:$0x1]  ;;  %v2278_v43 = vld [vmem:[%s3464_s5 + $0x10] sm:$0xff] }
   0xb   :  { %v2279_v44 = vld [vmem:[%s3464_s5 + $0x18] sm:$0xff]  ;;  %v2277_v46 = vld [vmem:[%s3463_s4 + $0x1] sm:$0x1]  ;;  %v2283_v54 = vld [vmem:[%s3461_s2 + $0x48] sm:$0xff] }
   0xc   :  { %v3097_v50 = vpack.c.bf16 %v2279_v44, %v2278_v43  ;;  %v2282_v53 = vld [vmem:[%s3461_s2 + $0x40] sm:$0xff]  ;;  %v2284_v57 = vld [vmem:[%s3461_s2 + $0x50] sm:$0xff]  ;;  %v2285_v58 = vld [vmem:[%s3461_s2 + $0x58] sm:$0xff] }
   0xd   :  { %2770 = vmatpush3.bf16.msra.mxu0 %v2996_v9  ;;  %2776 = vmatpush3.bf16.msra.mxu1 %v3038_v22  ;;  %v3109_v55 = vpack.c.bf16 %v2283_v54, %v2282_v53  ;;  %v3120_v59 = vpack.c.bf16 %v2285_v58, %v2284_v57  ;;  %v2289_v61 = vld [vmem:[%s3464_s5 + $0x20] sm:$0xff]  ;;  %v2290_v62 = vld [vmem:[%s3464_s5 + $0x28] sm:$0xff]  ;;  %v2295_v25 = vld [vmem:[%s3461_s2 + $0x70] sm:$0xff] }
   0xe   :  { %2780 = vmatprep.subr.bf16.mxu0 %v2921_v16  ;;  %2777 = vmatprep.subr.bf16.mxu1 %v2921_v16  ;;  %v3137_v63 = vpack.c.bf16 %v2290_v62, %v2289_v61  ;;  %v253_v0 = vld [vmem:[%s3465_s6] sm:$0x1]  ;;  %v2280_v6 = vld [vmem:[%s3465_s6 + $0x1] sm:$0x1]  ;;  %v2288_v13 = vld [vmem:[%s3463_s4 + $0x2] sm:$0x1] }
   0xf   :  { %v2293_v18 = vld [vmem:[%s3461_s2 + $0x60] sm:$0xff]  ;;  %v2294_v19 = vld [vmem:[%s3461_s2 + $0x68] sm:$0xff]  ;;  %v2296_v26 = vld [vmem:[%s3461_s2 + $0x78] sm:$0xff] }
  0x10   :  { %2520 = vmatmul.mubr.msk.f32.vlgmr.msra.gmra.mrb[0].mxu0 %vm37_vm0, %v28_v10  ;;  %v2291_v35 = vld [vmem:[%s3465_s6 + $0x2] sm:$0x1]  ;;  %v2312_v57 = vld [vmem:[%s3464_s5 + $0x48] sm:$0xff] }
  0x11   :  { %2522 = vmatprep.mubr.msk.f32.mxu0 %vm37_vm0, %v29_v11  ;;  %2782 = vmatpush3.bf16.msra.mxu0 %v3035_v21  ;;  %v2287_v11 = vld [vmem:[%s3462_s3 + $0x2] sm:$0x1] }
  0x12   :  { %2783 = vmatprep.subr.bf16.mxu0 %v2921_v16 }
  0x14   :  { %2523 = vmatmul.mubr.msk.f32.gmra.mrb[2].mxu0 %vm37_vm0, %v30_v12 }
  0x15   :  { %2785 = vmatpush3.bf16.msra.mxu0 %v3051_v27  ;;  %2551 = vmatprep.mubr.msk.f32.mxu0 %vm2922_vm1, %v2923_v29 }
  0x16   :  { %2795 = vmatprep.subr.bf16.mxu0 %v2921_v16 }
  0xe3   :  { %v2521_v23 = vpop.f32.mrb[0].mxu0 }
  0xe4   :  { %v116_v24 = vpop.f32.mrb[1].mxu0 }
  0xe5   :  { %135 = vxpose.xlu0.b32.start [1/4] (short) (narrow) %v116_v24, 8 }
  0xe7   :  { %v2524_v28 = vpop.f32.mrb[2].mxu0 }
  0xe8   :  { %v126_v30 = vpop.f32.mrb[3].mxu0 }
  0xe9   :  { %136 = vxpose.xlu0.b32.cont [2/4] (short) (narrow) %v2521_v23, 8  ;;  %v3159_v23 = vpack.c.bf16 %v2294_v19, %v2293_v18 }
  0xed   :  { %137 = vxpose.xlu0.b32.cont [3/4] (short) (narrow) %v126_v30, 8 }
  0xf1   :  { %138 = vxpose.xlu0.b32.end [4/4] (short) (narrow) %v2524_v28, 8  ;;  %v3169_v28 = vpack.c.bf16 %v2296_v26, %v2295_v25 }
 0x165   :  { %v151_v31 = vpop.trf.xlu0 }
 0x166   :  { %v3059_v32 = vmul.f32 0.125, %v151_v31  ;;  %v2300_v31 = vld [vmem:[%s3464_s5 + $0x30] sm:$0xff] }
 0x168   :  { %2534 = vmatmul.mubr.msk.f32.vlgmr.msra.gmra.mrb[0].mxu1 %vm172_vm2, %v3059_v32  ;;  %v334_v33 = vrot.slane %v3059_v32, 1  ;;  %v499_v60 = vrot.slane %v3059_v32, 2  ;;  %v664_v30 = vrot.slane %v3059_v32, 3  ;;  %v829_v54 = vrot.slane %v3059_v32, 4 }
 0x169   :  { %2540 = vmatprep.mubr.msk.f32.mxu1 %vm2922_vm1, %v2923_v29  ;;  %2779 = vmatpush3.bf16.msra.mxu1 %v3075_v36  ;;  %v994_v19 = vrot.slane %v3059_v32, 5  ;;  %v2323_v32 = vld [vmem:[%s3464_s5 + $0x58] sm:$0xff] }
 0x16a   :  { %2552 = vmatmul.mubr.msk.f32.vlgmr.msra.gmra.mrb[4].mxu0 %vm172_vm2, %v334_v33  ;;  %2786 = vmatprep.subr.bf16.mxu1 %v2921_v16  ;;  %v2301_v33 = vld [vmem:[%s3464_s5 + $0x38] sm:$0xff] }
 0x16b   :  { %2576 = vmatprep.mubr.msk.f32.mxu0 %vm2922_vm1, %v2923_v29  ;;  %2797 = vmatpush3.bf16.msra.mxu0 %v3137_v63  ;;  %v3186_v34 = vpack.c.bf16 %v2301_v33, %v2300_v31  ;;  %v2321_v33 = vld [vmem:[%s3463_s4 + $0x5] sm:$0x1] }
 0x16c   :  { %2798 = vmatprep.subr.bf16.mxu0 %v2921_v16 }
 0x23b   :  { %v242_v38 = vpop.f32.mrb[0].mxu1 }
 0x23c   :  { %v247_v41 = vmul.f32 %v246_v37, %v242_v38  ;;  %v2535_v42 = vpop.f32.mrb[1].mxu1 }
 0x23d   :  { %v403_v45 = vpop.f32.mrb[4].mxu0  ;;  %v2299_v42 = vld [vmem:[%s3463_s4 + $0x3] sm:$0x1] }
 0x23e   :  { %v249_v47 = vadd.f32 %v248_v39, %v247_v41  ;;  %v409_v48 = vmul.f32 %v2276_v40, %v403_v45  ;;  %v2553_v49 = vpop.f32.mrb[5].mxu0  ;;  %v2298_v40 = vld [vmem:[%s3462_s3 + $0x3] sm:$0x1] }
 0x23f   :  { %v2304_v45 = vld [vmem:[%s3461_s2 + $0x80] sm:$0xff] }
 0x240   :  { %v250_v51 = vmax.f32 %v249_v47, 0.0  ;;  %v412_v52 = vadd.f32 %v2277_v46, %v409_v48  ;;  %v2305_v46 = vld [vmem:[%s3461_s2 + $0x88] sm:$0xff] }
 0x241   :  { %v3205_v48 = vpack.c.bf16 %v2305_v46, %v2304_v45 }
 0x242   :  { %2541 = vmatmul.mubr.msk.f32.vlgmr.msra.gmra.mrb[2].mxu1 %vm254_vm3, %v250_v51  ;;  %v413_v56 = vmax.f32 %v412_v52, 0.0  ;;  %v2306_v51 = vld [vmem:[%s3461_s2 + $0x90] sm:$0xff]  ;;  %v2307_v52 = vld [vmem:[%s3461_s2 + $0x98] sm:$0xff] }
 0x243   :  { %2788 = vmatpush3.bf16.msra.mxu1 %v3097_v50  ;;  %2558 = vmatprep.mubr.msk.f32.mxu1 %vm2922_vm1, %v2923_v29  ;;  %v3215_v53 = vpack.c.bf16 %v2307_v52, %v2306_v51  ;;  %v1372_v52 = vld [vmem:[%s3462_s3] sm:$0x1] }
 0x244   :  { %2789 = vmatprep.subr.bf16.mxu1 %v2921_v16 }
 0x246   :  { %2559 = vmatmul.mubr.msk.f32.vlgmr.msra.gmra.mrb[4].mxu1 %vm254_vm3, %v413_v56  ;;  %v2311_v56 = vld [vmem:[%s3464_s5 + $0x40] sm:$0xff] }
 0x247   :  { %2791 = vmatpush3.bf16.msra.mxu1 %v3109_v55  ;;  %2569 = vmatprep.mubr.msk.f32.mxu1 %vm2922_vm1, %v2923_v29  ;;  %v3232_v58 = vpack.c.bf16 %v2312_v57, %v2311_v56  ;;  %v2341_v56 = vld [vmem:[%s3462_s3 + $0x1] sm:$0x1] }
 0x248   :  { %2792 = vmatprep.subr.bf16.mxu1 %v2921_v16 }
 0x24b   :  { %2794 = vmatpush3.bf16.msra.mxu1 %v3120_v59 }
 0x24c   :  { %2804 = vmatprep.subr.bf16.mxu1 %v2921_v16 }
 0x24e   :  { %2570 = vmatmul.mubr.msk.f32.vlgmr.msra.gmra.mrb[6].mxu1 %vm172_vm2, %v499_v60  ;;  %v2302_v60 = vld [vmem:[%s3465_s6 + $0x3] sm:$0x1] }
 0x24f   :  { %2594 = vmatprep.mubr.msk.f32.mxu1 %vm2922_vm1, %v2923_v29  ;;  %2806 = vmatpush3.bf16.msra.mxu1 %v3186_v34 }
 0x250   :  { %2807 = vmatprep.subr.bf16.mxu1 %v2921_v16 }
 0x315   :  { %v324_v1 = vpop.f32.mrb[2].mxu1 }
 0x316   :  { %v325_v2 = vadd.f32 %v324_v1, %v253_v0  ;;  %v2542_v4 = vpop.f32.mrb[3].mxu1  ;;  %v2309_v1 = vld [vmem:[%s3462_s3 + $0x4] sm:$0x1] }
 0x317   :  { %v2310_v4 = vld [vmem:[%s3463_s4 + $0x4] sm:$0x1] }
 0x318   :  { %328 = vst [vmem:[#allocation2] sm:$0x1] %v325_v2 }
 0x319   :  { %v488_v7 = vpop.f32.mrb[4].mxu1 }
 0x31a   :  { %v489_v8 = vadd.f32 %v2280_v6, %v488_v7  ;;  %v2560_v10 = vpop.f32.mrb[5].mxu1 }
 0x31b   :  { %v2316_v10 = vld [vmem:[%s3461_s2 + $0xa8] sm:$0xff] }
 0x31c   :  { %493 = vst [vmem:[#allocation2 + $0x2] sm:$0x1] %v489_v8  ;;  %v2315_v8 = vld [vmem:[%s3461_s2 + $0xa0] sm:$0xff] }
 0x321   :  { %v568_v12 = vpop.f32.mrb[6].mxu1 }
 0x322   :  { %v574_v14 = vmul.f32 %v2287_v11, %v568_v12  ;;  %v2571_v15 = vpop.f32.mrb[7].mxu1  ;;  %v3251_v12 = vpack.c.bf16 %v2316_v10, %v2315_v8  ;;  %v2345_v10 = vld [vmem:[%s3465_s6 + $0x1] sm:$0x1] }
 0x323   :  { %v2318_v15 = vld [vmem:[%s3461_s2 + $0xb8] sm:$0xff] }
 0x324   :  { %v577_v20 = vadd.f32 %v2288_v13, %v574_v14  ;;  %v2317_v14 = vld [vmem:[%s3461_s2 + $0xb0] sm:$0xff]  ;;  %s2924_s2 = smov [#allocation2]  }
 0x325   :  { %v3261_v18 = vpack.c.bf16 %v2318_v15, %v2317_v14  ;;  %v2352_v14 = vld [vmem:[%s3462_s3 + $0x2] sm:$0x1]  ;;  %s2254_s20 = sshll.u32 %s2924_s2, 4  ;;  %s2255_s20 = int_to_ptr.vmem [resolvable:$true] %s2254_s20 }
 0x326   :  { %v578_v24 = vmax.f32 %v577_v20, 0.0  ;;  %v2322_v20 = vld [vmem:[%s3464_s5 + $0x50] sm:$0xff]  ;;  %p2902_p1 = scmp.lt.s32.totalorder %s2255_s20, %s2255_s20 }
 0x328   :  { %2577 = vmatmul.mubr.msk.f32.vlgmr.msra.gmra.mrb[6].mxu0 %vm254_vm3, %v578_v24  ;;  %v3282_v24 = vpack.c.bf16 %v2323_v32, %v2322_v20 }
 0x329   :  { %2800 = vmatpush3.bf16.msra.mxu0 %v3159_v23  ;;  %2587 = vmatprep.mubr.msk.f32.mxu0 %vm2922_vm1, %v2923_v29 }
 0x32a   :  { %2801 = vmatprep.subr.bf16.mxu0 %v2921_v16 }
 0x32d   :  { %2803 = vmatpush3.bf16.msra.mxu0 %v3169_v28 }
 0x32e   :  { %2813 = vmatprep.subr.bf16.mxu0 %v2921_v16 }
 0x330   :  { %2588 = vmatmul.mubr.msk.f32.vlgmr.msra.gmra.mrb[8].mxu0 %vm172_vm2, %v664_v30  ;;  %v2320_v30 = vld [vmem:[%s3462_s3 + $0x5] sm:$0x1] }
 0x331   :  { %2612 = vmatprep.mubr.msk.f32.mxu0 %vm2922_vm1, %v2923_v29  ;;  %2815 = vmatpush3.bf16.msra.mxu0 %v3232_v58 }
 0x332   :  { %2816 = vmatprep.subr.bf16.mxu0 %v2921_v16 }
 0x3fb   :  { %v653_v37 = vpop.f32.mrb[6].mxu0 }
 0x3fc   :  { %v654_v38 = vadd.f32 %v2291_v35, %v653_v37  ;;  %v2578_v39 = vpop.f32.mrb[7].mxu0 }
 0x3fe   :  { %658 = vst [vmem:[#allocation2 + $0x4] sm:$0x1] %v654_v38 }
 0x403   :  { %v733_v41 = vpop.f32.mrb[8].mxu0 }
 0x404   :  { %v739_v43 = vmul.f32 %v2298_v40, %v733_v41  ;;  %v2589_v44 = vpop.f32.mrb[9].mxu0  ;;  %v2326_v40 = vld [vmem:[%s3459_s0 + $0x20] sm:$0xff]  ;;  %v2327_v41 = vld [vmem:[%s3459_s0 + $0x28] sm:$0xff] }
 0x406   :  { %v742_v47 = vadd.f32 %v2299_v42, %v739_v43  ;;  %v2328_v42 = vld [vmem:[%s3459_s0 + $0x30] sm:$0xff] }
 0x408   :  { %v743_v49 = vmax.f32 %v742_v47, 0.0 }
 0x40a   :  { %2595 = vmatmul.mubr.msk.f32.vlgmr.msra.gmra.mrb[8].mxu1 %vm254_vm3, %v743_v49 }
 0x40b   :  { %2809 = vmatpush3.bf16.msra.mxu1 %v3205_v48  ;;  %2605 = vmatprep.mubr.msk.f32.mxu1 %vm2922_vm1, %v2923_v29 }
 0x40c   :  { %2810 = vmatprep.subr.bf16.mxu1 %v2921_v16 }
 0x40f   :  { %2812 = vmatpush3.bf16.msra.mxu1 %v3215_v53 }
 0x410   :  { %2822 = vmatprep.subr.bf16.mxu1 %v2921_v16 }
 0x412   :  { %2606 = vmatmul.mubr.msk.f32.vlgmr.msra.gmra.mrb[10].mxu1 %vm172_vm2, %v829_v54 }
 0x413   :  { %2630 = vmatprep.mubr.msk.f32.mxu1 %vm2922_vm1, %v2923_v29  ;;  %2824 = vmatpush3.bf16.msra.mxu1 %v3282_v24 }
 0x414   :  { %2826 = vmatprep.subr.bf16.mxu1 %v2976_v3 }
 0x4dd   :  { %v818_v61 = vpop.f32.mrb[8].mxu1 }
 0x4de   :  { %v819_v62 = vadd.f32 %v2302_v60, %v818_v61  ;;  %v2596_v0 = vpop.f32.mrb[9].mxu1  ;;  %v2342_v61 = vld [vmem:[%s3463_s4 + $0x1] sm:$0x1] }
 0x4e0   :  { %823 = vst [vmem:[#allocation2 + $0x6] sm:$0x1] %v819_v62 }
 0x4e5   :  { %v898_v2 = vpop.f32.mrb[10].mxu1 }
 0x4e6   :  { %v904_v6 = vmul.f32 %v2309_v1, %v898_v2  ;;  %v2607_v7 = vpop.f32.mrb[11].mxu1 }
 0x4e8   :  { %v907_v11 = vadd.f32 %v2310_v4, %v904_v6 }
 0x4ea   :  { %v908_v13 = vmax.f32 %v907_v11, 0.0 }
 0x4ec   :  { %2613 = vmatmul.mubr.msk.f32.vlgmr.msra.gmra.mrb[10].mxu0 %vm254_vm3, %v908_v13 }
 0x4ed   :  { %2818 = vmatpush3.bf16.msra.mxu0 %v3251_v12  ;;  %2623 = vmatprep.mubr.msk.f32.mxu0 %vm2922_vm1, %v2923_v29 }
 0x4ee   :  { %2819 = vmatprep.subr.bf16.mxu0 %v2921_v16 }
 0x4f1   :  { %2821 = vmatpush3.bf16.msra.mxu0 %v3261_v18 }
 0x4f2   :  { %2837 = vmatprep.subr.bf16.mxu0 %v2921_v16 }
 0x4f4   :  { %2624 = vmatmul.mubr.msk.f32.vlgmr.msra.gmra.mrb[12].mxu0 %vm172_vm2, %v994_v19  ;;  %v2353_v19 = vld [vmem:[%s3463_s4 + $0x2] sm:$0x1] }
 0x4f5   :  { %2839 = vmatpush3.bf16.msra.mxu0 %v3023_v17  ;;  %2659 = vmatprep.mubr.msk.f32.mxu0 %vm2922_vm1, %v2923_v29  ;;  %v2313_v17 = vld [vmem:[%s3465_s6 + $0x4] sm:$0x1] }
 0x4f6   :  { %2840 = vmatprep.subr.bf16.mxu0 %v2921_v16 }
 0x4f9   :  { %2842 = vmatpush3.bf16.msra.mxu0 %v3038_v22 }
 0x4fa   :  { %2843 = vmatprep.subr.bf16.mxu0 %v2921_v16 }
 0x5bf   :  { %v983_v22 = vpop.f32.mrb[10].mxu0 }
 0x5c0   :  { %v984_v25 = vadd.f32 %v2313_v17, %v983_v22  ;;  %v2614_v26 = vpop.f32.mrb[11].mxu0 }
 0x5c2   :  { %988 = vst [vmem:[#allocation2 + $0x8] sm:$0x1] %v984_v25 }
 0x5c7   :  { %v1063_v31 = vpop.f32.mrb[12].mxu0 }
 0x5c8   :  { %v1069_v35 = vmul.f32 %v2320_v30, %v1063_v31  ;;  %v2625_v37 = vpop.f32.mrb[13].mxu0  ;;  %v2363_v31 = vld [vmem:[%s3462_s3 + $0x3] sm:$0x1] }
 0x5ca   :  { %v1072_v38 = vadd.f32 %v2321_v33, %v1069_v35 }
 0x5cc   :  { %v1073_v39 = vmax.f32 %v1072_v38, 0.0 }
 0x5ce   :  { %2631 = vmatmul.mubr.msk.f32.vlgmr.msra.gmra.mrb[12].mxu1 %vm254_vm3, %v1073_v39 }
 0x5cf   :  { %2828 = vmatpush3.bf16.msra.mxu1 %v2976_v3  ;;  %2645 = vmatprep.mubr.msk.f32.mxu1 %vm37_vm0, %v2326_v40  ;;  %v2329_v3 = vld [vmem:[%s3459_s0 + $0x38] sm:$0xff] }
 0x5d0   :  { %2830 = vmatprep.subr.bf16.mxu1 %v2981_v5 }
 0x5d3   :  { %2832 = vmatpush3.bf16.msra.mxu1 %v2981_v5  ;;  %v2324_v5 = vld [vmem:[%s3465_s6 + $0x5] sm:$0x1] }
 0x5d4   :  { %2834 = vmatprep.subr.bf16.mxu1 %v2996_v9 }
 0x5d7   :  { %2836 = vmatpush3.bf16.msra.mxu1 %v2996_v9 }
 0x5d8   :  { %2846 = vmatprep.subr.bf16.mxu1 %v2921_v16 }
 0x5da   :  { %2646 = vmatmul.mubr.msk.f32.vlgmr.msra.gmra.mrb[14].mxu1 %vm37_vm0, %v2327_v41 }
 0x5db   :  { %2648 = vmatprep.mubr.msk.f32.mxu1 %vm37_vm0, %v2328_v42  ;;  %2848 = vmatpush3.bf16.msra.mxu1 %v3035_v21 }
 0x5dc   :  { %2849 = vmatprep.subr.bf16.mxu1 %v2921_v16 }
 0x5de   :  { %2649 = vmatmul.mubr.msk.f32.gmra.mrb[16].mxu1 %vm37_vm0, %v2329_v3 }
 0x5df   :  { %2851 = vmatpush3.bf16.msra.mxu1 %v3051_v27  ;;  %2677 = vmatprep.mubr.msk.f32.mxu1 %vm2922_vm1, %v2923_v29 }
 0x5e0   :  { %2861 = vmatprep.subr.bf16.mxu1 %v2921_v16 }
 0x6a1   :  { %v1148_v9 = vpop.f32.mrb[12].mxu1 }
 0x6a2   :  { %v1149_v43 = vadd.f32 %v2324_v5, %v1148_v9  ;;  %v2632_v44 = vpop.f32.mrb[13].mxu1 }
 0x6a4   :  { %1153 = vst [vmem:[#allocation2 + $0xa] sm:$0x1] %v1149_v43 }
 0x6ad   :  { %v2647_v21 = vpop.f32.mrb[14].mxu1 }
 0x6ae   :  { %v1243_v45 = vpop.f32.mrb[15].mxu1 }
 0x6af   :  { %1262 = vxpose.xlu1.b32.start [1/4] (short) (narrow) %v1243_v45, 8 }
 0x6b1   :  { %v2650_v46 = vpop.f32.mrb[16].mxu1 }
 0x6b2   :  { %v1253_v47 = vpop.f32.mrb[17].mxu1 }
 0x6b3   :  { %1263 = vxpose.xlu1.b32.cont [2/4] (short) (narrow) %v2647_v21, 8 }
 0x6b7   :  { %1264 = vxpose.xlu1.b32.cont [3/4] (short) (narrow) %v1253_v47, 8 }
 0x6bb   :  { %1265 = vxpose.xlu1.b32.end [4/4] (short) (narrow) %v2650_v46, 8  ;;  %v2378_v46 = vld [vmem:[%s3465_s6 + $0x4] sm:$0x1] }
 0x72f   :  { %v1278_v27 = vpop.trf.xlu1 }
 0x730   :  { %v3327_v49 = vmul.f32 0.125, %v1278_v27 }
 0x732   :  { %2660 = vmatmul.mubr.msk.f32.vlgmr.msra.gmra.mrb[14].mxu0 %vm172_vm2, %v3327_v49  ;;  %v1458_v51 = vrot.slane %v3327_v49, 1  ;;  %v1617_v7 = vrot.slane %v3327_v49, 2  ;;  %v1776_v25 = vrot.slane %v3327_v49, 3  ;;  %v1935_v40 = vrot.slane %v3327_v49, 4 }
 0x733   :  { %2845 = vmatpush3.bf16.msra.mxu0 %v3075_v36  ;;  %2666 = vmatprep.mubr.msk.f32.mxu0 %vm2922_vm1, %v2923_v29  ;;  %v1374_v36 = vld [vmem:[%s3463_s4] sm:$0x1]  ;;  %v2094_v45 = vrot.slane %v3327_v49, 5 }
 0x734   :  { %2678 = vmatmul.mubr.msk.f32.vlgmr.msra.gmra.mrb[18].mxu1 %vm172_vm2, %v1458_v51  ;;  %2852 = vmatprep.subr.bf16.mxu0 %v2921_v16 }
 0x735   :  { %2863 = vmatpush3.bf16.msra.mxu1 %v3137_v63  ;;  %2702 = vmatprep.mubr.msk.f32.mxu1 %vm2922_vm1, %v2923_v29 }
 0x736   :  { %2864 = vmatprep.subr.bf16.mxu1 %v2921_v16 }
 0x805   :  { %v1368_v54 = vpop.f32.mrb[14].mxu0 }
 0x806   :  { %v1373_v57 = vmul.f32 %v1372_v52, %v1368_v54  ;;  %v2661_v63 = vpop.f32.mrb[15].mxu0 }
 0x807   :  { %v1527_v60 = vpop.f32.mrb[18].mxu1 }
 0x808   :  { %v1375_v62 = vadd.f32 %v1374_v36, %v1373_v57  ;;  %v1532_v0 = vmul.f32 %v2341_v56, %v1527_v60  ;;  %v2679_v1 = vpop.f32.mrb[19].mxu1  ;;  %v2389_v36 = vld [vmem:[%s3465_s6 + $0x5] sm:$0x1] }
 0x80a   :  { %v1376_v2 = vmax.f32 %v1375_v62, 0.0  ;;  %v1534_v4 = vadd.f32 %v2342_v61, %v1532_v0 }
 0x80c   :  { %2667 = vmatmul.mubr.msk.f32.vlgmr.msra.gmra.mrb[16].mxu0 %vm254_vm3, %v1376_v2  ;;  %v1535_v6 = vmax.f32 %v1534_v4, 0.0 }
 0x80d   :  { %2854 = vmatpush3.bf16.msra.mxu0 %v3097_v50  ;;  %2684 = vmatprep.mubr.msk.f32.mxu0 %vm2922_vm1, %v2923_v29  ;;  %v1379_v50 = vld [vmem:[%s3465_s6] sm:$0x1] }
 0x80e   :  { %2855 = vmatprep.subr.bf16.mxu0 %v2921_v16 }
 0x810   :  { %2685 = vmatmul.mubr.msk.f32.vlgmr.msra.gmra.mrb[18].mxu0 %vm254_vm3, %v1535_v6 }
 0x811   :  { %2857 = vmatpush3.bf16.msra.mxu0 %v3109_v55  ;;  %2695 = vmatprep.mubr.msk.f32.mxu0 %vm2922_vm1, %v2923_v29 }
 0x812   :  { %2858 = vmatprep.subr.bf16.mxu0 %v2921_v16 }
 0x815   :  { %2860 = vmatpush3.bf16.msra.mxu0 %v3120_v59 }
 0x816   :  { %2870 = vmatprep.subr.bf16.mxu0 %v2921_v16 }
 0x818   :  { %2696 = vmatmul.mubr.msk.f32.vlgmr.msra.gmra.mrb[20].mxu0 %vm172_vm2, %v1617_v7 }
 0x819   :  { %2872 = vmatpush3.bf16.msra.mxu0 %v3186_v34  ;;  %2720 = vmatprep.mubr.msk.f32.mxu0 %vm2922_vm1, %v2923_v29 }
 0x81a   :  { %2873 = vmatprep.subr.bf16.mxu0 %v2921_v16 }
 0x8df   :  { %v1449_v55 = vpop.f32.mrb[16].mxu0 }
 0x8e0   :  { %v1450_v8 = vadd.f32 %v1449_v55, %v1379_v50  ;;  %v2668_v59 = vpop.f32.mrb[17].mxu0 }
 0x8e2   :  { %1453 = vst [vmem:[#allocation2 + $0x1] sm:$0x1] %v1450_v8 }
 0x8e3   :  { %v1608_v11 = vpop.f32.mrb[18].mxu0 }
 0x8e4   :  { %v1609_v13 = vadd.f32 %v2345_v10, %v1608_v11  ;;  %v2686_v34 = vpop.f32.mrb[19].mxu0 }
 0x8e6   :  { %1612 = vst [vmem:[#allocation2 + $0x3] sm:$0x1] %v1609_v13 }
 0x8eb   :  { %v1686_v15 = vpop.f32.mrb[20].mxu0 }
 0x8ec   :  { %v1691_v20 = vmul.f32 %v2352_v14, %v1686_v15  ;;  %v2697_v32 = vpop.f32.mrb[21].mxu0 }
 0x8ee   :  { %v1693_v17 = vadd.f32 %v2353_v19, %v1691_v20 }
 0x8f0   :  { %v1694_v22 = vmax.f32 %v1693_v17, 0.0 }
 0x8f2   :  { %2703 = vmatmul.mubr.msk.f32.vlgmr.msra.gmra.mrb[20].mxu1 %vm254_vm3, %v1694_v22 }
 0x8f3   :  { %2866 = vmatpush3.bf16.msra.mxu1 %v3159_v23  ;;  %2713 = vmatprep.mubr.msk.f32.mxu1 %vm2922_vm1, %v2923_v29  ;;  %v2356_v23 = vld [vmem:[%s3465_s6 + $0x2] sm:$0x1] }
 0x8f4   :  { %2867 = vmatprep.subr.bf16.mxu1 %v2921_v16 }
 0x8f7   :  { %2869 = vmatpush3.bf16.msra.mxu1 %v3169_v28 }
 0x8f8   :  { %2879 = vmatprep.subr.bf16.mxu1 %v2921_v16 }
 0x8fa   :  { %2714 = vmatmul.mubr.msk.f32.vlgmr.msra.gmra.mrb[22].mxu1 %vm172_vm2, %v1776_v25 }
 0x8fb   :  { %2881 = vmatpush3.bf16.msra.mxu1 %v3232_v58  ;;  %2738 = vmatprep.mubr.msk.f32.mxu1 %vm2922_vm1, %v2923_v29  ;;  %v2364_v58 = vld [vmem:[%s3463_s4 + $0x3] sm:$0x1] }
 0x8fc   :  { %2882 = vmatprep.subr.bf16.mxu1 %v2921_v16 }
 0x9c5   :  { %v1767_v26 = vpop.f32.mrb[20].mxu1 }
 0x9c6   :  { %v1768_v30 = vadd.f32 %v2356_v23, %v1767_v26  ;;  %v2704_v28 = vpop.f32.mrb[21].mxu1 }
 0x9c8   :  { %1771 = vst [vmem:[#allocation2 + $0x5] sm:$0x1] %v1768_v30 }
 0x9cd   :  { %v1845_v33 = vpop.f32.mrb[22].mxu1 }
 0x9ce   :  { %v1850_v35 = vmul.f32 %v2363_v31, %v1845_v33  ;;  %v2715_v37 = vpop.f32.mrb[23].mxu1 }
 0x9d0   :  { %v1852_v38 = vadd.f32 %v2364_v58, %v1850_v35 }
 0x9d2   :  { %v1853_v39 = vmax.f32 %v1852_v38, 0.0 }
 0x9d4   :  { %2721 = vmatmul.mubr.msk.f32.vlgmr.msra.gmra.mrb[22].mxu0 %vm254_vm3, %v1853_v39 }
 0x9d5   :  { %2875 = vmatpush3.bf16.msra.mxu0 %v3205_v48  ;;  %2731 = vmatprep.mubr.msk.f32.mxu0 %vm2922_vm1, %v2923_v29  ;;  %v2367_v48 = vld [vmem:[%s3465_s6 + $0x3] sm:$0x1] }
 0x9d6   :  { %2876 = vmatprep.subr.bf16.mxu0 %v2921_v16 }
 0x9d9   :  { %2878 = vmatpush3.bf16.msra.mxu0 %v3215_v53  ;;  %v2374_v53 = vld [vmem:[%s3462_s3 + $0x4] sm:$0x1] }
 0x9da   :  { %2888 = vmatprep.subr.bf16.mxu0 %v2921_v16 }
 0x9dc   :  { %2732 = vmatmul.mubr.msk.f32.vlgmr.msra.gmra.mrb[24].mxu0 %vm172_vm2, %v1935_v40 }
 0x9dd   :  { %2890 = vmatpush3.bf16.msra.mxu0 %v3282_v24  ;;  %2756 = vmatprep.mubr.msk.f32.mxu0 %vm2922_vm1, %v2923_v29  ;;  %v2375_v24 = vld [vmem:[%s3463_s4 + $0x4] sm:$0x1] }
 0xaa7   :  { %v1926_v41 = vpop.f32.mrb[22].mxu0 }
 0xaa8   :  { %v1927_v42 = vadd.f32 %v2367_v48, %v1926_v41  ;;  %v2722_v3 = vpop.f32.mrb[23].mxu0 }
 0xaaa   :  { %1930 = vst [vmem:[#allocation2 + $0x7] sm:$0x1] %v1927_v42 }
 0xaaf   :  { %v2004_v5 = vpop.f32.mrb[24].mxu0 }
 0xab0   :  { %v2009_v9 = vmul.f32 %v2374_v53, %v2004_v5  ;;  %v2733_v43 = vpop.f32.mrb[25].mxu0 }
 0xab2   :  { %v2011_v44 = vadd.f32 %v2375_v24, %v2009_v9 }
 0xab4   :  { %v2012_v21 = vmax.f32 %v2011_v44, 0.0 }
 0xab6   :  { %2739 = vmatmul.mubr.msk.f32.vlgmr.msra.gmra.mrb[24].mxu1 %vm254_vm3, %v2012_v21 }
 0xab7   :  { %2884 = vmatpush3.bf16.msra.mxu1 %v3251_v12  ;;  %2749 = vmatprep.mubr.msk.f32.mxu1 %vm2922_vm1, %v2923_v29  ;;  %v2385_v29 = vld [vmem:[%s3462_s3 + $0x5] sm:$0x1]  ;;  %s2897_s3 = scalar_lea.vmem %s2255_s20, 192 }
 0xab8   :  { %2885 = vmatprep.subr.bf16.mxu1 %v2921_v16  ;;  %v2386_v16 = vld [vmem:[%s3463_s4 + $0x5] sm:$0x1]  ;;  %p2898_p0 = scmp.ne.s32.totalorder %s2255_s20, %s2897_s3  ;;  %p2903_p2 = scmp.lt.s32.totalorder %s2897_s3, %s2897_s3 }
 0xaba   :  { %p2904_p3 = por %p2903_p2, %p2902_p1 }
 0xabb   :  { %2887 = vmatpush3.bf16.msra.mxu1 %v3261_v18 }
 0xabc   :  { %p2905_p4 = pnand %p2904_p3, %p2898_p0 }
 0xabe   :  { %2750 = vmatmul.mubr.msk.f32.vlgmr.msra.gmra.mrb[26].mxu1 %vm172_vm2, %v2094_v45 }
 0xb89   :  { %v2085_v47 = vpop.f32.mrb[24].mxu1 }
 0xb8a   :  { %v2086_v27 = vadd.f32 %v2378_v46, %v2085_v47  ;;  %v2740_v51 = vpop.f32.mrb[25].mxu1 }
 0xb8c   :  { %2089 = vst [vmem:[#allocation2 + $0x9] sm:$0x1] %v2086_v27 }
 0xb91   :  { %v2163_v12 = vpop.f32.mrb[26].mxu1 }
 0xb92   :  { %v2168_v18 = vmul.f32 %v2385_v29, %v2163_v12  ;;  %v2751_v49 = vpop.f32.mrb[27].mxu1 }
 0xb94   :  { %v2170_v52 = vadd.f32 %v2386_v16, %v2168_v18 }
 0xb96   :  { %v2171_v54 = vmax.f32 %v2170_v52, 0.0 }
 0xb98   :  { %2757 = vmatmul.mubr.msk.f32.vlgmr.msra.gmra.mrb[26].mxu0 %vm254_vm3, %v2171_v54 }
 0xc6b   :  { %v2244_v56 = vpop.f32.mrb[26].mxu0 }
 0xc6c   :  { %v2245_v57 = vadd.f32 %v2389_v36, %v2244_v56  ;;  %v2758_v63 = vpop.f32.mrb[27].mxu0 }
 0xc6e   :  { %2248 = vst [vmem:[#allocation2 + $0xb] sm:$0x1] %v2245_v57 }
 0xc6f   :  { %2908 = shalt.err (!%p2905_p4)
}
 0xc70   :  { %s2909_s24 = scalar_lea.hbm %s3466_s7, 192 }
 0xc71   :  { %p2910_p5 = scmp.ne.s32.totalorder %s3466_s7, %s2909_s24  ;;  %p2913_p6 = scmp.lt.u32.totalorder %s2909_s24, %s3466_s7 }
 0xc73   :  { %p2915_p7 = pnand %p2913_p6, %p2910_p5 }
 0xc75   :  { %2918 = shalt.err (!%p2915_p7)
}
 0xc76   :  { %s2925_s27 = smov 32   ;;  %s2926_s28 = smov 2  }
 0xc77   :  { %2260 = dma.vmem_to_hbm [thread:$0]  %s2255_s20, 192, %s3466_s7, [#allocation3], %s2925_s27, %s2925_s27, %s2926_s28  }
 0xc78   :  { %2919 = dma.done.wait [#allocation3], 192  }
 0xc79   :  { %2920 = vsyncadd [#allocation3], 4294967104 }
 0xc7a   :  { %2264 = vsyncpa [#allocation3], 1 }

// kernel: tpu_custom_call.1
= control target key start
LH: loop header
LB: loop body
LE: loop exit
PB: predicated region body
PF: predicated region fallthrough
CT: control target
= control target key end

     0   :  { %vm37_vm0 = vcmask 392192   ;;  %s3459_s0 = inlined_call_operand.vmem [shape: f32[2,32,48], index: 0, kind: input, shape index: {}]   ;;  %s3460_s1 = inlined_call_operand.vmem [shape: f32[48,6], index: 1, kind: input, shape index: {}]   ;;  %s3461_s2 = inlined_call_operand.vmem [shape: f32[6,32,16], index: 2, kind: input, shape index: {}]   ;;  %s3462_s3 = inlined_call_operand.vmem [shape: f32[6,1,16], index: 3, kind: input, shape index: {}]   ;;  %s3463_s4 = inlined_call_operand.vmem [shape: f32[6,1,16], index: 4, kind: input, shape index: {}]   ;;  %s3464_s5 = inlined_call_operand.vmem [shape: f32[6,16,128], index: 5, kind: input, shape index: {}]   ;;  %s3465_s6 = inlined_call_operand.vmem [shape: f32[6,1,128], index: 6, kind: input, shape index: {}]   ;;  %s3466_s7 = inlined_call_operand.hbm [shape: f32[6,2,128], index: 7, kind: output, shape index: {}]  }
   0x1   :  { %v31_v0 = vld [vmem:[%s3460_s1] sm:$0xff]  ;;  %v32_v1 = vld [vmem:[%s3460_s1 + $0x8] sm:$0xff]  ;;  %v33_v2 = vld [vmem:[%s3460_s1 + $0x10] sm:$0xff] }
   0x2   :  { %v2976_v3 = vpack.c.bf16 %v32_v1, %v31_v0  ;;  %v34_v4 = vld [vmem:[%s3460_s1 + $0x18] sm:$0xff]  ;;  %v35_v6 = vld [vmem:[%s3460_s1 + $0x20] sm:$0xff]  ;;  %v36_v7 = vld [vmem:[%s3460_s1 + $0x28] sm:$0xff] }
   0x3   :  { %v2981_v5 = vpack.c.bf16 %v34_v4, %v33_v2  ;;  %v27_v8 = vld [vmem:[%s3459_s0] sm:$0xff] }
   0x4   :  { %2760 = vmatprep.subr.bf16.mxu0 %v2976_v3  ;;  %2519 = vmatprep.mubr.msk.f32.mxu0 %vm37_vm0, %v27_v8 }
   0x5   :  { %12 = vsyncpa [#allocation3], 0  ;;  %2762 = vmatpush3.bf16.msra.mxu0 %v2976_v3  ;;  %v2996_v9 = vpack.c.bf16 %v36_v7, %v35_v6  ;;  %v28_v10 = vld [vmem:[%s3459_s0 + $0x8] sm:$0xff]  ;;  %v29_v11 = vld [vmem:[%s3459_s0 + $0x10] sm:$0xff]  ;;  %v2921_v16 = vmov 0.0|0.0   ;;  %vm2922_vm1 = vmmov 0  }
   0x6   :  { %2764 = vmatprep.subr.bf16.mxu0 %v2981_v5  ;;  %v30_v12 = vld [vmem:[%s3459_s0 + $0x18] sm:$0xff]  ;;  %v168_v13 = vld [vmem:[%s3461_s2] sm:$0xff]  ;;  %v169_v14 = vld [vmem:[%s3461_s2 + $0x8] sm:$0xff]  ;;  %2771 = vmatprep.subr.bf16.mxu1 %v2921_v16  ;;  %v2923_v29 = vmov 0.0   ;;  %vm172_vm2 = vcmask 261120   ;;  %vm254_vm3 = vcmask 130048  }
   0x7   :  { %v2271_v15 = vld [vmem:[%s3461_s2 + $0x20] sm:$0xff]  ;;  %v3023_v17 = vpack.c.bf16 %v169_v14, %v168_v13  ;;  %v2272_v18 = vld [vmem:[%s3461_s2 + $0x28] sm:$0xff]  ;;  %v170_v19 = vld [vmem:[%s3461_s2 + $0x10] sm:$0xff]  ;;  %2533 = vmatprep.mubr.msk.f32.mxu1 %vm2922_vm1, %v2923_v29 }
   0x8   :  { %v171_v20 = vld [vmem:[%s3461_s2 + $0x18] sm:$0xff]  ;;  %v3035_v21 = vpack.c.bf16 %v2272_v18, %v2271_v15  ;;  %v2273_v25 = vld [vmem:[%s3461_s2 + $0x30] sm:$0xff]  ;;  %v251_v34 = vld [vmem:[%s3464_s5] sm:$0xff] }
   0x9   :  { %2766 = vmatpush3.bf16.msra.mxu0 %v2981_v5  ;;  %2773 = vmatpush3.bf16.msra.mxu1 %v3023_v17  ;;  %v3038_v22 = vpack.c.bf16 %v171_v20, %v170_v19  ;;  %v2274_v26 = vld [vmem:[%s3461_s2 + $0x38] sm:$0xff]  ;;  %v252_v35 = vld [vmem:[%s3464_s5 + $0x8] sm:$0xff]  ;;  %v246_v37 = vld [vmem:[%s3462_s3] sm:$0x1] }
   0xa   :  { %2768 = vmatprep.subr.bf16.mxu0 %v2996_v9  ;;  %2774 = vmatprep.subr.bf16.mxu1 %v2921_v16  ;;  %v3051_v27 = vpack.c.bf16 %v2274_v26, %v2273_v25  ;;  %v3075_v36 = vpack.c.bf16 %v252_v35, %v251_v34  ;;  %v248_v39 = vld [vmem:[%s3463_s4] sm:$0x1]  ;;  %v2276_v40 = vld [vmem:[%s3462_s3 + $0x1] sm:$0x1]  ;;  %v2278_v43 = vld [vmem:[%s3464_s5 + $0x10] sm:$0xff] }
   0xb   :  { %v2279_v44 = vld [vmem:[%s3464_s5 + $0x18] sm:$0xff]  ;;  %v2277_v46 = vld [vmem:[%s3463_s4 + $0x1] sm:$0x1]  ;;  %v2283_v54 = vld [vmem:[%s3461_s2 + $0x48] sm:$0xff] }
   0xc   :  { %v3097_v50 = vpack.c.bf16 %v2279_v44, %v2278_v43  ;;  %v2282_v53 = vld [vmem:[%s3461_s2 + $0x40] sm:$0xff]  ;;  %v2284_v57 = vld [vmem:[%s3461_s2 + $0x50] sm:$0xff]  ;;  %v2285_v58 = vld [vmem:[%s3461_s2 + $0x58] sm:$0xff] }
   0xd   :  { %2770 = vmatpush3.bf16.msra.mxu0 %v2996_v9  ;;  %2776 = vmatpush3.bf16.msra.mxu1 %v3038_v22  ;;  %v3109_v55 = vpack.c.bf16 %v2283_v54, %v2282_v53  ;;  %v3120_v59 = vpack.c.bf16 %v2285_v58, %v2284_v57  ;;  %v2289_v61 = vld [vmem:[%s3464_s5 + $0x20] sm:$0xff]  ;;  %v2290_v62 = vld [vmem:[%s3464_s5 + $0x28] sm:$0xff]  ;;  %v2295_v25 = vld [vmem:[%s3461_s2 + $0x70] sm:$0xff] }
   0xe   :  { %2780 = vmatprep.subr.bf16.mxu0 %v2921_v16  ;;  %2777 = vmatprep.subr.bf16.mxu1 %v2921_v16  ;;  %v3137_v63 = vpack.c.bf16 %v2290_v62, %v2289_v61  ;;  %v253_v0 = vld [vmem:[%s3465_s6] sm:$0x1]  ;;  %v2280_v6 = vld [vmem:[%s3465_s6 + $0x1] sm:$0x1]  ;;  %v2288_v13 = vld [vmem:[%s3463_s4 + $0x2] sm:$0x1] }
   0xf   :  { %v2293_v18 = vld [vmem:[%s3461_s2 + $0x60] sm:$0xff]  ;;  %v2294_v19 = vld [vmem:[%s3461_s2 + $0x68] sm:$0xff]  ;;  %v2296_v26 = vld [vmem:[%s3461_s2 + $0x78] sm:$0xff] }
  0x10   :  { %2520 = vmatmul.mubr.msk.f32.vlgmr.msra.gmra.mrb[0].mxu0 %vm37_vm0, %v28_v10  ;;  %v2291_v35 = vld [vmem:[%s3465_s6 + $0x2] sm:$0x1]  ;;  %v2312_v57 = vld [vmem:[%s3464_s5 + $0x48] sm:$0xff] }
  0x11   :  { %2522 = vmatprep.mubr.msk.f32.mxu0 %vm37_vm0, %v29_v11  ;;  %2782 = vmatpush3.bf16.msra.mxu0 %v3035_v21  ;;  %v2287_v11 = vld [vmem:[%s3462_s3 + $0x2] sm:$0x1] }
  0x12   :  { %2783 = vmatprep.subr.bf16.mxu0 %v2921_v16 }
  0x14   :  { %2523 = vmatmul.mubr.msk.f32.gmra.mrb[2].mxu0 %vm37_vm0, %v30_v12 }
  0x15   :  { %2785 = vmatpush3.bf16.msra.mxu0 %v3051_v27  ;;  %2551 = vmatprep.mubr.msk.f32.mxu0 %vm2922_vm1, %v2923_v29 }
  0x16   :  { %2795 = vmatprep.subr.bf16.mxu0 %v2921_v16 }
  0xe3   :  { %v2521_v23 = vpop.f32.mrb[0].mxu0 }
  0xe4   :  { %v116_v24 = vpop.f32.mrb[1].mxu0 }
  0xe5   :  { %135 = vxpose.xlu0.b32.start [1/4] (short) (narrow) %v116_v24, 8 }
  0xe7   :  { %v2524_v28 = vpop.f32.mrb[2].mxu0 }
  0xe8   :  { %v126_v30 = vpop.f32.mrb[3].mxu0 }
  0xe9   :  { %136 = vxpose.xlu0.b32.cont [2/4] (short) (narrow) %v2521_v23, 8  ;;  %v3159_v23 = vpack.c.bf16 %v2294_v19, %v2293_v18 }
  0xed   :  { %137 = vxpose.xlu0.b32.cont [3/4] (short) (narrow) %v126_v30, 8 }
  0xf1   :  { %138 = vxpose.xlu0.b32.end [4/4] (short) (narrow) %v2524_v28, 8  ;;  %v3169_v28 = vpack.c.bf16 %v2296_v26, %v2295_v25 }
 0x165   :  { %v151_v31 = vpop.trf.xlu0 }
 0x166   :  { %v3059_v32 = vmul.f32 0.125, %v151_v31  ;;  %v2300_v31 = vld [vmem:[%s3464_s5 + $0x30] sm:$0xff] }
 0x168   :  { %2534 = vmatmul.mubr.msk.f32.vlgmr.msra.gmra.mrb[0].mxu1 %vm172_vm2, %v3059_v32  ;;  %v334_v33 = vrot.slane %v3059_v32, 1  ;;  %v499_v60 = vrot.slane %v3059_v32, 2  ;;  %v664_v30 = vrot.slane %v3059_v32, 3  ;;  %v829_v54 = vrot.slane %v3059_v32, 4 }
 0x169   :  { %2540 = vmatprep.mubr.msk.f32.mxu1 %vm2922_vm1, %v2923_v29  ;;  %2779 = vmatpush3.bf16.msra.mxu1 %v3075_v36  ;;  %v994_v19 = vrot.slane %v3059_v32, 5  ;;  %v2323_v32 = vld [vmem:[%s3464_s5 + $0x58] sm:$0xff] }
 0x16a   :  { %2552 = vmatmul.mubr.msk.f32.vlgmr.msra.gmra.mrb[4].mxu0 %vm172_vm2, %v334_v33  ;;  %2786 = vmatprep.subr.bf16.mxu1 %v2921_v16  ;;  %v2301_v33 = vld [vmem:[%s3464_s5 + $0x38] sm:$0xff] }
 0x16b   :  { %2576 = vmatprep.mubr.msk.f32.mxu0 %vm2922_vm1, %v2923_v29  ;;  %2797 = vmatpush3.bf16.msra.mxu0 %v3137_v63  ;;  %v3186_v34 = vpack.c.bf16 %v2301_v33, %v2300_v31  ;;  %v2321_v33 = vld [vmem:[%s3463_s4 + $0x5] sm:$0x1] }
 0x16c   :  { %2798 = vmatprep.subr.bf16.mxu0 %v2921_v16 }
 0x23b   :  { %v242_v38 = vpop.f32.mrb[0].mxu1 }
 0x23c   :  { %v247_v41 = vmul.f32 %v246_v37, %v242_v38  ;;  %v2535_v42 = vpop.f32.mrb[1].mxu1 }
 0x23d   :  { %v403_v45 = vpop.f32.mrb[4].mxu0  ;;  %v2299_v42 = vld [vmem:[%s3463_s4 + $0x3] sm:$0x1] }
 0x23e   :  { %v249_v47 = vadd.f32 %v248_v39, %v247_v41  ;;  %v409_v48 = vmul.f32 %v2276_v40, %v403_v45  ;;  %v2553_v49 = vpop.f32.mrb[5].mxu0  ;;  %v2298_v40 = vld [vmem:[%s3462_s3 + $0x3] sm:$0x1] }
 0x23f   :  { %v2304_v45 = vld [vmem:[%s3461_s2 + $0x80] sm:$0xff] }
 0x240   :  { %v250_v51 = vmax.f32 %v249_v47, 0.0  ;;  %v412_v52 = vadd.f32 %v2277_v46, %v409_v48  ;;  %v2305_v46 = vld [vmem:[%s3461_s2 + $0x88] sm:$0xff] }
 0x241   :  { %v3205_v48 = vpack.c.bf16 %v2305_v46, %v2304_v45 }
 0x242   :  { %2541 = vmatmul.mubr.msk.f32.vlgmr.msra.gmra.mrb[2].mxu1 %vm254_vm3, %v250_v51  ;;  %v413_v56 = vmax.f32 %v412_v52, 0.0  ;;  %v2306_v51 = vld [vmem:[%s3461_s2 + $0x90] sm:$0xff]  ;;  %v2307_v52 = vld [vmem:[%s3461_s2 + $0x98] sm:$0xff] }
 0x243   :  { %2788 = vmatpush3.bf16.msra.mxu1 %v3097_v50  ;;  %2558 = vmatprep.mubr.msk.f32.mxu1 %vm2922_vm1, %v2923_v29  ;;  %v3215_v53 = vpack.c.bf16 %v2307_v52, %v2306_v51  ;;  %v1372_v52 = vld [vmem:[%s3462_s3] sm:$0x1] }
 0x244   :  { %2789 = vmatprep.subr.bf16.mxu1 %v2921_v16 }
 0x246   :  { %2559 = vmatmul.mubr.msk.f32.vlgmr.msra.gmra.mrb[4].mxu1 %vm254_vm3, %v413_v56  ;;  %v2311_v56 = vld [vmem:[%s3464_s5 + $0x40] sm:$0xff] }
 0x247   :  { %2791 = vmatpush3.bf16.msra.mxu1 %v3109_v55  ;;  %2569 = vmatprep.mubr.msk.f32.mxu1 %vm2922_vm1, %v2923_v29  ;;  %v3232_v58 = vpack.c.bf16 %v2312_v57, %v2311_v56  ;;  %v2341_v56 = vld [vmem:[%s3462_s3 + $0x1] sm:$0x1] }
 0x248   :  { %2792 = vmatprep.subr.bf16.mxu1 %v2921_v16 }
 0x24b   :  { %2794 = vmatpush3.bf16.msra.mxu1 %v3120_v59 }
 0x24c   :  { %2804 = vmatprep.subr.bf16.mxu1 %v2921_v16 }
 0x24e   :  { %2570 = vmatmul.mubr.msk.f32.vlgmr.msra.gmra.mrb[6].mxu1 %vm172_vm2, %v499_v60  ;;  %v2302_v60 = vld [vmem:[%s3465_s6 + $0x3] sm:$0x1] }
 0x24f   :  { %2594 = vmatprep.mubr.msk.f32.mxu1 %vm2922_vm1, %v2923_v29  ;;  %2806 = vmatpush3.bf16.msra.mxu1 %v3186_v34 }
 0x250   :  { %2807 = vmatprep.subr.bf16.mxu1 %v2921_v16 }
 0x315   :  { %v324_v1 = vpop.f32.mrb[2].mxu1 }
 0x316   :  { %v325_v2 = vadd.f32 %v324_v1, %v253_v0  ;;  %v2542_v4 = vpop.f32.mrb[3].mxu1  ;;  %v2309_v1 = vld [vmem:[%s3462_s3 + $0x4] sm:$0x1] }
 0x317   :  { %v2310_v4 = vld [vmem:[%s3463_s4 + $0x4] sm:$0x1] }
 0x318   :  { %328 = vst [vmem:[#allocation2] sm:$0x1] %v325_v2 }
 0x319   :  { %v488_v7 = vpop.f32.mrb[4].mxu1 }
 0x31a   :  { %v489_v8 = vadd.f32 %v2280_v6, %v488_v7  ;;  %v2560_v10 = vpop.f32.mrb[5].mxu1 }
 0x31b   :  { %v2316_v10 = vld [vmem:[%s3461_s2 + $0xa8] sm:$0xff] }
 0x31c   :  { %493 = vst [vmem:[#allocation2 + $0x2] sm:$0x1] %v489_v8  ;;  %v2315_v8 = vld [vmem:[%s3461_s2 + $0xa0] sm:$0xff] }
 0x321   :  { %v568_v12 = vpop.f32.mrb[6].mxu1 }
 0x322   :  { %v574_v14 = vmul.f32 %v2287_v11, %v568_v12  ;;  %v2571_v15 = vpop.f32.mrb[7].mxu1  ;;  %v3251_v12 = vpack.c.bf16 %v2316_v10, %v2315_v8  ;;  %v2345_v10 = vld [vmem:[%s3465_s6 + $0x1] sm:$0x1] }
 0x323   :  { %v2318_v15 = vld [vmem:[%s3461_s2 + $0xb8] sm:$0xff] }
 0x324   :  { %v577_v20 = vadd.f32 %v2288_v13, %v574_v14  ;;  %v2317_v14 = vld [vmem:[%s3461_s2 + $0xb0] sm:$0xff]  ;;  %s2924_s2 = smov [#allocation2]  }
 0x325   :  { %v3261_v18 = vpack.c.bf16 %v2318_v15, %v2317_v14  ;;  %v2352_v14 = vld [vmem:[%s3462_s3 + $0x2] sm:$0x1]  ;;  %s2254_s20 = sshll.u32 %s2924_s2, 4  ;;  %s2255_s20 = int_to_ptr.vmem [resolvable:$true] %s2254_s20 }
 0x326   :  { %v578_v24 = vmax.f32 %v577_v20, 0.0  ;;  %v2322_v20 = vld [vmem:[%s3464_s5 + $0x50] sm:$0xff]  ;;  %p2902_p1 = scmp.lt.s32.totalorder %s2255_s20, %s2255_s20 }
 0x328   :  { %2577 = vmatmul.mubr.msk.f32.vlgmr.msra.gmra.mrb[6].mxu0 %vm254_vm3, %v578_v24  ;;  %v3282_v24 = vpack.c.bf16 %v2323_v32, %v2322_v20 }
 0x329   :  { %2800 = vmatpush3.bf16.msra.mxu0 %v3159_v23  ;;  %2587 = vmatprep.mubr.msk.f32.mxu0 %vm2922_vm1, %v2923_v29 }
 0x32a   :  { %2801 = vmatprep.subr.bf16.mxu0 %v2921_v16 }
 0x32d   :  { %2803 = vmatpush3.bf16.msra.mxu0 %v3169_v28 }
 0x32e   :  { %2813 = vmatprep.subr.bf16.mxu0 %v2921_v16 }
 0x330   :  { %2588 = vmatmul.mubr.msk.f32.vlgmr.msra.gmra.mrb[8].mxu0 %vm172_vm2, %v664_v30  ;;  %v2320_v30 = vld [vmem:[%s3462_s3 + $0x5] sm:$0x1] }
 0x331   :  { %2612 = vmatprep.mubr.msk.f32.mxu0 %vm2922_vm1, %v2923_v29  ;;  %2815 = vmatpush3.bf16.msra.mxu0 %v3232_v58 }
 0x332   :  { %2816 = vmatprep.subr.bf16.mxu0 %v2921_v16 }
 0x3fb   :  { %v653_v37 = vpop.f32.mrb[6].mxu0 }
 0x3fc   :  { %v654_v38 = vadd.f32 %v2291_v35, %v653_v37  ;;  %v2578_v39 = vpop.f32.mrb[7].mxu0 }
 0x3fe   :  { %658 = vst [vmem:[#allocation2 + $0x4] sm:$0x1] %v654_v38 }
 0x403   :  { %v733_v41 = vpop.f32.mrb[8].mxu0 }
 0x404   :  { %v739_v43 = vmul.f32 %v2298_v40, %v733_v41  ;;  %v2589_v44 = vpop.f32.mrb[9].mxu0  ;;  %v2326_v40 = vld [vmem:[%s3459_s0 + $0x20] sm:$0xff]  ;;  %v2327_v41 = vld [vmem:[%s3459_s0 + $0x28] sm:$0xff] }
 0x406   :  { %v742_v47 = vadd.f32 %v2299_v42, %v739_v43  ;;  %v2328_v42 = vld [vmem:[%s3459_s0 + $0x30] sm:$0xff] }
 0x408   :  { %v743_v49 = vmax.f32 %v742_v47, 0.0 }
 0x40a   :  { %2595 = vmatmul.mubr.msk.f32.vlgmr.msra.gmra.mrb[8].mxu1 %vm254_vm3, %v743_v49 }
 0x40b   :  { %2809 = vmatpush3.bf16.msra.mxu1 %v3205_v48  ;;  %2605 = vmatprep.mubr.msk.f32.mxu1 %vm2922_vm1, %v2923_v29 }
 0x40c   :  { %2810 = vmatprep.subr.bf16.mxu1 %v2921_v16 }
 0x40f   :  { %2812 = vmatpush3.bf16.msra.mxu1 %v3215_v53 }
 0x410   :  { %2822 = vmatprep.subr.bf16.mxu1 %v2921_v16 }
 0x412   :  { %2606 = vmatmul.mubr.msk.f32.vlgmr.msra.gmra.mrb[10].mxu1 %vm172_vm2, %v829_v54 }
 0x413   :  { %2630 = vmatprep.mubr.msk.f32.mxu1 %vm2922_vm1, %v2923_v29  ;;  %2824 = vmatpush3.bf16.msra.mxu1 %v3282_v24 }
 0x414   :  { %2826 = vmatprep.subr.bf16.mxu1 %v2976_v3 }
 0x4dd   :  { %v818_v61 = vpop.f32.mrb[8].mxu1 }
 0x4de   :  { %v819_v62 = vadd.f32 %v2302_v60, %v818_v61  ;;  %v2596_v0 = vpop.f32.mrb[9].mxu1  ;;  %v2342_v61 = vld [vmem:[%s3463_s4 + $0x1] sm:$0x1] }
 0x4e0   :  { %823 = vst [vmem:[#allocation2 + $0x6] sm:$0x1] %v819_v62 }
 0x4e5   :  { %v898_v2 = vpop.f32.mrb[10].mxu1 }
 0x4e6   :  { %v904_v6 = vmul.f32 %v2309_v1, %v898_v2  ;;  %v2607_v7 = vpop.f32.mrb[11].mxu1 }
 0x4e8   :  { %v907_v11 = vadd.f32 %v2310_v4, %v904_v6 }
 0x4ea   :  { %v908_v13 = vmax.f32 %v907_v11, 0.0 }
 0x4ec   :  { %2613 = vmatmul.mubr.msk.f32.vlgmr.msra.gmra.mrb[10].mxu0 %vm254_vm3, %v908_v13 }
 0x4ed   :  { %2818 = vmatpush3.bf16.msra.mxu0 %v3251_v12  ;;  %2623 = vmatprep.mubr.msk.f32.mxu0 %vm2922_vm1, %v2923_v29 }
 0x4ee   :  { %2819 = vmatprep.subr.bf16.mxu0 %v2921_v16 }
 0x4f1   :  { %2821 = vmatpush3.bf16.msra.mxu0 %v3261_v18 }
 0x4f2   :  { %2837 = vmatprep.subr.bf16.mxu0 %v2921_v16 }
 0x4f4   :  { %2624 = vmatmul.mubr.msk.f32.vlgmr.msra.gmra.mrb[12].mxu0 %vm172_vm2, %v994_v19  ;;  %v2353_v19 = vld [vmem:[%s3463_s4 + $0x2] sm:$0x1] }
 0x4f5   :  { %2839 = vmatpush3.bf16.msra.mxu0 %v3023_v17  ;;  %2659 = vmatprep.mubr.msk.f32.mxu0 %vm2922_vm1, %v2923_v29  ;;  %v2313_v17 = vld [vmem:[%s3465_s6 + $0x4] sm:$0x1] }
 0x4f6   :  { %2840 = vmatprep.subr.bf16.mxu0 %v2921_v16 }
 0x4f9   :  { %2842 = vmatpush3.bf16.msra.mxu0 %v3038_v22 }
 0x4fa   :  { %2843 = vmatprep.subr.bf16.mxu0 %v2921_v16 }
 0x5bf   :  { %v983_v22 = vpop.f32.mrb[10].mxu0 }
 0x5c0   :  { %v984_v25 = vadd.f32 %v2313_v17, %v983_v22  ;;  %v2614_v26 = vpop.f32.mrb[11].mxu0 }
 0x5c2   :  { %988 = vst [vmem:[#allocation2 + $0x8] sm:$0x1] %v984_v25 }
 0x5c7   :  { %v1063_v31 = vpop.f32.mrb[12].mxu0 }
 0x5c8   :  { %v1069_v35 = vmul.f32 %v2320_v30, %v1063_v31  ;;  %v2625_v37 = vpop.f32.mrb[13].mxu0  ;;  %v2363_v31 = vld [vmem:[%s3462_s3 + $0x3] sm:$0x1] }
 0x5ca   :  { %v1072_v38 = vadd.f32 %v2321_v33, %v1069_v35 }
 0x5cc   :  { %v1073_v39 = vmax.f32 %v1072_v38, 0.0 }
 0x5ce   :  { %2631 = vmatmul.mubr.msk.f32.vlgmr.msra.gmra.mrb[12].mxu1 %vm254_vm3, %v1073_v39 }
 0x5cf   :  { %2828 = vmatpush3.bf16.msra.mxu1 %v2976_v3  ;;  %2645 = vmatprep.mubr.msk.f32.mxu1 %vm37_vm0, %v2326_v40  ;;  %v2329_v3 = vld [vmem:[%s3459_s0 + $0x38] sm:$0xff] }
 0x5d0   :  { %2830 = vmatprep.subr.bf16.mxu1 %v2981_v5 }
 0x5d3   :  { %2832 = vmatpush3.bf16.msra.mxu1 %v2981_v5  ;;  %v2324_v5 = vld [vmem:[%s3465_s6 + $0x5] sm:$0x1] }
 0x5d4   :  { %2834 = vmatprep.subr.bf16.mxu1 %v2996_v9 }
 0x5d7   :  { %2836 = vmatpush3.bf16.msra.mxu1 %v2996_v9 }
 0x5d8   :  { %2846 = vmatprep.subr.bf16.mxu1 %v2921_v16 }
 0x5da   :  { %2646 = vmatmul.mubr.msk.f32.vlgmr.msra.gmra.mrb[14].mxu1 %vm37_vm0, %v2327_v41 }
 0x5db   :  { %2648 = vmatprep.mubr.msk.f32.mxu1 %vm37_vm0, %v2328_v42  ;;  %2848 = vmatpush3.bf16.msra.mxu1 %v3035_v21 }
 0x5dc   :  { %2849 = vmatprep.subr.bf16.mxu1 %v2921_v16 }
 0x5de   :  { %2649 = vmatmul.mubr.msk.f32.gmra.mrb[16].mxu1 %vm37_vm0, %v2329_v3 }
 0x5df   :  { %2851 = vmatpush3.bf16.msra.mxu1 %v3051_v27  ;;  %2677 = vmatprep.mubr.msk.f32.mxu1 %vm2922_vm1, %v2923_v29 }
 0x5e0   :  { %2861 = vmatprep.subr.bf16.mxu1 %v2921_v16 }
 0x6a1   :  { %v1148_v9 = vpop.f32.mrb[12].mxu1 }
 0x6a2   :  { %v1149_v43 = vadd.f32 %v2324_v5, %v1148_v9  ;;  %v2632_v44 = vpop.f32.mrb[13].mxu1 }
 0x6a4   :  { %1153 = vst [vmem:[#allocation2 + $0xa] sm:$0x1] %v1149_v43 }
 0x6ad   :  { %v2647_v21 = vpop.f32.mrb[14].mxu1 }
 0x6ae   :  { %v1243_v45 = vpop.f32.mrb[15].mxu1 }
 0x6af   :  { %1262 = vxpose.xlu1.b32.start [1/4] (short) (narrow) %v1243_v45, 8 }
 0x6b1   :  { %v2650_v46 = vpop.f32.mrb[16].mxu1 }
 0x6b2   :  { %v1253_v47 = vpop.f32.mrb[17].mxu1 }
 0x6b3   :  { %1263 = vxpose.xlu1.b32.cont [2/4] (short) (narrow) %v2647_v21, 8 }
 0x6b7   :  { %1264 = vxpose.xlu1.b32.cont [3/4] (short) (narrow) %v1253_v47, 8 }
 0x6bb   :  { %1265 = vxpose.xlu1.b32.end [4/4] (short) (narrow) %v2650_v46, 8  ;;  %v2378_v46 = vld [vmem:[%s3465_s6 + $0x4] sm:$0x1] }
 0x72f   :  { %v1278_v27 = vpop.trf.xlu1 }
 0x730   :  { %v3327_v49 = vmul.f32 0.125, %v1278_v27 }
 0x732   :  { %2660 = vmatmul.mubr.msk.f32.vlgmr.msra.gmra.mrb[14].mxu0 %vm172_vm2, %v3327_v49  ;;  %v1458_v51 = vrot.slane %v3327_v49, 1  ;;  %v1617_v7 = vrot.slane %v3327_v49, 2  ;;  %v1776_v25 = vrot.slane %v3327_v49, 3  ;;  %v1935_v40 = vrot.slane %v3327_v49, 4 }
 0x733   :  { %2845 = vmatpush3.bf16.msra.mxu0 %v3075_v36  ;;  %2666 = vmatprep.mubr.msk.f32.mxu0 %vm2922_vm1, %v2923_v29  ;;  %v1374_v36 = vld [vmem:[%s3463_s4] sm:$0x1]  ;;  %v2094_v45 = vrot.slane %v3327_v49, 5 }
 0x734   :  { %2678 = vmatmul.mubr.msk.f32.vlgmr.msra.gmra.mrb[18].mxu1 %vm172_vm2, %v1458_v51  ;;  %2852 = vmatprep.subr.bf16.mxu0 %v2921_v16 }
 0x735   :  { %2863 = vmatpush3.bf16.msra.mxu1 %v3137_v63  ;;  %2702 = vmatprep.mubr.msk.f32.mxu1 %vm2922_vm1, %v2923_v29 }
 0x736   :  { %2864 = vmatprep.subr.bf16.mxu1 %v2921_v16 }
 0x805   :  { %v1368_v54 = vpop.f32.mrb[14].mxu0 }
 0x806   :  { %v1373_v57 = vmul.f32 %v1372_v52, %v1368_v54  ;;  %v2661_v63 = vpop.f32.mrb[15].mxu0 }
 0x807   :  { %v1527_v60 = vpop.f32.mrb[18].mxu1 }
 0x808   :  { %v1375_v62 = vadd.f32 %v1374_v36, %v1373_v57  ;;  %v1532_v0 = vmul.f32 %v2341_v56, %v1527_v60  ;;  %v2679_v1 = vpop.f32.mrb[19].mxu1  ;;  %v2389_v36 = vld [vmem:[%s3465_s6 + $0x5] sm:$0x1] }
 0x80a   :  { %v1376_v2 = vmax.f32 %v1375_v62, 0.0  ;;  %v1534_v4 = vadd.f32 %v2342_v61, %v1532_v0 }
 0x80c   :  { %2667 = vmatmul.mubr.msk.f32.vlgmr.msra.gmra.mrb[16].mxu0 %vm254_vm3, %v1376_v2  ;;  %v1535_v6 = vmax.f32 %v1534_v4, 0.0 }
 0x80d   :  { %2854 = vmatpush3.bf16.msra.mxu0 %v3097_v50  ;;  %2684 = vmatprep.mubr.msk.f32.mxu0 %vm2922_vm1, %v2923_v29  ;;  %v1379_v50 = vld [vmem:[%s3465_s6] sm:$0x1] }
 0x80e   :  { %2855 = vmatprep.subr.bf16.mxu0 %v2921_v16 }
 0x810   :  { %2685 = vmatmul.mubr.msk.f32.vlgmr.msra.gmra.mrb[18].mxu0 %vm254_vm3, %v1535_v6 }
 0x811   :  { %2857 = vmatpush3.bf16.msra.mxu0 %v3109_v55  ;;  %2695 = vmatprep.mubr.msk.f32.mxu0 %vm2922_vm1, %v2923_v29 }
 0x812   :  { %2858 = vmatprep.subr.bf16.mxu0 %v2921_v16 }
 0x815   :  { %2860 = vmatpush3.bf16.msra.mxu0 %v3120_v59 }
 0x816   :  { %2870 = vmatprep.subr.bf16.mxu0 %v2921_v16 }
 0x818   :  { %2696 = vmatmul.mubr.msk.f32.vlgmr.msra.gmra.mrb[20].mxu0 %vm172_vm2, %v1617_v7 }
 0x819   :  { %2872 = vmatpush3.bf16.msra.mxu0 %v3186_v34  ;;  %2720 = vmatprep.mubr.msk.f32.mxu0 %vm2922_vm1, %v2923_v29 }
 0x81a   :  { %2873 = vmatprep.subr.bf16.mxu0 %v2921_v16 }
 0x8df   :  { %v1449_v55 = vpop.f32.mrb[16].mxu0 }
 0x8e0   :  { %v1450_v8 = vadd.f32 %v1449_v55, %v1379_v50  ;;  %v2668_v59 = vpop.f32.mrb[17].mxu0 }
 0x8e2   :  { %1453 = vst [vmem:[#allocation2 + $0x1] sm:$0x1] %v1450_v8 }
 0x8e3   :  { %v1608_v11 = vpop.f32.mrb[18].mxu0 }
 0x8e4   :  { %v1609_v13 = vadd.f32 %v2345_v10, %v1608_v11  ;;  %v2686_v34 = vpop.f32.mrb[19].mxu0 }
 0x8e6   :  { %1612 = vst [vmem:[#allocation2 + $0x3] sm:$0x1] %v1609_v13 }
 0x8eb   :  { %v1686_v15 = vpop.f32.mrb[20].mxu0 }
 0x8ec   :  { %v1691_v20 = vmul.f32 %v2352_v14, %v1686_v15  ;;  %v2697_v32 = vpop.f32.mrb[21].mxu0 }
 0x8ee   :  { %v1693_v17 = vadd.f32 %v2353_v19, %v1691_v20 }
 0x8f0   :  { %v1694_v22 = vmax.f32 %v1693_v17, 0.0 }
 0x8f2   :  { %2703 = vmatmul.mubr.msk.f32.vlgmr.msra.gmra.mrb[20].mxu1 %vm254_vm3, %v1694_v22 }
 0x8f3   :  { %2866 = vmatpush3.bf16.msra.mxu1 %v3159_v23  ;;  %2713 = vmatprep.mubr.msk.f32.mxu1 %vm2922_vm1, %v2923_v29  ;;  %v2356_v23 = vld [vmem:[%s3465_s6 + $0x2] sm:$0x1] }
 0x8f4   :  { %2867 = vmatprep.subr.bf16.mxu1 %v2921_v16 }
 0x8f7   :  { %2869 = vmatpush3.bf16.msra.mxu1 %v3169_v28 }
 0x8f8   :  { %2879 = vmatprep.subr.bf16.mxu1 %v2921_v16 }
 0x8fa   :  { %2714 = vmatmul.mubr.msk.f32.vlgmr.msra.gmra.mrb[22].mxu1 %vm172_vm2, %v1776_v25 }
 0x8fb   :  { %2881 = vmatpush3.bf16.msra.mxu1 %v3232_v58  ;;  %2738 = vmatprep.mubr.msk.f32.mxu1 %vm2922_vm1, %v2923_v29  ;;  %v2364_v58 = vld [vmem:[%s3463_s4 + $0x3] sm:$0x1] }
 0x8fc   :  { %2882 = vmatprep.subr.bf16.mxu1 %v2921_v16 }
 0x9c5   :  { %v1767_v26 = vpop.f32.mrb[20].mxu1 }
 0x9c6   :  { %v1768_v30 = vadd.f32 %v2356_v23, %v1767_v26  ;;  %v2704_v28 = vpop.f32.mrb[21].mxu1 }
 0x9c8   :  { %1771 = vst [vmem:[#allocation2 + $0x5] sm:$0x1] %v1768_v30 }
 0x9cd   :  { %v1845_v33 = vpop.f32.mrb[22].mxu1 }
 0x9ce   :  { %v1850_v35 = vmul.f32 %v2363_v31, %v1845_v33  ;;  %v2715_v37 = vpop.f32.mrb[23].mxu1 }
 0x9d0   :  { %v1852_v38 = vadd.f32 %v2364_v58, %v1850_v35 }
 0x9d2   :  { %v1853_v39 = vmax.f32 %v1852_v38, 0.0 }
 0x9d4   :  { %2721 = vmatmul.mubr.msk.f32.vlgmr.msra.gmra.mrb[22].mxu0 %vm254_vm3, %v1853_v39 }
 0x9d5   :  { %2875 = vmatpush3.bf16.msra.mxu0 %v3205_v48  ;;  %2731 = vmatprep.mubr.msk.f32.mxu0 %vm2922_vm1, %v2923_v29  ;;  %v2367_v48 = vld [vmem:[%s3465_s6 + $0x3] sm:$0x1] }
 0x9d6   :  { %2876 = vmatprep.subr.bf16.mxu0 %v2921_v16 }
 0x9d9   :  { %2878 = vmatpush3.bf16.msra.mxu0 %v3215_v53  ;;  %v2374_v53 = vld [vmem:[%s3462_s3 + $0x4] sm:$0x1] }
 0x9da   :  { %2888 = vmatprep.subr.bf16.mxu0 %v2921_v16 }
 0x9dc   :  { %2732 = vmatmul.mubr.msk.f32.vlgmr.msra.gmra.mrb[24].mxu0 %vm172_vm2, %v1935_v40 }
 0x9dd   :  { %2890 = vmatpush3.bf16.msra.mxu0 %v3282_v24  ;;  %2756 = vmatprep.mubr.msk.f32.mxu0 %vm2922_vm1, %v2923_v29  ;;  %v2375_v24 = vld [vmem:[%s3463_s4 + $0x4] sm:$0x1] }
 0xaa7   :  { %v1926_v41 = vpop.f32.mrb[22].mxu0 }
 0xaa8   :  { %v1927_v42 = vadd.f32 %v2367_v48, %v1926_v41  ;;  %v2722_v3 = vpop.f32.mrb[23].mxu0 }
 0xaaa   :  { %1930 = vst [vmem:[#allocation2 + $0x7] sm:$0x1] %v1927_v42 }
 0xaaf   :  { %v2004_v5 = vpop.f32.mrb[24].mxu0 }
 0xab0   :  { %v2009_v9 = vmul.f32 %v2374_v53, %v2004_v5  ;;  %v2733_v43 = vpop.f32.mrb[25].mxu0 }
 0xab2   :  { %v2011_v44 = vadd.f32 %v2375_v24, %v2009_v9 }
 0xab4   :  { %v2012_v21 = vmax.f32 %v2011_v44, 0.0 }
 0xab6   :  { %2739 = vmatmul.mubr.msk.f32.vlgmr.msra.gmra.mrb[24].mxu1 %vm254_vm3, %v2012_v21 }
 0xab7   :  { %2884 = vmatpush3.bf16.msra.mxu1 %v3251_v12  ;;  %2749 = vmatprep.mubr.msk.f32.mxu1 %vm2922_vm1, %v2923_v29  ;;  %v2385_v29 = vld [vmem:[%s3462_s3 + $0x5] sm:$0x1]  ;;  %s2897_s3 = scalar_lea.vmem %s2255_s20, 192 }
 0xab8   :  { %2885 = vmatprep.subr.bf16.mxu1 %v2921_v16  ;;  %v2386_v16 = vld [vmem:[%s3463_s4 + $0x5] sm:$0x1]  ;;  %p2898_p0 = scmp.ne.s32.totalorder %s2255_s20, %s2897_s3  ;;  %p2903_p2 = scmp.lt.s32.totalorder %s2897_s3, %s2897_s3 }
 0xaba   :  { %p2904_p3 = por %p2903_p2, %p2902_p1 }
 0xabb   :  { %2887 = vmatpush3.bf16.msra.mxu1 %v3261_v18 }
 0xabc   :  { %p2905_p4 = pnand %p2904_p3, %p2898_p0 }
 0xabe   :  { %2750 = vmatmul.mubr.msk.f32.vlgmr.msra.gmra.mrb[26].mxu1 %vm172_vm2, %v2094_v45 }
 0xb89   :  { %v2085_v47 = vpop.f32.mrb[24].mxu1 }
 0xb8a   :  { %v2086_v27 = vadd.f32 %v2378_v46, %v2085_v47  ;;  %v2740_v51 = vpop.f32.mrb[25].mxu1 }
 0xb8c   :  { %2089 = vst [vmem:[#allocation2 + $0x9] sm:$0x1] %v2086_v27 }
 0xb91   :  { %v2163_v12 = vpop.f32.mrb[26].mxu1 }
 0xb92   :  { %v2168_v18 = vmul.f32 %v2385_v29, %v2163_v12  ;;  %v2751_v49 = vpop.f32.mrb[27].mxu1 }
 0xb94   :  { %v2170_v52 = vadd.f32 %v2386_v16, %v2168_v18 }
 0xb96   :  { %v2171_v54 = vmax.f32 %v2170_v52, 0.0 }
 0xb98   :  { %2757 = vmatmul.mubr.msk.f32.vlgmr.msra.gmra.mrb[26].mxu0 %vm254_vm3, %v2171_v54 }
 0xc6b   :  { %v2244_v56 = vpop.f32.mrb[26].mxu0 }
 0xc6c   :  { %v2245_v57 = vadd.f32 %v2389_v36, %v2244_v56  ;;  %v2758_v63 = vpop.f32.mrb[27].mxu0 }
 0xc6e   :  { %2248 = vst [vmem:[#allocation2 + $0xb] sm:$0x1] %v2245_v57 }
 0xc6f   :  { %2908 = shalt.err (!%p2905_p4)
}
 0xc70   :  { %s2909_s24 = scalar_lea.hbm %s3466_s7, 192 }
 0xc71   :  { %p2910_p5 = scmp.ne.s32.totalorder %s3466_s7, %s2909_s24  ;;  %p2913_p6 = scmp.lt.u32.totalorder %s2909_s24, %s3466_s7 }
 0xc73   :  { %p2915_p7 = pnand %p2913_p6, %p2910_p5 }
 0xc75   :  { %2918 = shalt.err (!%p2915_p7)
}
 0xc76   :  { %s2925_s27 = smov 32   ;;  %s2926_s28 = smov 2  }
 0xc77   :  { %2260 = dma.vmem_to_hbm [thread:$0]  %s2255_s20, 192, %s3466_s7, [#allocation3], %s2925_s27, %s2925_s27, %s2926_s28  }
 0xc78   :  { %2919 = dma.done.wait [#allocation3], 192  }
 0xc79   :  { %2920 = vsyncadd [#allocation3], 4294967104 }
 0xc7a   :  { %2264 = vsyncpa [#allocation3], 1 }

// kernel: tpu_custom_call.1
= control target key start
LH: loop header
LB: loop body
LE: loop exit
PB: predicated region body
PF: predicated region fallthrough
CT: control target
= control target key end

     0   :  { %vm35_vm0 = vcmask 64512   ;;  %s2656_s0 = inlined_call_operand.vmem [shape: f32[2,32,48], index: 0, kind: input, shape index: {}]   ;;  %s2657_s1 = inlined_call_operand.vmem [shape: f32[48,6], index: 1, kind: input, shape index: {}]   ;;  %s2658_s2 = inlined_call_operand.vmem [shape: f32[6,32,16], index: 2, kind: input, shape index: {}]   ;;  %s2659_s3 = inlined_call_operand.vmem [shape: f32[6,1,16], index: 3, kind: input, shape index: {}]   ;;  %s2660_s4 = inlined_call_operand.vmem [shape: f32[6,1,16], index: 4, kind: input, shape index: {}]   ;;  %s2661_s5 = inlined_call_operand.vmem [shape: f32[6,16,128], index: 5, kind: input, shape index: {}]   ;;  %s2662_s6 = inlined_call_operand.vmem [shape: f32[6,1,128], index: 6, kind: input, shape index: {}]   ;;  %s2663_s7 = inlined_call_operand.hbm [shape: f32[6,2,128], index: 7, kind: output, shape index: {}]  }
   0x1   :  { %v2197_v0 = vld [vmem:[%s2656_s0 + $0x20] sm:$0xff]  ;;  %v2207_v2 = vld [vmem:[%s2656_s0 + $0x28] sm:$0xff] }
   0x2   :  { %v2202_v1 = vld [vmem:[%s2656_s0] sm:$0xff]  ;;  %v48_v3 = vsel %vm35_vm0, %v2197_v0, 0.0  ;;  %v2216_v5 = vld [vmem:[%s2656_s0 + $0x8] sm:$0xff]  ;;  %v51_v6 = vsel %vm35_vm0, %v2207_v2, 0.0 }
   0x3   :  { %v36_v4 = vsel %vm35_vm0, %v2202_v1, 0.0  ;;  %49 = vadd.xlane.f32.xlu1 %v48_v3  ;;  %v39_v7 = vsel %vm35_vm0, %v2216_v5, 0.0 }
   0x4   :  { %37 = vadd.xlane.f32.xlu0 %v36_v4 }
   0x5   :  { %12 = vsyncpa [#allocation3], 0  ;;  %v2225_v8 = vld [vmem:[%s2656_s0 + $0x30] sm:$0xff]  ;;  %v2239_v12 = vld [vmem:[%s2656_s0 + $0x38] sm:$0xff]  ;;  %v2143_v19 = vmov 0.0|0.0   ;;  %s2144_s23 = smov 120   ;;  %v80_v24 = vlaneseq }
   0x6   :  { %v2230_v9 = vld [vmem:[%s2656_s0 + $0x10] sm:$0xff]  ;;  %v54_v10 = vsel %vm35_vm0, %v2225_v8, 0.0  ;;  %v2244_v13 = vld [vmem:[%s2656_s0 + $0x18] sm:$0xff]  ;;  %v57_v14 = vsel %vm35_vm0, %v2239_v12, 0.0  ;;  %v68_v16 = vld [vmem:[%s2658_s2] sm:$0xff]  ;;  %2054 = vmatprep.subr.bf16.mxu0 %v2143_v19  ;;  %2060 = vmatprep.subr.bf16.mxu1 %v2143_v19  ;;  %vm2145_vm1 = vmmov 0  }
   0x7   :  { %52 = vadd.xlane.f32.xlu1 %v51_v6  ;;  %v42_v11 = vsel %vm35_vm0, %v2230_v9, 0.0  ;;  %v45_v15 = vsel %vm35_vm0, %v2244_v13, 0.0  ;;  %v69_v17 = vld [vmem:[%s2658_s2 + $0x8] sm:$0xff]  ;;  %v70_v20 = vld [vmem:[%s2658_s2 + $0x10] sm:$0xff]  ;;  %v71_v21 = vld [vmem:[%s2658_s2 + $0x18] sm:$0xff]  ;;  %v2146_v23 = vmov 0.0  }
   0x8   :  { %40 = vadd.xlane.f32.xlu0 %v39_v7  ;;  %v2055_v18 = vpack.c.bf16 %v69_v17, %v68_v16  ;;  %v2058_v22 = vpack.c.bf16 %v71_v21, %v70_v20  ;;  %1954 = vmatprep.mubr.msk.f32.mxu0 %vm2145_vm1, %v2146_v23  ;;  %v81_v27 = vand.u32 127, %v80_v24  ;;  %v83_v29 = vshrl.u32 %v80_v24, 7  ;;  %s2147_s24 = smov 112   ;;  %s2148_s28 = smov 104  }
   0x9   :  { %1961 = vmatprep.mubr.msk.f32.mxu1 %vm2145_vm1, %v2146_v23  ;;  %vm91_vm2 = vcmask 130112   ;;  %vm98_vm3 = vcmask 195712   ;;  %vm105_vm4 = vcmask 261312   ;;  %vm126_vm5 = vcmask 1041409   ;;  %s2149_s21 = smov 96   ;;  %s2150_s16 = smov 88  }
   0xa   :  { %2056 = vmatpush3.bf16.msra.mxu0 %v2055_v18  ;;  %v86_v28 = vadd.s32 4294967288, %v81_v27  ;;  %v93_v32 = vadd.s32 4294967280, %v81_v27  ;;  %v100_v36 = vadd.s32 4294967272, %v81_v27  ;;  %v2280_v37 = vsub.s32 %v81_v27, %v83_v29  ;;  %v218_v27 = vld [vmem:[%s2661_s5] sm:$0xff] }
   0xb   :  { %55 = vadd.xlane.f32.xlu1 %v54_v10  ;;  %2057 = vmatprep.subr.bf16.mxu0 %v2143_v19  ;;  %vm128_vm6 = vcmask 261120   ;;  %vm227_vm7 = vcmask 130048  }
   0xc   :  { %43 = vadd.xlane.f32.xlu0 %v42_v11  ;;  %v2278_v33 = vsub.s32 %v86_v28, %v83_v29  ;;  %v2282_v38 = vsub.s32 %v93_v32, %v83_v29  ;;  %v2286_v47 = vsub.s32 %v100_v36, %v83_v29  ;;  %v219_v28 = vld [vmem:[%s2661_s5 + $0x8] sm:$0xff] }
   0xd   :  { %v2061_v29 = vpack.c.bf16 %v219_v28, %v218_v27  ;;  %v1824_v27 = vld [vmem:[%s2659_s3] ss:$0 sm:$0xff] }
   0xe   :  { %2059 = vmatpush3.bf16.msra.mxu0 %v2058_v22 }
   0xf   :  { %58 = vadd.xlane.f32.xlu1 %v57_v14  ;;  %2069 = vmatprep.subr.bf16.mxu0 %v2143_v19 }
  0x10   :  { %46 = vadd.xlane.f32.xlu0 %v45_v15  ;;  %2062 = vmatpush3.bf16.msra.mxu1 %v2061_v29  ;;  %v1825_v29 = vld [vmem:[%s2660_s4] ss:$0 sm:$0xff] }
  0x11   :  { %2063 = vmatprep.subr.bf16.mxu1 %v2143_v19 }
  0x20   :  { %320 = vrot.lane.b32.xlu1 %v2216_v5, %s2144_s23 }
  0x24   :  { %326 = vrot.lane.b32.xlu1 %v2197_v0, %s2144_s23 }
  0x26   :  { %318 = vrot.lane.b32.xlu0 %v2202_v1, %s2144_s23 }
  0x28   :  { %328 = vrot.lane.b32.xlu1 %v2207_v2, %s2144_s23 }
  0x2a   :  { %322 = vrot.lane.b32.xlu0 %v2230_v9, %s2144_s23 }
  0x2c   :  { %330 = vrot.lane.b32.xlu1 %v2225_v8, %s2144_s23 }
  0x2e   :  { %324 = vrot.lane.b32.xlu0 %v2244_v13, %s2144_s23 }
  0x30   :  { %332 = vrot.lane.b32.xlu1 %v2239_v12, %s2144_s23 }
  0x90   :  { %v50_v25 = vpop.xlane.xlu1 %49 }
  0x91   :  { %v38_v26 = vpop.xlane.xlu0 %37  ;;  %v64_v41 = vmul.f32 0.125, %v50_v25 }
  0x92   :  { %v60_v42 = vmul.f32 0.125, %v38_v26 }
  0x93   :  { %v110_v52 = vrot.slane %v64_v41, %v2280_v37 }
  0x94   :  { %v53_v30 = vpop.xlane.xlu1 %52  ;;  %v85_v53 = vrot.slane %v60_v42, %v2280_v37 }
  0x95   :  { %v41_v31 = vpop.xlane.xlu0 %40  ;;  %v65_v34 = vmul.f32 0.125, %v53_v30 }
  0x96   :  { %v61_v35 = vmul.f32 0.125, %v41_v31 }
  0x97   :  { %v114_v45 = vrot.slane %v65_v34, %v2278_v33 }
  0x98   :  { %v56_v39 = vpop.xlane.xlu1 %55  ;;  %v90_v46 = vrot.slane %v61_v35, %v2278_v33 }
  0x99   :  { %v44_v40 = vpop.xlane.xlu0 %43  ;;  %v66_v43 = vmul.f32 0.125, %v56_v39  ;;  %v115_v56 = vsel %vm91_vm2, %v114_v45, %v110_v52 }
  0x9a   :  { %v62_v44 = vmul.f32 0.125, %v44_v40  ;;  %v92_v57 = vsel %vm91_vm2, %v90_v46, %v85_v53 }
  0x9b   :  { %v119_v48 = vrot.slane %v66_v43, %v2282_v38 }
  0x9c   :  { %v97_v49 = vrot.slane %v62_v44, %v2282_v38  ;;  %v59_v50 = vpop.xlane.xlu1 %58 }
  0x9d   :  { %v47_v51 = vpop.xlane.xlu0 %46  ;;  %v67_v54 = vmul.f32 0.125, %v59_v50  ;;  %v120_v60 = vsel %vm98_vm3, %v119_v48, %v115_v56 }
  0x9e   :  { %v63_v55 = vmul.f32 0.125, %v47_v51  ;;  %v99_v61 = vsel %vm98_vm3, %v97_v49, %v92_v57 }
  0x9f   :  { %v124_v58 = vrot.slane %v67_v54, %v2286_v47 }
  0xa0   :  { %v104_v59 = vrot.slane %v63_v55, %v2286_v47  ;;  %v321_v62 = vpop.permute.xlu1 %320 }
  0xa1   :  { %v319_v63 = vpop.permute.xlu0 %318  ;;  %v125_v4 = vsel %vm105_vm4, %v124_v58, %v120_v60  ;;  %v345_v7 = vsel %vm35_vm0, %v321_v62, 0.0 }
  0xa2   :  { %v106_v3 = vsel %vm105_vm4, %v104_v59, %v99_v61  ;;  %v342_v6 = vsel %vm35_vm0, %v319_v63, 0.0  ;;  %346 = vadd.xlane.f32.xlu1 %v345_v7 }
  0xa3   :  { %v127_v10 = vsel %vm126_vm5, %v125_v4, %v106_v3  ;;  %343 = vadd.xlane.f32.xlu0 %v342_v6 }
  0xa4   :  { %1955 = vmatmul.mubr.msk.f32.vlgmr.msra.gmra.mrb[0].mxu0 %vm128_vm6, %v127_v10  ;;  %v327_v11 = vpop.permute.xlu1 %326 }
  0xa5   :  { %1979 = vmatprep.mubr.msk.f32.mxu0 %vm2145_vm1, %v2146_v23  ;;  %v354_v14 = vsel %vm35_vm0, %v327_v11, 0.0  ;;  %v323_v15 = vpop.permute.xlu0 %322 }
  0xa6   :  { %v348_v18 = vsel %vm35_vm0, %v323_v15, 0.0 }
  0xa7   :  { %355 = vadd.xlane.f32.xlu0 %v354_v14 }
  0xa8   :  { %v329_v16 = vpop.permute.xlu1 %328 }
  0xa9   :  { %v357_v17 = vsel %vm35_vm0, %v329_v16, 0.0  ;;  %v325_v21 = vpop.permute.xlu0 %324 }
  0xaa   :  { %v351_v24 = vsel %vm35_vm0, %v325_v21, 0.0 }
  0xab   :  { %358 = vadd.xlane.f32.xlu0 %v357_v17 }
  0xac   :  { %v331_v20 = vpop.permute.xlu1 %330 }
  0xad   :  { %v360_v22 = vsel %vm35_vm0, %v331_v20, 0.0 }
  0xae   :  { %361 = vadd.xlane.f32.xlu1 %v360_v22 }
  0xaf   :  { %349 = vadd.xlane.f32.xlu0 %v348_v18 }
  0xb0   :  { %v333_v25 = vpop.permute.xlu1 %332 }
  0xb1   :  { %v363_v26 = vsel %vm35_vm0, %v333_v25, 0.0 }
  0xb2   :  { %364 = vadd.xlane.f32.xlu1 %v363_v26 }
  0xb3   :  { %352 = vadd.xlane.f32.xlu0 %v351_v24 }
  0xc3   :  { %621 = vrot.lane.b32.xlu1 %v2216_v5, %s2147_s24 }
  0xc7   :  { %627 = vrot.lane.b32.xlu1 %v2197_v0, %s2147_s24 }
  0xc9   :  { %619 = vrot.lane.b32.xlu0 %v2202_v1, %s2147_s24 }
  0xcb   :  { %629 = vrot.lane.b32.xlu1 %v2207_v2, %s2147_s24 }
  0xcd   :  { %623 = vrot.lane.b32.xlu0 %v2230_v9, %s2147_s24 }
  0xcf   :  { %631 = vrot.lane.b32.xlu1 %v2225_v8, %s2147_s24 }
  0xd1   :  { %625 = vrot.lane.b32.xlu0 %v2244_v13, %s2147_s24 }
  0xd3   :  { %633 = vrot.lane.b32.xlu1 %v2239_v12, %s2147_s24 }
 0x12f   :  { %v347_v31 = vpop.xlane.xlu1 %346 }
 0x130   :  { %v344_v30 = vpop.xlane.xlu0 %343  ;;  %v367_v34 = vmul.f32 0.125, %v347_v31 }
 0x131   :  { %v366_v32 = vmul.f32 0.125, %v344_v30 }
 0x132   :  { %v394_v36 = vrot.slane %v367_v34, %v2278_v33  ;;  %v1829_v34 = vld [vmem:[%s2658_s2 + $0x28] sm:$0xff] }
 0x133   :  { %v390_v35 = vrot.slane %v366_v32, %v2280_v37  ;;  %v1828_v32 = vld [vmem:[%s2658_s2 + $0x20] sm:$0xff] }
 0x134   :  { %v356_v39 = vpop.xlane.xlu0 %355 }
 0x135   :  { %v370_v40 = vmul.f32 0.125, %v356_v39  ;;  %v395_v41 = vsel %vm91_vm2, %v394_v36, %v390_v35  ;;  %v2064_v36 = vpack.c.bf16 %v1829_v34, %v1828_v32 }
 0x137   :  { %v409_v43 = vrot.slane %v370_v40, %v2280_v37  ;;  %v1830_v40 = vld [vmem:[%s2658_s2 + $0x30] sm:$0xff] }
 0x138   :  { %v359_v42 = vpop.xlane.xlu0 %358 }
 0x139   :  { %v371_v44 = vmul.f32 0.125, %v359_v42 }
 0x13b   :  { %v413_v45 = vrot.slane %v371_v44, %v2278_v33  ;;  %v362_v46 = vpop.xlane.xlu1 %361 }
 0x13c   :  { %v350_v48 = vpop.xlane.xlu0 %349  ;;  %v372_v50 = vmul.f32 0.125, %v362_v46 }
 0x13d   :  { %v414_v49 = vsel %vm91_vm2, %v413_v45, %v409_v43  ;;  %v368_v51 = vmul.f32 0.125, %v350_v48 }
 0x13e   :  { %v418_v52 = vrot.slane %v372_v50, %v2282_v38 }
 0x13f   :  { %v399_v53 = vrot.slane %v368_v51, %v2282_v38  ;;  %v365_v54 = vpop.xlane.xlu1 %364 }
 0x140   :  { %v353_v55 = vpop.xlane.xlu0 %352  ;;  %v419_v56 = vsel %vm98_vm3, %v418_v52, %v414_v49  ;;  %v373_v58 = vmul.f32 0.125, %v365_v54  ;;  %v1838_v54 = vld [vmem:[%s2661_s5 + $0x18] sm:$0xff] }
 0x141   :  { %v400_v57 = vsel %vm98_vm3, %v399_v53, %v395_v41  ;;  %v369_v59 = vmul.f32 0.125, %v353_v55  ;;  %v1831_v41 = vld [vmem:[%s2658_s2 + $0x38] sm:$0xff]  ;;  %v1837_v53 = vld [vmem:[%s2661_s5 + $0x10] sm:$0xff] }
 0x142   :  { %v423_v60 = vrot.slane %v373_v58, %v2286_v47  ;;  %v2067_v42 = vpack.c.bf16 %v1831_v41, %v1830_v40  ;;  %v2070_v55 = vpack.c.bf16 %v1838_v54, %v1837_v53  ;;  %v1842_v53 = vld [vmem:[%s2658_s2 + $0x40] sm:$0xff]  ;;  %v1843_v54 = vld [vmem:[%s2658_s2 + $0x48] sm:$0xff] }
 0x143   :  { %v404_v61 = vrot.slane %v369_v59, %v2286_v47  ;;  %v622_v62 = vpop.permute.xlu1 %621 }
 0x144   :  { %v620_v63 = vpop.permute.xlu0 %619  ;;  %v424_v3 = vsel %vm105_vm4, %v423_v60, %v419_v56  ;;  %v646_v7 = vsel %vm35_vm0, %v622_v62, 0.0  ;;  %2071 = vmatpush3.bf16.msra.mxu0 %v2070_v55 }
 0x145   :  { %v405_v4 = vsel %vm105_vm4, %v404_v61, %v400_v57  ;;  %v643_v6 = vsel %vm35_vm0, %v620_v63, 0.0  ;;  %647 = vadd.xlane.f32.xlu1 %v646_v7  ;;  %2072 = vmatprep.subr.bf16.mxu0 %v2143_v19 }
 0x146   :  { %v425_v10 = vsel %vm126_vm5, %v424_v3, %v405_v4  ;;  %644 = vadd.xlane.f32.xlu0 %v643_v6 }
 0x147   :  { %v628_v11 = vpop.permute.xlu1 %627 }
 0x148   :  { %v655_v14 = vsel %vm35_vm0, %v628_v11, 0.0  ;;  %v624_v15 = vpop.permute.xlu0 %623 }
 0x149   :  { %v649_v18 = vsel %vm35_vm0, %v624_v15, 0.0 }
 0x14a   :  { %656 = vadd.xlane.f32.xlu0 %v655_v14 }
 0x14b   :  { %v630_v16 = vpop.permute.xlu1 %629 }
 0x14c   :  { %v658_v17 = vsel %vm35_vm0, %v630_v16, 0.0  ;;  %v626_v21 = vpop.permute.xlu0 %625 }
 0x14d   :  { %v652_v24 = vsel %vm35_vm0, %v626_v21, 0.0 }
 0x14e   :  { %659 = vadd.xlane.f32.xlu0 %v658_v17 }
 0x14f   :  { %v632_v20 = vpop.permute.xlu1 %631 }
 0x150   :  { %v661_v22 = vsel %vm35_vm0, %v632_v20, 0.0 }
 0x151   :  { %662 = vadd.xlane.f32.xlu1 %v661_v22 }
 0x152   :  { %650 = vadd.xlane.f32.xlu0 %v649_v18 }
 0x153   :  { %v634_v25 = vpop.permute.xlu1 %633 }
 0x154   :  { %v664_v26 = vsel %vm35_vm0, %v634_v25, 0.0 }
 0x155   :  { %665 = vadd.xlane.f32.xlu1 %v664_v26 }
 0x156   :  { %653 = vadd.xlane.f32.xlu0 %v652_v24 }
 0x166   :  { %922 = vrot.lane.b32.xlu1 %v2216_v5, %s2148_s28 }
 0x16a   :  { %928 = vrot.lane.b32.xlu1 %v2197_v0, %s2148_s28 }
 0x16c   :  { %920 = vrot.lane.b32.xlu0 %v2202_v1, %s2148_s28 }
 0x16e   :  { %930 = vrot.lane.b32.xlu1 %v2207_v2, %s2148_s28 }
 0x170   :  { %924 = vrot.lane.b32.xlu0 %v2230_v9, %s2148_s28 }
 0x172   :  { %932 = vrot.lane.b32.xlu1 %v2225_v8, %s2148_s28 }
 0x174   :  { %926 = vrot.lane.b32.xlu0 %v2244_v13, %s2148_s28 }
 0x176   :  { %934 = vrot.lane.b32.xlu1 %v2239_v12, %s2148_s28 }
 0x177   :  { %v197_v28 = vpop.f32.mrb[0].mxu0 }
 0x178   :  { %v208_v30 = vmul.f32 %v1824_v27, %v197_v28  ;;  %v1956_v31 = vpop.f32.mrb[1].mxu0 }
 0x17a   :  { %v216_v35 = vadd.f32 %v1825_v29, %v208_v30 }
 0x17c   :  { %v217_v39 = vmax.f32 %v216_v35, 0.0 }
 0x17e   :  { %1962 = vmatmul.mubr.msk.f32.vlgmr.msra.gmra.mrb[0].mxu1 %vm227_vm7, %v217_v39 }
 0x17f   :  { %2065 = vmatpush3.bf16.msra.mxu1 %v2064_v36  ;;  %1972 = vmatprep.mubr.msk.f32.mxu1 %vm2145_vm1, %v2146_v23 }
 0x180   :  { %2066 = vmatprep.subr.bf16.mxu1 %v2143_v19 }
 0x183   :  { %2068 = vmatpush3.bf16.msra.mxu1 %v2067_v42 }
 0x184   :  { %2078 = vmatprep.subr.bf16.mxu1 %v2143_v19 }
 0x186   :  { %1973 = vmatmul.mubr.msk.f32.vlgmr.msra.gmra.mrb[2].mxu1 %vm128_vm6, %v425_v10 }
 0x187   :  { %1997 = vmatprep.mubr.msk.f32.mxu1 %vm2145_vm1, %v2146_v23 }
 0x1d2   :  { %v648_v44 = vpop.xlane.xlu1 %647 }
 0x1d3   :  { %v645_v43 = vpop.xlane.xlu0 %644  ;;  %v668_v46 = vmul.f32 0.125, %v648_v44 }
 0x1d4   :  { %v667_v45 = vmul.f32 0.125, %v645_v43  ;;  %v1826_v43 = vld [vmem:[%s2662_s6] ss:$0 sm:$0xff] }
 0x1d5   :  { %v695_v49 = vrot.slane %v668_v46, %v2278_v33 }
 0x1d6   :  { %v691_v48 = vrot.slane %v667_v45, %v2280_v37 }
 0x1d7   :  { %v657_v50 = vpop.xlane.xlu0 %656 }
 0x1d8   :  { %v671_v51 = vmul.f32 0.125, %v657_v50  ;;  %v696_v52 = vsel %vm91_vm2, %v695_v49, %v691_v48  ;;  %v1834_v48 = vld [vmem:[%s2659_s3 + $0x1] ss:$0 sm:$0xff] }
 0x1d9   :  { %v1836_v50 = vld [vmem:[%s2660_s4 + $0x1] ss:$0 sm:$0xff] }
 0x1da   :  { %v710_v57 = vrot.slane %v671_v51, %v2280_v37 }
 0x1db   :  { %v660_v56 = vpop.xlane.xlu0 %659 }
 0x1dc   :  { %v672_v58 = vmul.f32 0.125, %v660_v56  ;;  %v2073_v56 = vpack.c.bf16 %v1843_v54, %v1842_v53 }
 0x1de   :  { %v714_v59 = vrot.slane %v672_v58, %v2278_v33  ;;  %v663_v60 = vpop.xlane.xlu1 %662  ;;  %v1844_v58 = vld [vmem:[%s2658_s2 + $0x50] sm:$0xff] }
 0x1df   :  { %v651_v61 = vpop.xlane.xlu0 %650  ;;  %v673_v63 = vmul.f32 0.125, %v663_v60 }
 0x1e0   :  { %v715_v62 = vsel %vm91_vm2, %v714_v59, %v710_v57  ;;  %v669_v3 = vmul.f32 0.125, %v651_v61  ;;  %v1845_v59 = vld [vmem:[%s2658_s2 + $0x58] sm:$0xff] }
 0x1e1   :  { %v719_v4 = vrot.slane %v673_v63, %v2282_v38  ;;  %v2076_v60 = vpack.c.bf16 %v1845_v59, %v1844_v58 }
 0x1e2   :  { %v700_v6 = vrot.slane %v669_v3, %v2282_v38  ;;  %v666_v7 = vpop.xlane.xlu1 %665 }
 0x1e3   :  { %v654_v10 = vpop.xlane.xlu0 %653  ;;  %v720_v11 = vsel %vm98_vm3, %v719_v4, %v715_v62  ;;  %v674_v15 = vmul.f32 0.125, %v666_v7 }
 0x1e4   :  { %v701_v14 = vsel %vm98_vm3, %v700_v6, %v696_v52  ;;  %v670_v16 = vmul.f32 0.125, %v654_v10 }
 0x1e5   :  { %v724_v17 = vrot.slane %v674_v15, %v2286_v47 }
 0x1e6   :  { %v705_v18 = vrot.slane %v670_v16, %v2286_v47  ;;  %v923_v22 = vpop.permute.xlu1 %922 }
 0x1e7   :  { %v725_v20 = vsel %vm105_vm4, %v724_v17, %v720_v11  ;;  %v921_v24 = vpop.permute.xlu0 %920  ;;  %v947_v27 = vsel %vm35_vm0, %v923_v22, 0.0 }
 0x1e8   :  { %v706_v21 = vsel %vm105_vm4, %v705_v18, %v701_v14  ;;  %v944_v26 = vsel %vm35_vm0, %v921_v24, 0.0  ;;  %948 = vadd.xlane.f32.xlu1 %v947_v27 }
 0x1e9   :  { %v726_v25 = vsel %vm126_vm5, %v725_v20, %v706_v21  ;;  %945 = vadd.xlane.f32.xlu0 %v944_v26 }
 0x1ea   :  { %v929_v28 = vpop.permute.xlu1 %928 }
 0x1eb   :  { %v956_v29 = vsel %vm35_vm0, %v929_v28, 0.0  ;;  %v925_v30 = vpop.permute.xlu0 %924 }
 0x1ec   :  { %v950_v34 = vsel %vm35_vm0, %v925_v30, 0.0 }
 0x1ed   :  { %957 = vadd.xlane.f32.xlu0 %v956_v29 }
 0x1ee   :  { %v931_v31 = vpop.permute.xlu1 %930 }
 0x1ef   :  { %v959_v32 = vsel %vm35_vm0, %v931_v31, 0.0  ;;  %v927_v36 = vpop.permute.xlu0 %926 }
 0x1f0   :  { %v953_v40 = vsel %vm35_vm0, %v927_v36, 0.0 }
 0x1f1   :  { %960 = vadd.xlane.f32.xlu0 %v959_v32 }
 0x1f2   :  { %v933_v35 = vpop.permute.xlu1 %932 }
 0x1f3   :  { %v962_v39 = vsel %vm35_vm0, %v933_v35, 0.0 }
 0x1f4   :  { %963 = vadd.xlane.f32.xlu1 %v962_v39 }
 0x1f5   :  { %951 = vadd.xlane.f32.xlu0 %v950_v34 }
 0x1f6   :  { %v935_v41 = vpop.permute.xlu1 %934 }
 0x1f7   :  { %v965_v42 = vsel %vm35_vm0, %v935_v41, 0.0  ;;  %v1852_v41 = vld [vmem:[%s2661_s5 + $0x28] sm:$0xff] }
 0x1f8   :  { %966 = vadd.xlane.f32.xlu1 %v965_v42 }
 0x1f9   :  { %954 = vadd.xlane.f32.xlu0 %v953_v40  ;;  %v1851_v40 = vld [vmem:[%s2661_s5 + $0x20] sm:$0xff] }
 0x209   :  { %1223 = vrot.lane.b32.xlu1 %v2216_v5, %s2149_s21 }
 0x20d   :  { %1229 = vrot.lane.b32.xlu1 %v2197_v0, %s2149_s21 }
 0x20f   :  { %1221 = vrot.lane.b32.xlu0 %v2202_v1, %s2149_s21 }
 0x211   :  { %1231 = vrot.lane.b32.xlu1 %v2207_v2, %s2149_s21 }
 0x213   :  { %1225 = vrot.lane.b32.xlu0 %v2230_v9, %s2149_s21 }
 0x215   :  { %1233 = vrot.lane.b32.xlu1 %v2225_v8, %s2149_s21 }
 0x217   :  { %1227 = vrot.lane.b32.xlu0 %v2244_v13, %s2149_s21 }
 0x219   :  { %1235 = vrot.lane.b32.xlu1 %v2239_v12, %s2149_s21 }
 0x251   :  { %v297_v44 = vpop.f32.mrb[0].mxu1 }
 0x252   :  { %v298_v45 = vadd.f32 %v1826_v43, %v297_v44  ;;  %v1963_v46 = vpop.f32.mrb[1].mxu1  ;;  %v2079_v43 = vpack.c.bf16 %v1852_v41, %v1851_v40 }
 0x254   :  { %301 = vst [vmem:[#allocation2] sm:$0x3] %v298_v45  ;;  %2080 = vmatpush3.bf16.msra.mxu1 %v2079_v43 }
 0x255   :  { %2081 = vmatprep.subr.bf16.mxu1 %v2143_v19 }
 0x259   :  { %v494_v49 = vpop.f32.mrb[2].mxu1 }
 0x25a   :  { %v506_v51 = vmul.f32 %v1834_v48, %v494_v49  ;;  %v1974_v52 = vpop.f32.mrb[3].mxu1 }
 0x25c   :  { %v515_v55 = vadd.f32 %v1836_v50, %v506_v51 }
 0x25e   :  { %v516_v57 = vmax.f32 %v515_v55, 0.0 }
 0x260   :  { %1980 = vmatmul.mubr.msk.f32.vlgmr.msra.gmra.mrb[2].mxu0 %vm227_vm7, %v516_v57 }
 0x261   :  { %2074 = vmatpush3.bf16.msra.mxu0 %v2073_v56  ;;  %1990 = vmatprep.mubr.msk.f32.mxu0 %vm2145_vm1, %v2146_v23 }
 0x262   :  { %2075 = vmatprep.subr.bf16.mxu0 %v2143_v19 }
 0x265   :  { %2077 = vmatpush3.bf16.msra.mxu0 %v2076_v60 }
 0x266   :  { %2087 = vmatprep.subr.bf16.mxu0 %v2143_v19 }
 0x268   :  { %1991 = vmatmul.mubr.msk.f32.vlgmr.msra.gmra.mrb[4].mxu0 %vm128_vm6, %v726_v25 }
 0x269   :  { %2015 = vmatprep.mubr.msk.f32.mxu0 %vm2145_vm1, %v2146_v23 }
 0x275   :  { %v949_v62 = vpop.xlane.xlu1 %948 }
 0x276   :  { %v946_v61 = vpop.xlane.xlu0 %945  ;;  %v969_v3 = vmul.f32 0.125, %v949_v62 }
 0x277   :  { %v968_v63 = vmul.f32 0.125, %v946_v61  ;;  %v1840_v61 = vld [vmem:[%s2662_s6 + $0x1] ss:$0 sm:$0xff] }
 0x278   :  { %v996_v6 = vrot.slane %v969_v3, %v2278_v33 }
 0x279   :  { %v992_v4 = vrot.slane %v968_v63, %v2280_v37 }
 0x27a   :  { %v958_v7 = vpop.xlane.xlu0 %957 }
 0x27b   :  { %v972_v10 = vmul.f32 0.125, %v958_v7  ;;  %v997_v11 = vsel %vm91_vm2, %v996_v6, %v992_v4  ;;  %v1858_v7 = vld [vmem:[%s2658_s2 + $0x70] sm:$0xff] }
 0x27d   :  { %v1011_v15 = vrot.slane %v972_v10, %v2280_v37  ;;  %v1859_v10 = vld [vmem:[%s2658_s2 + $0x78] sm:$0xff] }
 0x27e   :  { %v961_v14 = vpop.xlane.xlu0 %960 }
 0x27f   :  { %v973_v16 = vmul.f32 0.125, %v961_v14 }
 0x281   :  { %v1015_v17 = vrot.slane %v973_v16, %v2278_v33  ;;  %v964_v18 = vpop.xlane.xlu1 %963 }
 0x282   :  { %v952_v20 = vpop.xlane.xlu0 %951  ;;  %v974_v22 = vmul.f32 0.125, %v964_v18 }
 0x283   :  { %v1016_v21 = vsel %vm91_vm2, %v1015_v17, %v1011_v15  ;;  %v970_v24 = vmul.f32 0.125, %v952_v20 }
 0x284   :  { %v1020_v25 = vrot.slane %v974_v22, %v2282_v38 }
 0x285   :  { %v1001_v26 = vrot.slane %v970_v24, %v2282_v38  ;;  %v967_v29 = vpop.xlane.xlu1 %966 }
 0x286   :  { %v1021_v27 = vsel %vm98_vm3, %v1020_v25, %v1016_v21  ;;  %v975_v30 = vmul.f32 0.125, %v967_v29  ;;  %v955_v32 = vpop.xlane.xlu0 %954 }
 0x287   :  { %v1002_v28 = vsel %vm98_vm3, %v1001_v26, %v997_v11  ;;  %v971_v34 = vmul.f32 0.125, %v955_v32  ;;  %v2085_v11 = vpack.c.bf16 %v1859_v10, %v1858_v7  ;;  %v1864_v10 = vld [vmem:[%s2660_s4 + $0x3] ss:$0 sm:$0xff] }
 0x288   :  { %v1025_v31 = vrot.slane %v975_v30, %v2286_v47 }
 0x289   :  { %v1006_v35 = vrot.slane %v971_v34, %v2286_v47  ;;  %v1224_v44 = vpop.permute.xlu1 %1223 }
 0x28a   :  { %v1026_v36 = vsel %vm105_vm4, %v1025_v31, %v1021_v27  ;;  %v1222_v45 = vpop.permute.xlu0 %1221  ;;  %v1248_v48 = vsel %vm35_vm0, %v1224_v44, 0.0 }
 0x28b   :  { %v1007_v39 = vsel %vm105_vm4, %v1006_v35, %v1002_v28  ;;  %v1245_v46 = vsel %vm35_vm0, %v1222_v45, 0.0  ;;  %1249 = vadd.xlane.f32.xlu1 %v1248_v48 }
 0x28c   :  { %v1027_v42 = vsel %vm126_vm5, %v1026_v36, %v1007_v39  ;;  %1246 = vadd.xlane.f32.xlu0 %v1245_v46 }
 0x28d   :  { %v1230_v49 = vpop.permute.xlu1 %1229 }
 0x28e   :  { %v1257_v50 = vsel %vm35_vm0, %v1230_v49, 0.0  ;;  %v1226_v51 = vpop.permute.xlu0 %1225 }
 0x28f   :  { %v1251_v54 = vsel %vm35_vm0, %v1226_v51, 0.0  ;;  %v1866_v51 = vld [vmem:[%s2661_s5 + $0x38] sm:$0xff] }
 0x290   :  { %1258 = vadd.xlane.f32.xlu0 %v1257_v50  ;;  %v1865_v50 = vld [vmem:[%s2661_s5 + $0x30] sm:$0xff] }
 0x291   :  { %v1232_v52 = vpop.permute.xlu1 %1231 }
 0x292   :  { %v1260_v53 = vsel %vm35_vm0, %v1232_v52, 0.0  ;;  %v1228_v56 = vpop.permute.xlu0 %1227 }
 0x293   :  { %v1254_v58 = vsel %vm35_vm0, %v1228_v56, 0.0 }
 0x294   :  { %1261 = vadd.xlane.f32.xlu0 %v1260_v53  ;;  %v2088_v53 = vpack.c.bf16 %v1866_v51, %v1865_v50 }
 0x295   :  { %v1234_v55 = vpop.permute.xlu1 %1233 }
 0x296   :  { %v1263_v57 = vsel %vm35_vm0, %v1234_v55, 0.0  ;;  %2089 = vmatpush3.bf16.msra.mxu0 %v2088_v53  ;;  %v1878_v53 = vld [vmem:[%s2660_s4 + $0x4] ss:$0 sm:$0xff] }
 0x297   :  { %1264 = vadd.xlane.f32.xlu1 %v1263_v57  ;;  %2090 = vmatprep.subr.bf16.mxu0 %v2143_v19 }
 0x298   :  { %1252 = vadd.xlane.f32.xlu0 %v1251_v54 }
 0x299   :  { %v1236_v59 = vpop.permute.xlu1 %1235 }
 0x29a   :  { %v1266_v60 = vsel %vm35_vm0, %v1236_v59, 0.0 }
 0x29b   :  { %1267 = vadd.xlane.f32.xlu1 %v1266_v60 }
 0x29c   :  { %1255 = vadd.xlane.f32.xlu0 %v1254_v58 }
 0x2ac   :  { %1524 = vrot.lane.b32.xlu1 %v2216_v5, %s2150_s16 }
 0x2b0   :  { %1530 = vrot.lane.b32.xlu1 %v2197_v0, %s2150_s16  ;;  %v1848_v0 = vld [vmem:[%s2659_s3 + $0x2] ss:$0 sm:$0xff] }
 0x2b2   :  { %1522 = vrot.lane.b32.xlu0 %v2202_v1, %s2150_s16 }
 0x2b4   :  { %1532 = vrot.lane.b32.xlu1 %v2207_v2, %s2150_s16  ;;  %v1850_v2 = vld [vmem:[%s2660_s4 + $0x2] ss:$0 sm:$0xff] }
 0x2b6   :  { %1526 = vrot.lane.b32.xlu0 %v2230_v9, %s2150_s16 }
 0x2b8   :  { %1534 = vrot.lane.b32.xlu1 %v2225_v8, %s2150_s16 }
 0x2ba   :  { %1528 = vrot.lane.b32.xlu0 %v2244_v13, %s2150_s16  ;;  %v1857_v13 = vld [vmem:[%s2658_s2 + $0x68] sm:$0xff] }
 0x2bc   :  { %1536 = vrot.lane.b32.xlu1 %v2239_v12, %s2150_s16  ;;  %v1856_v12 = vld [vmem:[%s2658_s2 + $0x60] sm:$0xff] }
 0x2bd   :  { %v2082_v4 = vpack.c.bf16 %v1857_v13, %v1856_v12  ;;  %v1854_v12 = vld [vmem:[%s2662_s6 + $0x2] ss:$0 sm:$0xff] }
 0x318   :  { %v1250_v15 = vpop.xlane.xlu1 %1249 }
 0x319   :  { %v1247_v14 = vpop.xlane.xlu0 %1246  ;;  %v1270_v17 = vmul.f32 0.125, %v1250_v15  ;;  %v1870_v15 = vld [vmem:[%s2658_s2 + $0x80] sm:$0xff] }
 0x31a   :  { %v1269_v16 = vmul.f32 0.125, %v1247_v14 }
 0x31b   :  { %v1297_v20 = vrot.slane %v1270_v17, %v2278_v33 }
 0x31c   :  { %v1293_v18 = vrot.slane %v1269_v16, %v2280_v37  ;;  %v1871_v16 = vld [vmem:[%s2658_s2 + $0x88] sm:$0xff] }
 0x31d   :  { %v1259_v21 = vpop.xlane.xlu0 %1258 }
 0x31e   :  { %v1273_v22 = vmul.f32 0.125, %v1259_v21  ;;  %v1298_v24 = vsel %vm91_vm2, %v1297_v20, %v1293_v18  ;;  %v2091_v18 = vpack.c.bf16 %v1871_v16, %v1870_v15  ;;  %v1872_v21 = vld [vmem:[%s2658_s2 + $0x90] sm:$0xff] }
 0x320   :  { %v1312_v26 = vrot.slane %v1273_v22, %v2280_v37  ;;  %v1873_v22 = vld [vmem:[%s2658_s2 + $0x98] sm:$0xff] }
 0x321   :  { %v1262_v25 = vpop.xlane.xlu0 %1261 }
 0x322   :  { %v1274_v27 = vmul.f32 0.125, %v1262_v25  ;;  %v1879_v25 = vld [vmem:[%s2661_s5 + $0x40] sm:$0xff] }
 0x324   :  { %v1316_v28 = vrot.slane %v1274_v27, %v2278_v33  ;;  %v1265_v29 = vpop.xlane.xlu1 %1264 }
 0x325   :  { %v1253_v30 = vpop.xlane.xlu0 %1252  ;;  %v1275_v32 = vmul.f32 0.125, %v1265_v29 }
 0x326   :  { %v1317_v31 = vsel %vm91_vm2, %v1316_v28, %v1312_v26  ;;  %v1271_v34 = vmul.f32 0.125, %v1253_v30  ;;  %v1880_v26 = vld [vmem:[%s2661_s5 + $0x48] sm:$0xff] }
 0x327   :  { %v1321_v35 = vrot.slane %v1275_v32, %v2282_v38  ;;  %v2097_v27 = vpack.c.bf16 %v1880_v26, %v1879_v25  ;;  %v1868_v32 = vld [vmem:[%s2662_s6 + $0x3] ss:$0 sm:$0xff]  ;;  %v1896_v26 = vld [vmem:[%s2662_s6 + $0x5] ss:$0 sm:$0xff] }
 0x328   :  { %v1302_v36 = vrot.slane %v1271_v34, %v2282_v38  ;;  %v1268_v41 = vpop.xlane.xlu1 %1267 }
 0x329   :  { %v1322_v39 = vsel %vm98_vm3, %v1321_v35, %v1317_v31  ;;  %v1256_v44 = vpop.xlane.xlu0 %1255 }
 0x32a   :  { %v1303_v40 = vsel %vm98_vm3, %v1302_v36, %v1298_v24  ;;  %v1272_v45 = vmul.f32 0.125, %v1256_v44  ;;  %v2094_v24 = vpack.c.bf16 %v1873_v22, %v1872_v21 }
 0x32c   :  { %v1307_v46 = vrot.slane %v1272_v45, %v2286_v47  ;;  %v1525_v54 = vpop.permute.xlu1 %1524  ;;  %v1876_v45 = vld [vmem:[%s2659_s3 + $0x4] ss:$0 sm:$0xff] }
 0x32d   :  { %v1523_v55 = vpop.permute.xlu0 %1522  ;;  %v1549_v57 = vsel %vm35_vm0, %v1525_v54, 0.0 }
 0x32e   :  { %v1308_v49 = vsel %vm105_vm4, %v1307_v46, %v1303_v40  ;;  %v1546_v56 = vsel %vm35_vm0, %v1523_v55, 0.0  ;;  %1550 = vadd.xlane.f32.xlu1 %v1549_v57 }
 0x32f   :  { %1547 = vadd.xlane.f32.xlu0 %v1546_v56 }
 0x330   :  { %v1531_v58 = vpop.permute.xlu1 %1530 }
 0x331   :  { %v1558_v59 = vsel %vm35_vm0, %v1531_v58, 0.0  ;;  %v1527_v60 = vpop.permute.xlu0 %1526 }
 0x333   :  { %v597_v62 = vpop.f32.mrb[2].mxu0  ;;  %1559 = vadd.xlane.f32.xlu0 %v1558_v59  ;;  %v1884_v59 = vld [vmem:[%s2658_s2 + $0xa0] sm:$0xff] }
 0x334   :  { %v598_v5 = vadd.f32 %v1840_v61, %v597_v62  ;;  %v1981_v63 = vpop.f32.mrb[3].mxu0  ;;  %v1533_v61 = vpop.permute.xlu1 %1532 }
 0x335   :  { %v1561_v62 = vsel %vm35_vm0, %v1533_v61, 0.0 }
 0x336   :  { %602 = vst [vmem:[#allocation2 + $0x2] sm:$0x3] %v598_v5  ;;  %v1552_v5 = vsel %vm35_vm0, %v1527_v60, 0.0  ;;  %v1885_v60 = vld [vmem:[%s2658_s2 + $0xa8] sm:$0xff] }
 0x337   :  { %1562 = vadd.xlane.f32.xlu0 %v1561_v62 }
 0x338   :  { %v1535_v63 = vpop.permute.xlu1 %1534 }
 0x33b   :  { %v795_v1 = vpop.f32.mrb[4].mxu0  ;;  %1553 = vadd.xlane.f32.xlu0 %v1552_v5 }
 0x33c   :  { %v807_v8 = vmul.f32 %v1848_v0, %v795_v1  ;;  %v1992_v9 = vpop.f32.mrb[5].mxu0  ;;  %v1529_v0 = vpop.permute.xlu0 %1528  ;;  %v1564_v1 = vsel %vm35_vm0, %v1535_v63, 0.0 }
 0x33d   :  { %1565 = vadd.xlane.f32.xlu1 %v1564_v1 }
 0x33e   :  { %v816_v3 = vadd.f32 %v1850_v2, %v807_v8  ;;  %v1555_v2 = vsel %vm35_vm0, %v1529_v0, 0.0  ;;  %v1537_v8 = vpop.permute.xlu1 %1536  ;;  %v2100_v0 = vpack.c.bf16 %v1885_v60, %v1884_v59 }
 0x33f   :  { %v1567_v9 = vsel %vm35_vm0, %v1537_v8, 0.0  ;;  %1556 = vadd.xlane.f32.xlu0 %v1555_v2  ;;  %v1886_v8 = vld [vmem:[%s2658_s2 + $0xb0] sm:$0xff] }
 0x340   :  { %v817_v6 = vmax.f32 %v816_v3, 0.0 }
 0x341   :  { %1568 = vadd.xlane.f32.xlu1 %v1567_v9  ;;  %v1887_v9 = vld [vmem:[%s2658_s2 + $0xb8] sm:$0xff] }
 0x342   :  { %1998 = vmatmul.mubr.msk.f32.vlgmr.msra.gmra.mrb[4].mxu1 %vm227_vm7, %v817_v6  ;;  %v1862_v6 = vld [vmem:[%s2659_s3 + $0x3] ss:$0 sm:$0xff] }
 0x343   :  { %2083 = vmatpush3.bf16.msra.mxu1 %v2082_v4  ;;  %2008 = vmatprep.mubr.msk.f32.mxu1 %vm2145_vm1, %v2146_v23 }
 0x344   :  { %2084 = vmatprep.subr.bf16.mxu1 %v2143_v19 }
 0x347   :  { %2086 = vmatpush3.bf16.msra.mxu1 %v2085_v11 }
 0x348   :  { %2096 = vmatprep.subr.bf16.mxu1 %v2143_v19 }
 0x34a   :  { %2009 = vmatmul.mubr.msk.f32.vlgmr.msra.gmra.mrb[6].mxu1 %vm128_vm6, %v1027_v42  ;;  %v1276_v42 = vmul.f32 0.125, %v1268_v41 }
 0x34b   :  { %2033 = vmatprep.mubr.msk.f32.mxu1 %vm2145_vm1, %v2146_v23  ;;  %2098 = vmatpush3.bf16.msra.mxu1 %v2097_v27 }
 0x34c   :  { %v1326_v43 = vrot.slane %v1276_v42, %v2286_v47  ;;  %2099 = vmatprep.subr.bf16.mxu1 %v2143_v19 }
 0x34e   :  { %v1327_v48 = vsel %vm105_vm4, %v1326_v43, %v1322_v39 }
 0x34f   :  { %v1328_v52 = vsel %vm126_vm5, %v1327_v48, %v1308_v49 }
 0x3bb   :  { %v1551_v30 = vpop.xlane.xlu1 %1550 }
 0x3bc   :  { %v1548_v28 = vpop.xlane.xlu0 %1547  ;;  %v1571_v43 = vmul.f32 0.125, %v1551_v30 }
 0x3bd   :  { %v1570_v41 = vmul.f32 0.125, %v1548_v28 }
 0x3be   :  { %v1598_v55 = vrot.slane %v1571_v43, %v2278_v33 }
 0x3bf   :  { %v1594_v48 = vrot.slane %v1570_v41, %v2280_v37 }
 0x3c0   :  { %v1560_v29 = vpop.xlane.xlu0 %1559 }
 0x3c1   :  { %v1574_v42 = vmul.f32 0.125, %v1560_v29 }
 0x3c3   :  { %v1613_v54 = vrot.slane %v1574_v42, %v2280_v37 }
 0x3c4   :  { %v1563_v31 = vpop.xlane.xlu0 %1562 }
 0x3c5   :  { %v1575_v44 = vmul.f32 0.125, %v1563_v31 }
 0x3c7   :  { %v1617_v56 = vrot.slane %v1575_v44, %v2278_v33  ;;  %v1599_v33 = vsel %vm91_vm2, %v1598_v55, %v1594_v48 }
 0x3c8   :  { %v1554_v40 = vpop.xlane.xlu0 %1553 }
 0x3c9   :  { %v1572_v50 = vmul.f32 0.125, %v1554_v40  ;;  %v1618_v1 = vsel %vm91_vm2, %v1617_v56, %v1613_v54 }
 0x3ca   :  { %v1566_v35 = vpop.xlane.xlu1 %1565 }
 0x3cb   :  { %v1576_v49 = vmul.f32 0.125, %v1566_v35  ;;  %v1603_v37 = vrot.slane %v1572_v50, %v2282_v38 }
 0x3cc   :  { %v1557_v51 = vpop.xlane.xlu0 %1556 }
 0x3cd   :  { %v1573_v62 = vmul.f32 0.125, %v1557_v51  ;;  %v1622_v63 = vrot.slane %v1576_v49, %v2282_v38 }
 0x3ce   :  { %v1569_v46 = vpop.xlane.xlu1 %1568 }
 0x3cf   :  { %v1577_v61 = vmul.f32 0.125, %v1569_v46  ;;  %v1623_v38 = vsel %vm98_vm3, %v1622_v63, %v1618_v1 }
 0x415   :  { %v898_v13 = vpop.f32.mrb[4].mxu1 }
 0x416   :  { %v899_v3 = vadd.f32 %v1854_v12, %v898_v13  ;;  %v1999_v4 = vpop.f32.mrb[5].mxu1  ;;  %v1627_v12 = vrot.slane %v1577_v61, %v2286_v47  ;;  %v1608_v13 = vrot.slane %v1573_v62, %v2286_v47 }
 0x417   :  { %v2103_v4 = vpack.c.bf16 %v1887_v9, %v1886_v8 }
 0x418   :  { %903 = vst [vmem:[#allocation2 + $0x4] sm:$0x3] %v899_v3  ;;  %v1604_v3 = vsel %vm98_vm3, %v1603_v37, %v1599_v33 }
 0x41d   :  { %v1096_v7 = vpop.f32.mrb[6].mxu1 }
 0x41e   :  { %v1108_v11 = vmul.f32 %v1862_v6, %v1096_v7  ;;  %v2010_v14 = vpop.f32.mrb[7].mxu1  ;;  %v1628_v6 = vsel %vm105_vm4, %v1627_v12, %v1623_v38  ;;  %v1609_v7 = vsel %vm105_vm4, %v1608_v13, %v1604_v3 }
 0x41f   :  { %v1629_v47 = vsel %vm126_vm5, %v1628_v6, %v1609_v7 }
 0x420   :  { %v1117_v17 = vadd.f32 %v1864_v10, %v1108_v11  ;;  %v1893_v10 = vld [vmem:[%s2661_s5 + $0x50] sm:$0xff]  ;;  %v1894_v11 = vld [vmem:[%s2661_s5 + $0x58] sm:$0xff]  ;;  %s2151_s5 = smov [#allocation2]  }
 0x421   :  { %s1812_s1 = sshll.u32 %s2151_s5, 4  ;;  %s1813_s1 = int_to_ptr.vmem [resolvable:$true] %s1812_s1 }
 0x422   :  { %v1118_v20 = vmax.f32 %v1117_v17, 0.0  ;;  %v1890_v17 = vld [vmem:[%s2659_s3 + $0x5] ss:$0 sm:$0xff]  ;;  %s2119_s3 = scalar_lea.vmem %s1813_s1, 192  ;;  %p2124_p1 = scmp.lt.s32.totalorder %s1813_s1, %s1813_s1 }
 0x423   :  { %p2120_p0 = scmp.ne.s32.totalorder %s1813_s1, %s2119_s3  ;;  %p2125_p2 = scmp.lt.s32.totalorder %s2119_s3, %s2119_s3 }
 0x424   :  { %2016 = vmatmul.mubr.msk.f32.vlgmr.msra.gmra.mrb[6].mxu0 %vm227_vm7, %v1118_v20  ;;  %v1892_v20 = vld [vmem:[%s2660_s4 + $0x5] ss:$0 sm:$0xff] }
 0x425   :  { %2092 = vmatpush3.bf16.msra.mxu0 %v2091_v18  ;;  %2026 = vmatprep.mubr.msk.f32.mxu0 %vm2145_vm1, %v2146_v23  ;;  %p2126_p3 = por %p2125_p2, %p2124_p1 }
 0x426   :  { %2093 = vmatprep.subr.bf16.mxu0 %v2143_v19 }
 0x427   :  { %p2127_p4 = pnand %p2126_p3, %p2120_p0 }
 0x429   :  { %2095 = vmatpush3.bf16.msra.mxu0 %v2094_v24 }
 0x42a   :  { %2105 = vmatprep.subr.bf16.mxu0 %v2143_v19 }
 0x42c   :  { %2027 = vmatmul.mubr.msk.f32.vlgmr.msra.gmra.mrb[8].mxu0 %vm128_vm6, %v1328_v52 }
 0x42d   :  { %2051 = vmatprep.mubr.msk.f32.mxu0 %vm2145_vm1, %v2146_v23 }
 0x4f7   :  { %v1199_v34 = vpop.f32.mrb[6].mxu0 }
 0x4f8   :  { %v1200_v36 = vadd.f32 %v1868_v32, %v1199_v34  ;;  %v2017_v39 = vpop.f32.mrb[7].mxu0 }
 0x4fa   :  { %1204 = vst [vmem:[#allocation2 + $0x6] sm:$0x3] %v1200_v36 }
 0x4ff   :  { %v1397_v52 = vpop.f32.mrb[8].mxu0 }
 0x500   :  { %v1409_v57 = vmul.f32 %v1876_v45, %v1397_v52  ;;  %v2028_v58 = vpop.f32.mrb[9].mxu0 }
 0x502   :  { %v1418_v5 = vadd.f32 %v1878_v53, %v1409_v57 }
 0x504   :  { %v1419_v2 = vmax.f32 %v1418_v5, 0.0 }
 0x506   :  { %2034 = vmatmul.mubr.msk.f32.vlgmr.msra.gmra.mrb[8].mxu1 %vm227_vm7, %v1419_v2 }
 0x507   :  { %2101 = vmatpush3.bf16.msra.mxu1 %v2100_v0  ;;  %2044 = vmatprep.mubr.msk.f32.mxu1 %vm2145_vm1, %v2146_v23  ;;  %v2106_v23 = vpack.c.bf16 %v1894_v11, %v1893_v10 }
 0x508   :  { %2102 = vmatprep.subr.bf16.mxu1 %v2143_v19  ;;  %v1882_v19 = vld [vmem:[%s2662_s6 + $0x4] ss:$0 sm:$0xff] }
 0x509   :  { %2107 = vmatpush3.bf16.msra.mxu0 %v2106_v23 }
 0x50b   :  { %2104 = vmatpush3.bf16.msra.mxu1 %v2103_v4 }
 0x50e   :  { %2045 = vmatmul.mubr.msk.f32.vlgmr.msra.gmra.mrb[10].mxu1 %vm128_vm6, %v1629_v47 }
 0x5d9   :  { %v1500_v14 = vpop.f32.mrb[8].mxu1 }
 0x5da   :  { %v1501_v15 = vadd.f32 %v1882_v19, %v1500_v14  ;;  %v2035_v16 = vpop.f32.mrb[9].mxu1 }
 0x5dc   :  { %1505 = vst [vmem:[#allocation2 + $0x8] sm:$0x3] %v1501_v15 }
 0x5e1   :  { %v1698_v18 = vpop.f32.mrb[10].mxu1 }
 0x5e2   :  { %v1710_v21 = vmul.f32 %v1890_v17, %v1698_v18  ;;  %v2046_v22 = vpop.f32.mrb[11].mxu1 }
 0x5e4   :  { %v1719_v24 = vadd.f32 %v1892_v20, %v1710_v21 }
 0x5e6   :  { %v1720_v25 = vmax.f32 %v1719_v24, 0.0 }
 0x5e8   :  { %2052 = vmatmul.mubr.msk.f32.vlgmr.msra.gmra.mrb[10].mxu0 %vm227_vm7, %v1720_v25 }
 0x6bb   :  { %v1801_v27 = vpop.f32.mrb[10].mxu0 }
 0x6bc   :  { %v1802_v28 = vadd.f32 %v1896_v26, %v1801_v27  ;;  %v2053_v29 = vpop.f32.mrb[11].mxu0 }
 0x6be   :  { %1806 = vst [vmem:[#allocation2 + $0xa] sm:$0x3] %v1802_v28 }
 0x6bf   :  { %2130 = shalt.err (!%p2127_p4)
}
 0x6c0   :  { %s2131_s28 = scalar_lea.hbm %s2663_s7, 192 }
 0x6c1   :  { %p2132_p5 = scmp.ne.s32.totalorder %s2663_s7, %s2131_s28  ;;  %p2135_p6 = scmp.lt.u32.totalorder %s2131_s28, %s2663_s7 }
 0x6c3   :  { %p2137_p7 = pnand %p2135_p6, %p2132_p5 }
 0x6c5   :  { %2140 = shalt.err (!%p2137_p7)
}
 0x6c6   :  { %s2152_s9 = smov 32   ;;  %s2153_s10 = smov 2  }
 0x6c7   :  { %1818 = dma.vmem_to_hbm [thread:$0]  %s1813_s1, 192, %s2663_s7, [#allocation3], %s2152_s9, %s2152_s9, %s2153_s10  }
 0x6c8   :  { %2141 = dma.done.wait [#allocation3], 192  }
 0x6c9   :  { %2142 = vsyncadd [#allocation3], 4294967104 }
 0x6ca   :  { %1822 = vsyncpa [#allocation3], 1 }

// kernel: tpu_custom_call.1
= control target key start
LH: loop header
LB: loop body
LE: loop exit
PB: predicated region body
PF: predicated region fallthrough
CT: control target
= control target key end

     0   :  { %vm35_vm0 = vcmask 64512   ;;  %s2656_s0 = inlined_call_operand.vmem [shape: f32[2,32,48], index: 0, kind: input, shape index: {}]   ;;  %s2657_s1 = inlined_call_operand.vmem [shape: f32[48,6], index: 1, kind: input, shape index: {}]   ;;  %s2658_s2 = inlined_call_operand.vmem [shape: f32[6,32,16], index: 2, kind: input, shape index: {}]   ;;  %s2659_s3 = inlined_call_operand.vmem [shape: f32[6,1,16], index: 3, kind: input, shape index: {}]   ;;  %s2660_s4 = inlined_call_operand.vmem [shape: f32[6,1,16], index: 4, kind: input, shape index: {}]   ;;  %s2661_s5 = inlined_call_operand.vmem [shape: f32[6,16,128], index: 5, kind: input, shape index: {}]   ;;  %s2662_s6 = inlined_call_operand.vmem [shape: f32[6,1,128], index: 6, kind: input, shape index: {}]   ;;  %s2663_s7 = inlined_call_operand.hbm [shape: f32[6,2,128], index: 7, kind: output, shape index: {}]  }
   0x1   :  { %v2197_v0 = vld [vmem:[%s2656_s0 + $0x20] sm:$0xff]  ;;  %v2207_v2 = vld [vmem:[%s2656_s0 + $0x28] sm:$0xff] }
   0x2   :  { %v2202_v1 = vld [vmem:[%s2656_s0] sm:$0xff]  ;;  %v48_v3 = vsel %vm35_vm0, %v2197_v0, 0.0  ;;  %v2216_v5 = vld [vmem:[%s2656_s0 + $0x8] sm:$0xff]  ;;  %v51_v6 = vsel %vm35_vm0, %v2207_v2, 0.0 }
   0x3   :  { %v36_v4 = vsel %vm35_vm0, %v2202_v1, 0.0  ;;  %49 = vadd.xlane.f32.xlu1 %v48_v3  ;;  %v39_v7 = vsel %vm35_vm0, %v2216_v5, 0.0 }
   0x4   :  { %37 = vadd.xlane.f32.xlu0 %v36_v4 }
   0x5   :  { %12 = vsyncpa [#allocation3], 0  ;;  %v2225_v8 = vld [vmem:[%s2656_s0 + $0x30] sm:$0xff]  ;;  %v2239_v12 = vld [vmem:[%s2656_s0 + $0x38] sm:$0xff]  ;;  %v2143_v19 = vmov 0.0|0.0   ;;  %s2144_s23 = smov 120   ;;  %v80_v24 = vlaneseq }
   0x6   :  { %v2230_v9 = vld [vmem:[%s2656_s0 + $0x10] sm:$0xff]  ;;  %v54_v10 = vsel %vm35_vm0, %v2225_v8, 0.0  ;;  %v2244_v13 = vld [vmem:[%s2656_s0 + $0x18] sm:$0xff]  ;;  %v57_v14 = vsel %vm35_vm0, %v2239_v12, 0.0  ;;  %v68_v16 = vld [vmem:[%s2658_s2] sm:$0xff]  ;;  %2054 = vmatprep.subr.bf16.mxu0 %v2143_v19  ;;  %2060 = vmatprep.subr.bf16.mxu1 %v2143_v19  ;;  %vm2145_vm1 = vmmov 0  }
   0x7   :  { %52 = vadd.xlane.f32.xlu1 %v51_v6  ;;  %v42_v11 = vsel %vm35_vm0, %v2230_v9, 0.0  ;;  %v45_v15 = vsel %vm35_vm0, %v2244_v13, 0.0  ;;  %v69_v17 = vld [vmem:[%s2658_s2 + $0x8] sm:$0xff]  ;;  %v70_v20 = vld [vmem:[%s2658_s2 + $0x10] sm:$0xff]  ;;  %v71_v21 = vld [vmem:[%s2658_s2 + $0x18] sm:$0xff]  ;;  %v2146_v23 = vmov 0.0  }
   0x8   :  { %40 = vadd.xlane.f32.xlu0 %v39_v7  ;;  %v2055_v18 = vpack.c.bf16 %v69_v17, %v68_v16  ;;  %v2058_v22 = vpack.c.bf16 %v71_v21, %v70_v20  ;;  %1954 = vmatprep.mubr.msk.f32.mxu0 %vm2145_vm1, %v2146_v23  ;;  %v81_v27 = vand.u32 127, %v80_v24  ;;  %v83_v29 = vshrl.u32 %v80_v24, 7  ;;  %s2147_s24 = smov 112   ;;  %s2148_s28 = smov 104  }
   0x9   :  { %1961 = vmatprep.mubr.msk.f32.mxu1 %vm2145_vm1, %v2146_v23  ;;  %vm91_vm2 = vcmask 130112   ;;  %vm98_vm3 = vcmask 195712   ;;  %vm105_vm4 = vcmask 261312   ;;  %vm126_vm5 = vcmask 1041409   ;;  %s2149_s21 = smov 96   ;;  %s2150_s16 = smov 88  }
   0xa   :  { %2056 = vmatpush3.bf16.msra.mxu0 %v2055_v18  ;;  %v86_v28 = vadd.s32 4294967288, %v81_v27  ;;  %v93_v32 = vadd.s32 4294967280, %v81_v27  ;;  %v100_v36 = vadd.s32 4294967272, %v81_v27  ;;  %v2280_v37 = vsub.s32 %v81_v27, %v83_v29  ;;  %v218_v27 = vld [vmem:[%s2661_s5] sm:$0xff] }
   0xb   :  { %55 = vadd.xlane.f32.xlu1 %v54_v10  ;;  %2057 = vmatprep.subr.bf16.mxu0 %v2143_v19  ;;  %vm128_vm6 = vcmask 261120   ;;  %vm227_vm7 = vcmask 130048  }
   0xc   :  { %43 = vadd.xlane.f32.xlu0 %v42_v11  ;;  %v2278_v33 = vsub.s32 %v86_v28, %v83_v29  ;;  %v2282_v38 = vsub.s32 %v93_v32, %v83_v29  ;;  %v2286_v47 = vsub.s32 %v100_v36, %v83_v29  ;;  %v219_v28 = vld [vmem:[%s2661_s5 + $0x8] sm:$0xff] }
   0xd   :  { %v2061_v29 = vpack.c.bf16 %v219_v28, %v218_v27  ;;  %v1824_v27 = vld [vmem:[%s2659_s3] ss:$0 sm:$0xff] }
   0xe   :  { %2059 = vmatpush3.bf16.msra.mxu0 %v2058_v22 }
   0xf   :  { %58 = vadd.xlane.f32.xlu1 %v57_v14  ;;  %2069 = vmatprep.subr.bf16.mxu0 %v2143_v19 }
  0x10   :  { %46 = vadd.xlane.f32.xlu0 %v45_v15  ;;  %2062 = vmatpush3.bf16.msra.mxu1 %v2061_v29  ;;  %v1825_v29 = vld [vmem:[%s2660_s4] ss:$0 sm:$0xff] }
  0x11   :  { %2063 = vmatprep.subr.bf16.mxu1 %v2143_v19 }
  0x20   :  { %320 = vrot.lane.b32.xlu1 %v2216_v5, %s2144_s23 }
  0x24   :  { %326 = vrot.lane.b32.xlu1 %v2197_v0, %s2144_s23 }
  0x26   :  { %318 = vrot.lane.b32.xlu0 %v2202_v1, %s2144_s23 }
  0x28   :  { %328 = vrot.lane.b32.xlu1 %v2207_v2, %s2144_s23 }
  0x2a   :  { %322 = vrot.lane.b32.xlu0 %v2230_v9, %s2144_s23 }
  0x2c   :  { %330 = vrot.lane.b32.xlu1 %v2225_v8, %s2144_s23 }
  0x2e   :  { %324 = vrot.lane.b32.xlu0 %v2244_v13, %s2144_s23 }
  0x30   :  { %332 = vrot.lane.b32.xlu1 %v2239_v12, %s2144_s23 }
  0x90   :  { %v50_v25 = vpop.xlane.xlu1 %49 }
  0x91   :  { %v38_v26 = vpop.xlane.xlu0 %37  ;;  %v64_v41 = vmul.f32 0.125, %v50_v25 }
  0x92   :  { %v60_v42 = vmul.f32 0.125, %v38_v26 }
  0x93   :  { %v110_v52 = vrot.slane %v64_v41, %v2280_v37 }
  0x94   :  { %v53_v30 = vpop.xlane.xlu1 %52  ;;  %v85_v53 = vrot.slane %v60_v42, %v2280_v37 }
  0x95   :  { %v41_v31 = vpop.xlane.xlu0 %40  ;;  %v65_v34 = vmul.f32 0.125, %v53_v30 }
  0x96   :  { %v61_v35 = vmul.f32 0.125, %v41_v31 }
  0x97   :  { %v114_v45 = vrot.slane %v65_v34, %v2278_v33 }
  0x98   :  { %v56_v39 = vpop.xlane.xlu1 %55  ;;  %v90_v46 = vrot.slane %v61_v35, %v2278_v33 }
  0x99   :  { %v44_v40 = vpop.xlane.xlu0 %43  ;;  %v66_v43 = vmul.f32 0.125, %v56_v39  ;;  %v115_v56 = vsel %vm91_vm2, %v114_v45, %v110_v52 }
  0x9a   :  { %v62_v44 = vmul.f32 0.125, %v44_v40  ;;  %v92_v57 = vsel %vm91_vm2, %v90_v46, %v85_v53 }
  0x9b   :  { %v119_v48 = vrot.slane %v66_v43, %v2282_v38 }
  0x9c   :  { %v97_v49 = vrot.slane %v62_v44, %v2282_v38  ;;  %v59_v50 = vpop.xlane.xlu1 %58 }
  0x9d   :  { %v47_v51 = vpop.xlane.xlu0 %46  ;;  %v67_v54 = vmul.f32 0.125, %v59_v50  ;;  %v120_v60 = vsel %vm98_vm3, %v119_v48, %v115_v56 }
  0x9e   :  { %v63_v55 = vmul.f32 0.125, %v47_v51  ;;  %v99_v61 = vsel %vm98_vm3, %v97_v49, %v92_v57 }
  0x9f   :  { %v124_v58 = vrot.slane %v67_v54, %v2286_v47 }
  0xa0   :  { %v104_v59 = vrot.slane %v63_v55, %v2286_v47  ;;  %v321_v62 = vpop.permute.xlu1 %320 }
  0xa1   :  { %v319_v63 = vpop.permute.xlu0 %318  ;;  %v125_v4 = vsel %vm105_vm4, %v124_v58, %v120_v60  ;;  %v345_v7 = vsel %vm35_vm0, %v321_v62, 0.0 }
  0xa2   :  { %v106_v3 = vsel %vm105_vm4, %v104_v59, %v99_v61  ;;  %v342_v6 = vsel %vm35_vm0, %v319_v63, 0.0  ;;  %346 = vadd.xlane.f32.xlu1 %v345_v7 }
  0xa3   :  { %v127_v10 = vsel %vm126_vm5, %v125_v4, %v106_v3  ;;  %343 = vadd.xlane.f32.xlu0 %v342_v6 }
  0xa4   :  { %1955 = vmatmul.mubr.msk.f32.vlgmr.msra.gmra.mrb[0].mxu0 %vm128_vm6, %v127_v10  ;;  %v327_v11 = vpop.permute.xlu1 %326 }
  0xa5   :  { %1979 = vmatprep.mubr.msk.f32.mxu0 %vm2145_vm1, %v2146_v23  ;;  %v354_v14 = vsel %vm35_vm0, %v327_v11, 0.0  ;;  %v323_v15 = vpop.permute.xlu0 %322 }
  0xa6   :  { %v348_v18 = vsel %vm35_vm0, %v323_v15, 0.0 }
  0xa7   :  { %355 = vadd.xlane.f32.xlu0 %v354_v14 }
  0xa8   :  { %v329_v16 = vpop.permute.xlu1 %328 }
  0xa9   :  { %v357_v17 = vsel %vm35_vm0, %v329_v16, 0.0  ;;  %v325_v21 = vpop.permute.xlu0 %324 }
  0xaa   :  { %v351_v24 = vsel %vm35_vm0, %v325_v21, 0.0 }
  0xab   :  { %358 = vadd.xlane.f32.xlu0 %v357_v17 }
  0xac   :  { %v331_v20 = vpop.permute.xlu1 %330 }
  0xad   :  { %v360_v22 = vsel %vm35_vm0, %v331_v20, 0.0 }
  0xae   :  { %361 = vadd.xlane.f32.xlu1 %v360_v22 }
  0xaf   :  { %349 = vadd.xlane.f32.xlu0 %v348_v18 }
  0xb0   :  { %v333_v25 = vpop.permute.xlu1 %332 }
  0xb1   :  { %v363_v26 = vsel %vm35_vm0, %v333_v25, 0.0 }
  0xb2   :  { %364 = vadd.xlane.f32.xlu1 %v363_v26 }
  0xb3   :  { %352 = vadd.xlane.f32.xlu0 %v351_v24 }
  0xc3   :  { %621 = vrot.lane.b32.xlu1 %v2216_v5, %s2147_s24 }
  0xc7   :  { %627 = vrot.lane.b32.xlu1 %v2197_v0, %s2147_s24 }
  0xc9   :  { %619 = vrot.lane.b32.xlu0 %v2202_v1, %s2147_s24 }
  0xcb   :  { %629 = vrot.lane.b32.xlu1 %v2207_v2, %s2147_s24 }
  0xcd   :  { %623 = vrot.lane.b32.xlu0 %v2230_v9, %s2147_s24 }
  0xcf   :  { %631 = vrot.lane.b32.xlu1 %v2225_v8, %s2147_s24 }
  0xd1   :  { %625 = vrot.lane.b32.xlu0 %v2244_v13, %s2147_s24 }
  0xd3   :  { %633 = vrot.lane.b32.xlu1 %v2239_v12, %s2147_s24 }
 0x12f   :  { %v347_v31 = vpop.xlane.xlu1 %346 }
 0x130   :  { %v344_v30 = vpop.xlane.xlu0 %343  ;;  %v367_v34 = vmul.f32 0.125, %v347_v31 }
 0x131   :  { %v366_v32 = vmul.f32 0.125, %v344_v30 }
 0x132   :  { %v394_v36 = vrot.slane %v367_v34, %v2278_v33  ;;  %v1829_v34 = vld [vmem:[%s2658_s2 + $0x28] sm:$0xff] }
 0x133   :  { %v390_v35 = vrot.slane %v366_v32, %v2280_v37  ;;  %v1828_v32 = vld [vmem:[%s2658_s2 + $0x20] sm:$0xff] }
 0x134   :  { %v356_v39 = vpop.xlane.xlu0 %355 }
 0x135   :  { %v370_v40 = vmul.f32 0.125, %v356_v39  ;;  %v395_v41 = vsel %vm91_vm2, %v394_v36, %v390_v35  ;;  %v2064_v36 = vpack.c.bf16 %v1829_v34, %v1828_v32 }
 0x137   :  { %v409_v43 = vrot.slane %v370_v40, %v2280_v37  ;;  %v1830_v40 = vld [vmem:[%s2658_s2 + $0x30] sm:$0xff] }
 0x138   :  { %v359_v42 = vpop.xlane.xlu0 %358 }
 0x139   :  { %v371_v44 = vmul.f32 0.125, %v359_v42 }
 0x13b   :  { %v413_v45 = vrot.slane %v371_v44, %v2278_v33  ;;  %v362_v46 = vpop.xlane.xlu1 %361 }
 0x13c   :  { %v350_v48 = vpop.xlane.xlu0 %349  ;;  %v372_v50 = vmul.f32 0.125, %v362_v46 }
 0x13d   :  { %v414_v49 = vsel %vm91_vm2, %v413_v45, %v409_v43  ;;  %v368_v51 = vmul.f32 0.125, %v350_v48 }
 0x13e   :  { %v418_v52 = vrot.slane %v372_v50, %v2282_v38 }
 0x13f   :  { %v399_v53 = vrot.slane %v368_v51, %v2282_v38  ;;  %v365_v54 = vpop.xlane.xlu1 %364 }
 0x140   :  { %v353_v55 = vpop.xlane.xlu0 %352  ;;  %v419_v56 = vsel %vm98_vm3, %v418_v52, %v414_v49  ;;  %v373_v58 = vmul.f32 0.125, %v365_v54  ;;  %v1838_v54 = vld [vmem:[%s2661_s5 + $0x18] sm:$0xff] }
 0x141   :  { %v400_v57 = vsel %vm98_vm3, %v399_v53, %v395_v41  ;;  %v369_v59 = vmul.f32 0.125, %v353_v55  ;;  %v1831_v41 = vld [vmem:[%s2658_s2 + $0x38] sm:$0xff]  ;;  %v1837_v53 = vld [vmem:[%s2661_s5 + $0x10] sm:$0xff] }
 0x142   :  { %v423_v60 = vrot.slane %v373_v58, %v2286_v47  ;;  %v2067_v42 = vpack.c.bf16 %v1831_v41, %v1830_v40  ;;  %v2070_v55 = vpack.c.bf16 %v1838_v54, %v1837_v53  ;;  %v1842_v53 = vld [vmem:[%s2658_s2 + $0x40] sm:$0xff]  ;;  %v1843_v54 = vld [vmem:[%s2658_s2 + $0x48] sm:$0xff] }
 0x143   :  { %v404_v61 = vrot.slane %v369_v59, %v2286_v47  ;;  %v622_v62 = vpop.permute.xlu1 %621 }
 0x144   :  { %v620_v63 = vpop.permute.xlu0 %619  ;;  %v424_v3 = vsel %vm105_vm4, %v423_v60, %v419_v56  ;;  %v646_v7 = vsel %vm35_vm0, %v622_v62, 0.0  ;;  %2071 = vmatpush3.bf16.msra.mxu0 %v2070_v55 }
 0x145   :  { %v405_v4 = vsel %vm105_vm4, %v404_v61, %v400_v57  ;;  %v643_v6 = vsel %vm35_vm0, %v620_v63, 0.0  ;;  %647 = vadd.xlane.f32.xlu1 %v646_v7  ;;  %2072 = vmatprep.subr.bf16.mxu0 %v2143_v19 }
 0x146   :  { %v425_v10 = vsel %vm126_vm5, %v424_v3, %v405_v4  ;;  %644 = vadd.xlane.f32.xlu0 %v643_v6 }
 0x147   :  { %v628_v11 = vpop.permute.xlu1 %627 }
 0x148   :  { %v655_v14 = vsel %vm35_vm0, %v628_v11, 0.0  ;;  %v624_v15 = vpop.permute.xlu0 %623 }
 0x149   :  { %v649_v18 = vsel %vm35_vm0, %v624_v15, 0.0 }
 0x14a   :  { %656 = vadd.xlane.f32.xlu0 %v655_v14 }
 0x14b   :  { %v630_v16 = vpop.permute.xlu1 %629 }
 0x14c   :  { %v658_v17 = vsel %vm35_vm0, %v630_v16, 0.0  ;;  %v626_v21 = vpop.permute.xlu0 %625 }
 0x14d   :  { %v652_v24 = vsel %vm35_vm0, %v626_v21, 0.0 }
 0x14e   :  { %659 = vadd.xlane.f32.xlu0 %v658_v17 }
 0x14f   :  { %v632_v20 = vpop.permute.xlu1 %631 }
 0x150   :  { %v661_v22 = vsel %vm35_vm0, %v632_v20, 0.0 }
 0x151   :  { %662 = vadd.xlane.f32.xlu1 %v661_v22 }
 0x152   :  { %650 = vadd.xlane.f32.xlu0 %v649_v18 }
 0x153   :  { %v634_v25 = vpop.permute.xlu1 %633 }
 0x154   :  { %v664_v26 = vsel %vm35_vm0, %v634_v25, 0.0 }
 0x155   :  { %665 = vadd.xlane.f32.xlu1 %v664_v26 }
 0x156   :  { %653 = vadd.xlane.f32.xlu0 %v652_v24 }
 0x166   :  { %922 = vrot.lane.b32.xlu1 %v2216_v5, %s2148_s28 }
 0x16a   :  { %928 = vrot.lane.b32.xlu1 %v2197_v0, %s2148_s28 }
 0x16c   :  { %920 = vrot.lane.b32.xlu0 %v2202_v1, %s2148_s28 }
 0x16e   :  { %930 = vrot.lane.b32.xlu1 %v2207_v2, %s2148_s28 }
 0x170   :  { %924 = vrot.lane.b32.xlu0 %v2230_v9, %s2148_s28 }
 0x172   :  { %932 = vrot.lane.b32.xlu1 %v2225_v8, %s2148_s28 }
 0x174   :  { %926 = vrot.lane.b32.xlu0 %v2244_v13, %s2148_s28 }
 0x176   :  { %934 = vrot.lane.b32.xlu1 %v2239_v12, %s2148_s28 }
 0x177   :  { %v197_v28 = vpop.f32.mrb[0].mxu0 }
 0x178   :  { %v208_v30 = vmul.f32 %v1824_v27, %v197_v28  ;;  %v1956_v31 = vpop.f32.mrb[1].mxu0 }
 0x17a   :  { %v216_v35 = vadd.f32 %v1825_v29, %v208_v30 }
 0x17c   :  { %v217_v39 = vmax.f32 %v216_v35, 0.0 }
 0x17e   :  { %1962 = vmatmul.mubr.msk.f32.vlgmr.msra.gmra.mrb[0].mxu1 %vm227_vm7, %v217_v39 }
 0x17f   :  { %2065 = vmatpush3.bf16.msra.mxu1 %v2064_v36  ;;  %1972 = vmatprep.mubr.msk.f32.mxu1 %vm2145_vm1, %v2146_v23 }
 0x180   :  { %2066 = vmatprep.subr.bf16.mxu1 %v2143_v19 }
 0x183   :  { %2068 = vmatpush3.bf16.msra.mxu1 %v2067_v42 }
 0x184   :  { %2078 = vmatprep.subr.bf16.mxu1 %v2143_v19 }
 0x186   :  { %1973 = vmatmul.mubr.msk.f32.vlgmr.msra.gmra.mrb[2].mxu1 %vm128_vm6, %v425_v10 }
 0x187   :  { %1997 = vmatprep.mubr.msk.f32.mxu1 %vm2145_vm1, %v2146_v23 }
 0x1d2   :  { %v648_v44 = vpop.xlane.xlu1 %647 }
 0x1d3   :  { %v645_v43 = vpop.xlane.xlu0 %644  ;;  %v668_v46 = vmul.f32 0.125, %v648_v44 }
 0x1d4   :  { %v667_v45 = vmul.f32 0.125, %v645_v43  ;;  %v1826_v43 = vld [vmem:[%s2662_s6] ss:$0 sm:$0xff] }
 0x1d5   :  { %v695_v49 = vrot.slane %v668_v46, %v2278_v33 }
 0x1d6   :  { %v691_v48 = vrot.slane %v667_v45, %v2280_v37 }
 0x1d7   :  { %v657_v50 = vpop.xlane.xlu0 %656 }
 0x1d8   :  { %v671_v51 = vmul.f32 0.125, %v657_v50  ;;  %v696_v52 = vsel %vm91_vm2, %v695_v49, %v691_v48  ;;  %v1834_v48 = vld [vmem:[%s2659_s3 + $0x1] ss:$0 sm:$0xff] }
 0x1d9   :  { %v1836_v50 = vld [vmem:[%s2660_s4 + $0x1] ss:$0 sm:$0xff] }
 0x1da   :  { %v710_v57 = vrot.slane %v671_v51, %v2280_v37 }
 0x1db   :  { %v660_v56 = vpop.xlane.xlu0 %659 }
 0x1dc   :  { %v672_v58 = vmul.f32 0.125, %v660_v56  ;;  %v2073_v56 = vpack.c.bf16 %v1843_v54, %v1842_v53 }
 0x1de   :  { %v714_v59 = vrot.slane %v672_v58, %v2278_v33  ;;  %v663_v60 = vpop.xlane.xlu1 %662  ;;  %v1844_v58 = vld [vmem:[%s2658_s2 + $0x50] sm:$0xff] }
 0x1df   :  { %v651_v61 = vpop.xlane.xlu0 %650  ;;  %v673_v63 = vmul.f32 0.125, %v663_v60 }
 0x1e0   :  { %v715_v62 = vsel %vm91_vm2, %v714_v59, %v710_v57  ;;  %v669_v3 = vmul.f32 0.125, %v651_v61  ;;  %v1845_v59 = vld [vmem:[%s2658_s2 + $0x58] sm:$0xff] }
 0x1e1   :  { %v719_v4 = vrot.slane %v673_v63, %v2282_v38  ;;  %v2076_v60 = vpack.c.bf16 %v1845_v59, %v1844_v58 }
 0x1e2   :  { %v700_v6 = vrot.slane %v669_v3, %v2282_v38  ;;  %v666_v7 = vpop.xlane.xlu1 %665 }
 0x1e3   :  { %v654_v10 = vpop.xlane.xlu0 %653  ;;  %v720_v11 = vsel %vm98_vm3, %v719_v4, %v715_v62  ;;  %v674_v15 = vmul.f32 0.125, %v666_v7 }
 0x1e4   :  { %v701_v14 = vsel %vm98_vm3, %v700_v6, %v696_v52  ;;  %v670_v16 = vmul.f32 0.125, %v654_v10 }
 0x1e5   :  { %v724_v17 = vrot.slane %v674_v15, %v2286_v47 }
 0x1e6   :  { %v705_v18 = vrot.slane %v670_v16, %v2286_v47  ;;  %v923_v22 = vpop.permute.xlu1 %922 }
 0x1e7   :  { %v725_v20 = vsel %vm105_vm4, %v724_v17, %v720_v11  ;;  %v921_v24 = vpop.permute.xlu0 %920  ;;  %v947_v27 = vsel %vm35_vm0, %v923_v22, 0.0 }
 0x1e8   :  { %v706_v21 = vsel %vm105_vm4, %v705_v18, %v701_v14  ;;  %v944_v26 = vsel %vm35_vm0, %v921_v24, 0.0  ;;  %948 = vadd.xlane.f32.xlu1 %v947_v27 }
 0x1e9   :  { %v726_v25 = vsel %vm126_vm5, %v725_v20, %v706_v21  ;;  %945 = vadd.xlane.f32.xlu0 %v944_v26 }
 0x1ea   :  { %v929_v28 = vpop.permute.xlu1 %928 }
 0x1eb   :  { %v956_v29 = vsel %vm35_vm0, %v929_v28, 0.0  ;;  %v925_v30 = vpop.permute.xlu0 %924 }
 0x1ec   :  { %v950_v34 = vsel %vm35_vm0, %v925_v30, 0.0 }
 0x1ed   :  { %957 = vadd.xlane.f32.xlu0 %v956_v29 }
 0x1ee   :  { %v931_v31 = vpop.permute.xlu1 %930 }
 0x1ef   :  { %v959_v32 = vsel %vm35_vm0, %v931_v31, 0.0  ;;  %v927_v36 = vpop.permute.xlu0 %926 }
 0x1f0   :  { %v953_v40 = vsel %vm35_vm0, %v927_v36, 0.0 }
 0x1f1   :  { %960 = vadd.xlane.f32.xlu0 %v959_v32 }
 0x1f2   :  { %v933_v35 = vpop.permute.xlu1 %932 }
 0x1f3   :  { %v962_v39 = vsel %vm35_vm0, %v933_v35, 0.0 }
 0x1f4   :  { %963 = vadd.xlane.f32.xlu1 %v962_v39 }
 0x1f5   :  { %951 = vadd.xlane.f32.xlu0 %v950_v34 }
 0x1f6   :  { %v935_v41 = vpop.permute.xlu1 %934 }
 0x1f7   :  { %v965_v42 = vsel %vm35_vm0, %v935_v41, 0.0  ;;  %v1852_v41 = vld [vmem:[%s2661_s5 + $0x28] sm:$0xff] }
 0x1f8   :  { %966 = vadd.xlane.f32.xlu1 %v965_v42 }
 0x1f9   :  { %954 = vadd.xlane.f32.xlu0 %v953_v40  ;;  %v1851_v40 = vld [vmem:[%s2661_s5 + $0x20] sm:$0xff] }
 0x209   :  { %1223 = vrot.lane.b32.xlu1 %v2216_v5, %s2149_s21 }
 0x20d   :  { %1229 = vrot.lane.b32.xlu1 %v2197_v0, %s2149_s21 }
 0x20f   :  { %1221 = vrot.lane.b32.xlu0 %v2202_v1, %s2149_s21 }
 0x211   :  { %1231 = vrot.lane.b32.xlu1 %v2207_v2, %s2149_s21 }
 0x213   :  { %1225 = vrot.lane.b32.xlu0 %v2230_v9, %s2149_s21 }
 0x215   :  { %1233 = vrot.lane.b32.xlu1 %v2225_v8, %s2149_s21 }
 0x217   :  { %1227 = vrot.lane.b32.xlu0 %v2244_v13, %s2149_s21 }
 0x219   :  { %1235 = vrot.lane.b32.xlu1 %v2239_v12, %s2149_s21 }
 0x251   :  { %v297_v44 = vpop.f32.mrb[0].mxu1 }
 0x252   :  { %v298_v45 = vadd.f32 %v1826_v43, %v297_v44  ;;  %v1963_v46 = vpop.f32.mrb[1].mxu1  ;;  %v2079_v43 = vpack.c.bf16 %v1852_v41, %v1851_v40 }
 0x254   :  { %301 = vst [vmem:[#allocation2] sm:$0x3] %v298_v45  ;;  %2080 = vmatpush3.bf16.msra.mxu1 %v2079_v43 }
 0x255   :  { %2081 = vmatprep.subr.bf16.mxu1 %v2143_v19 }
 0x259   :  { %v494_v49 = vpop.f32.mrb[2].mxu1 }
 0x25a   :  { %v506_v51 = vmul.f32 %v1834_v48, %v494_v49  ;;  %v1974_v52 = vpop.f32.mrb[3].mxu1 }
 0x25c   :  { %v515_v55 = vadd.f32 %v1836_v50, %v506_v51 }
 0x25e   :  { %v516_v57 = vmax.f32 %v515_v55, 0.0 }
 0x260   :  { %1980 = vmatmul.mubr.msk.f32.vlgmr.msra.gmra.mrb[2].mxu0 %vm227_vm7, %v516_v57 }
 0x261   :  { %2074 = vmatpush3.bf16.msra.mxu0 %v2073_v56  ;;  %1990 = vmatprep.mubr.msk.f32.mxu0 %vm2145_vm1, %v2146_v23 }
 0x262   :  { %2075 = vmatprep.subr.bf16.mxu0 %v2143_v19 }
 0x265   :  { %2077 = vmatpush3.bf16.msra.mxu0 %v2076_v60 }
 0x266   :  { %2087 = vmatprep.subr.bf16.mxu0 %v2143_v19 }
 0x268   :  { %1991 = vmatmul.mubr.msk.f32.vlgmr.msra.gmra.mrb[4].mxu0 %vm128_vm6, %v726_v25 }
 0x269   :  { %2015 = vmatprep.mubr.msk.f32.mxu0 %vm2145_vm1, %v2146_v23 }
 0x275   :  { %v949_v62 = vpop.xlane.xlu1 %948 }
 0x276   :  { %v946_v61 = vpop.xlane.xlu0 %945  ;;  %v969_v3 = vmul.f32 0.125, %v949_v62 }
 0x277   :  { %v968_v63 = vmul.f32 0.125, %v946_v61  ;;  %v1840_v61 = vld [vmem:[%s2662_s6 + $0x1] ss:$0 sm:$0xff] }
 0x278   :  { %v996_v6 = vrot.slane %v969_v3, %v2278_v33 }
 0x279   :  { %v992_v4 = vrot.slane %v968_v63, %v2280_v37 }
 0x27a   :  { %v958_v7 = vpop.xlane.xlu0 %957 }
 0x27b   :  { %v972_v10 = vmul.f32 0.125, %v958_v7  ;;  %v997_v11 = vsel %vm91_vm2, %v996_v6, %v992_v4  ;;  %v1858_v7 = vld [vmem:[%s2658_s2 + $0x70] sm:$0xff] }
 0x27d   :  { %v1011_v15 = vrot.slane %v972_v10, %v2280_v37  ;;  %v1859_v10 = vld [vmem:[%s2658_s2 + $0x78] sm:$0xff] }
 0x27e   :  { %v961_v14 = vpop.xlane.xlu0 %960 }
 0x27f   :  { %v973_v16 = vmul.f32 0.125, %v961_v14 }
 0x281   :  { %v1015_v17 = vrot.slane %v973_v16, %v2278_v33  ;;  %v964_v18 = vpop.xlane.xlu1 %963 }
 0x282   :  { %v952_v20 = vpop.xlane.xlu0 %951  ;;  %v974_v22 = vmul.f32 0.125, %v964_v18 }
 0x283   :  { %v1016_v21 = vsel %vm91_vm2, %v1015_v17, %v1011_v15  ;;  %v970_v24 = vmul.f32 0.125, %v952_v20 }
 0x284   :  { %v1020_v25 = vrot.slane %v974_v22, %v2282_v38 }
 0x285   :  { %v1001_v26 = vrot.slane %v970_v24, %v2282_v38  ;;  %v967_v29 = vpop.xlane.xlu1 %966 }
 0x286   :  { %v1021_v27 = vsel %vm98_vm3, %v1020_v25, %v1016_v21  ;;  %v975_v30 = vmul.f32 0.125, %v967_v29  ;;  %v955_v32 = vpop.xlane.xlu0 %954 }
 0x287   :  { %v1002_v28 = vsel %vm98_vm3, %v1001_v26, %v997_v11  ;;  %v971_v34 = vmul.f32 0.125, %v955_v32  ;;  %v2085_v11 = vpack.c.bf16 %v1859_v10, %v1858_v7  ;;  %v1864_v10 = vld [vmem:[%s2660_s4 + $0x3] ss:$0 sm:$0xff] }
 0x288   :  { %v1025_v31 = vrot.slane %v975_v30, %v2286_v47 }
 0x289   :  { %v1006_v35 = vrot.slane %v971_v34, %v2286_v47  ;;  %v1224_v44 = vpop.permute.xlu1 %1223 }
 0x28a   :  { %v1026_v36 = vsel %vm105_vm4, %v1025_v31, %v1021_v27  ;;  %v1222_v45 = vpop.permute.xlu0 %1221  ;;  %v1248_v48 = vsel %vm35_vm0, %v1224_v44, 0.0 }
 0x28b   :  { %v1007_v39 = vsel %vm105_vm4, %v1006_v35, %v1002_v28  ;;  %v1245_v46 = vsel %vm35_vm0, %v1222_v45, 0.0  ;;  %1249 = vadd.xlane.f32.xlu1 %v1248_v48 }
 0x28c   :  { %v1027_v42 = vsel %vm126_vm5, %v1026_v36, %v1007_v39  ;;  %1246 = vadd.xlane.f32.xlu0 %v1245_v46 }
 0x28d   :  { %v1230_v49 = vpop.permute.xlu1 %1229 }
 0x28e   :  { %v1257_v50 = vsel %vm35_vm0, %v1230_v49, 0.0  ;;  %v1226_v51 = vpop.permute.xlu0 %1225 }
 0x28f   :  { %v1251_v54 = vsel %vm35_vm0, %v1226_v51, 0.0  ;;  %v1866_v51 = vld [vmem:[%s2661_s5 + $0x38] sm:$0xff] }
 0x290   :  { %1258 = vadd.xlane.f32.xlu0 %v1257_v50  ;;  %v1865_v50 = vld [vmem:[%s2661_s5 + $0x30] sm:$0xff] }
 0x291   :  { %v1232_v52 = vpop.permute.xlu1 %1231 }
 0x292   :  { %v1260_v53 = vsel %vm35_vm0, %v1232_v52, 0.0  ;;  %v1228_v56 = vpop.permute.xlu0 %1227 }
 0x293   :  { %v1254_v58 = vsel %vm35_vm0, %v1228_v56, 0.0 }
 0x294   :  { %1261 = vadd.xlane.f32.xlu0 %v1260_v53  ;;  %v2088_v53 = vpack.c.bf16 %v1866_v51, %v1865_v50 }
 0x295   :  { %v1234_v55 = vpop.permute.xlu1 %1233 }
 0x296   :  { %v1263_v57 = vsel %vm35_vm0, %v1234_v55, 0.0  ;;  %2089 = vmatpush3.bf16.msra.mxu0 %v2088_v53  ;;  %v1878_v53 = vld [vmem:[%s2660_s4 + $0x4] ss:$0 sm:$0xff] }
 0x297   :  { %1264 = vadd.xlane.f32.xlu1 %v1263_v57  ;;  %2090 = vmatprep.subr.bf16.mxu0 %v2143_v19 }
 0x298   :  { %1252 = vadd.xlane.f32.xlu0 %v1251_v54 }
 0x299   :  { %v1236_v59 = vpop.permute.xlu1 %1235 }
 0x29a   :  { %v1266_v60 = vsel %vm35_vm0, %v1236_v59, 0.0 }
 0x29b   :  { %1267 = vadd.xlane.f32.xlu1 %v1266_v60 }
 0x29c   :  { %1255 = vadd.xlane.f32.xlu0 %v1254_v58 }
 0x2ac   :  { %1524 = vrot.lane.b32.xlu1 %v2216_v5, %s2150_s16 }
 0x2b0   :  { %1530 = vrot.lane.b32.xlu1 %v2197_v0, %s2150_s16  ;;  %v1848_v0 = vld [vmem:[%s2659_s3 + $0x2] ss:$0 sm:$0xff] }
 0x2b2   :  { %1522 = vrot.lane.b32.xlu0 %v2202_v1, %s2150_s16 }
 0x2b4   :  { %1532 = vrot.lane.b32.xlu1 %v2207_v2, %s2150_s16  ;;  %v1850_v2 = vld [vmem:[%s2660_s4 + $0x2] ss:$0 sm:$0xff] }
 0x2b6   :  { %1526 = vrot.lane.b32.xlu0 %v2230_v9, %s2150_s16 }
 0x2b8   :  { %1534 = vrot.lane.b32.xlu1 %v2225_v8, %s2150_s16 }
 0x2ba   :  { %1528 = vrot.lane.b32.xlu0 %v2244_v13, %s2150_s16  ;;  %v1857_v13 = vld [vmem:[%s2658_s2 + $0x68] sm:$0xff] }
 0x2bc   :  { %1536 = vrot.lane.b32.xlu1 %v2239_v12, %s2150_s16  ;;  %v1856_v12 = vld [vmem:[%s2658_s2 + $0x60] sm:$0xff] }
 0x2bd   :  { %v2082_v4 = vpack.c.bf16 %v1857_v13, %v1856_v12  ;;  %v1854_v12 = vld [vmem:[%s2662_s6 + $0x2] ss:$0 sm:$0xff] }
 0x318   :  { %v1250_v15 = vpop.xlane.xlu1 %1249 }
 0x319   :  { %v1247_v14 = vpop.xlane.xlu0 %1246  ;;  %v1270_v17 = vmul.f32 0.125, %v1250_v15  ;;  %v1870_v15 = vld [vmem:[%s2658_s2 + $0x80] sm:$0xff] }
 0x31a   :  { %v1269_v16 = vmul.f32 0.125, %v1247_v14 }
 0x31b   :  { %v1297_v20 = vrot.slane %v1270_v17, %v2278_v33 }
 0x31c   :  { %v1293_v18 = vrot.slane %v1269_v16, %v2280_v37  ;;  %v1871_v16 = vld [vmem:[%s2658_s2 + $0x88] sm:$0xff] }
 0x31d   :  { %v1259_v21 = vpop.xlane.xlu0 %1258 }
 0x31e   :  { %v1273_v22 = vmul.f32 0.125, %v1259_v21  ;;  %v1298_v24 = vsel %vm91_vm2, %v1297_v20, %v1293_v18  ;;  %v2091_v18 = vpack.c.bf16 %v1871_v16, %v1870_v15  ;;  %v1872_v21 = vld [vmem:[%s2658_s2 + $0x90] sm:$0xff] }
 0x320   :  { %v1312_v26 = vrot.slane %v1273_v22, %v2280_v37  ;;  %v1873_v22 = vld [vmem:[%s2658_s2 + $0x98] sm:$0xff] }
 0x321   :  { %v1262_v25 = vpop.xlane.xlu0 %1261 }
 0x322   :  { %v1274_v27 = vmul.f32 0.125, %v1262_v25  ;;  %v1879_v25 = vld [vmem:[%s2661_s5 + $0x40] sm:$0xff] }
 0x324   :  { %v1316_v28 = vrot.slane %v1274_v27, %v2278_v33  ;;  %v1265_v29 = vpop.xlane.xlu1 %1264 }
 0x325   :  { %v1253_v30 = vpop.xlane.xlu0 %1252  ;;  %v1275_v32 = vmul.f32 0.125, %v1265_v29 }
 0x326   :  { %v1317_v31 = vsel %vm91_vm2, %v1316_v28, %v1312_v26  ;;  %v1271_v34 = vmul.f32 0.125, %v1253_v30  ;;  %v1880_v26 = vld [vmem:[%s2661_s5 + $0x48] sm:$0xff] }
 0x327   :  { %v1321_v35 = vrot.slane %v1275_v32, %v2282_v38  ;;  %v2097_v27 = vpack.c.bf16 %v1880_v26, %v1879_v25  ;;  %v1868_v32 = vld [vmem:[%s2662_s6 + $0x3] ss:$0 sm:$0xff]  ;;  %v1896_v26 = vld [vmem:[%s2662_s6 + $0x5] ss:$0 sm:$0xff] }
 0x328   :  { %v1302_v36 = vrot.slane %v1271_v34, %v2282_v38  ;;  %v1268_v41 = vpop.xlane.xlu1 %1267 }
 0x329   :  { %v1322_v39 = vsel %vm98_vm3, %v1321_v35, %v1317_v31  ;;  %v1256_v44 = vpop.xlane.xlu0 %1255 }
 0x32a   :  { %v1303_v40 = vsel %vm98_vm3, %v1302_v36, %v1298_v24  ;;  %v1272_v45 = vmul.f32 0.125, %v1256_v44  ;;  %v2094_v24 = vpack.c.bf16 %v1873_v22, %v1872_v21 }
 0x32c   :  { %v1307_v46 = vrot.slane %v1272_v45, %v2286_v47  ;;  %v1525_v54 = vpop.permute.xlu1 %1524  ;;  %v1876_v45 = vld [vmem:[%s2659_s3 + $0x4] ss:$0 sm:$0xff] }
 0x32d   :  { %v1523_v55 = vpop.permute.xlu0 %1522  ;;  %v1549_v57 = vsel %vm35_vm0, %v1525_v54, 0.0 }
 0x32e   :  { %v1308_v49 = vsel %vm105_vm4, %v1307_v46, %v1303_v40  ;;  %v1546_v56 = vsel %vm35_vm0, %v1523_v55, 0.0  ;;  %1550 = vadd.xlane.f32.xlu1 %v1549_v57 }
 0x32f   :  { %1547 = vadd.xlane.f32.xlu0 %v1546_v56 }
 0x330   :  { %v1531_v58 = vpop.permute.xlu1 %1530 }
 0x331   :  { %v1558_v59 = vsel %vm35_vm0, %v1531_v58, 0.0  ;;  %v1527_v60 = vpop.permute.xlu0 %1526 }
 0x333   :  { %v597_v62 = vpop.f32.mrb[2].mxu0  ;;  %1559 = vadd.xlane.f32.xlu0 %v1558_v59  ;;  %v1884_v59 = vld [vmem:[%s2658_s2 + $0xa0] sm:$0xff] }
 0x334   :  { %v598_v5 = vadd.f32 %v1840_v61, %v597_v62  ;;  %v1981_v63 = vpop.f32.mrb[3].mxu0  ;;  %v1533_v61 = vpop.permute.xlu1 %1532 }
 0x335   :  { %v1561_v62 = vsel %vm35_vm0, %v1533_v61, 0.0 }
 0x336   :  { %602 = vst [vmem:[#allocation2 + $0x2] sm:$0x3] %v598_v5  ;;  %v1552_v5 = vsel %vm35_vm0, %v1527_v60, 0.0  ;;  %v1885_v60 = vld [vmem:[%s2658_s2 + $0xa8] sm:$0xff] }
 0x337   :  { %1562 = vadd.xlane.f32.xlu0 %v1561_v62 }
 0x338   :  { %v1535_v63 = vpop.permute.xlu1 %1534 }
 0x33b   :  { %v795_v1 = vpop.f32.mrb[4].mxu0  ;;  %1553 = vadd.xlane.f32.xlu0 %v1552_v5 }
 0x33c   :  { %v807_v8 = vmul.f32 %v1848_v0, %v795_v1  ;;  %v1992_v9 = vpop.f32.mrb[5].mxu0  ;;  %v1529_v0 = vpop.permute.xlu0 %1528  ;;  %v1564_v1 = vsel %vm35_vm0, %v1535_v63, 0.0 }
 0x33d   :  { %1565 = vadd.xlane.f32.xlu1 %v1564_v1 }
 0x33e   :  { %v816_v3 = vadd.f32 %v1850_v2, %v807_v8  ;;  %v1555_v2 = vsel %vm35_vm0, %v1529_v0, 0.0  ;;  %v1537_v8 = vpop.permute.xlu1 %1536  ;;  %v2100_v0 = vpack.c.bf16 %v1885_v60, %v1884_v59 }
 0x33f   :  { %v1567_v9 = vsel %vm35_vm0, %v1537_v8, 0.0  ;;  %1556 = vadd.xlane.f32.xlu0 %v1555_v2  ;;  %v1886_v8 = vld [vmem:[%s2658_s2 + $0xb0] sm:$0xff] }
 0x340   :  { %v817_v6 = vmax.f32 %v816_v3, 0.0 }
 0x341   :  { %1568 = vadd.xlane.f32.xlu1 %v1567_v9  ;;  %v1887_v9 = vld [vmem:[%s2658_s2 + $0xb8] sm:$0xff] }
 0x342   :  { %1998 = vmatmul.mubr.msk.f32.vlgmr.msra.gmra.mrb[4].mxu1 %vm227_vm7, %v817_v6  ;;  %v1862_v6 = vld [vmem:[%s2659_s3 + $0x3] ss:$0 sm:$0xff] }
 0x343   :  { %2083 = vmatpush3.bf16.msra.mxu1 %v2082_v4  ;;  %2008 = vmatprep.mubr.msk.f32.mxu1 %vm2145_vm1, %v2146_v23 }
 0x344   :  { %2084 = vmatprep.subr.bf16.mxu1 %v2143_v19 }
 0x347   :  { %2086 = vmatpush3.bf16.msra.mxu1 %v2085_v11 }
 0x348   :  { %2096 = vmatprep.subr.bf16.mxu1 %v2143_v19 }
 0x34a   :  { %2009 = vmatmul.mubr.msk.f32.vlgmr.msra.gmra.mrb[6].mxu1 %vm128_vm6, %v1027_v42  ;;  %v1276_v42 = vmul.f32 0.125, %v1268_v41 }
 0x34b   :  { %2033 = vmatprep.mubr.msk.f32.mxu1 %vm2145_vm1, %v2146_v23  ;;  %2098 = vmatpush3.bf16.msra.mxu1 %v2097_v27 }
 0x34c   :  { %v1326_v43 = vrot.slane %v1276_v42, %v2286_v47  ;;  %2099 = vmatprep.subr.bf16.mxu1 %v2143_v19 }
 0x34e   :  { %v1327_v48 = vsel %vm105_vm4, %v1326_v43, %v1322_v39 }
 0x34f   :  { %v1328_v52 = vsel %vm126_vm5, %v1327_v48, %v1308_v49 }
 0x3bb   :  { %v1551_v30 = vpop.xlane.xlu1 %1550 }
 0x3bc   :  { %v1548_v28 = vpop.xlane.xlu0 %1547  ;;  %v1571_v43 = vmul.f32 0.125, %v1551_v30 }
 0x3bd   :  { %v1570_v41 = vmul.f32 0.125, %v1548_v28 }
 0x3be   :  { %v1598_v55 = vrot.slane %v1571_v43, %v2278_v33 }
 0x3bf   :  { %v1594_v48 = vrot.slane %v1570_v41, %v2280_v37 }
 0x3c0   :  { %v1560_v29 = vpop.xlane.xlu0 %1559 }
 0x3c1   :  { %v1574_v42 = vmul.f32 0.125, %v1560_v29 }
 0x3c3   :  { %v1613_v54 = vrot.slane %v1574_v42, %v2280_v37 }
 0x3c4   :  { %v1563_v31 = vpop.xlane.xlu0 %1562 }
 0x3c5   :  { %v1575_v44 = vmul.f32 0.125, %v1563_v31 }
 0x3c7   :  { %v1617_v56 = vrot.slane %v1575_v44, %v2278_v33  ;;  %v1599_v33 = vsel %vm91_vm2, %v1598_v55, %v1594_v48 }
 0x3c8   :  { %v1554_v40 = vpop.xlane.xlu0 %1553 }
 0x3c9   :  { %v1572_v50 = vmul.f32 0.125, %v1554_v40  ;;  %v1618_v1 = vsel %vm91_vm2, %v1617_v56, %v1613_v54 }
 0x3ca   :  { %v1566_v35 = vpop.xlane.xlu1 %1565 }
 0x3cb   :  { %v1576_v49 = vmul.f32 0.125, %v1566_v35  ;;  %v1603_v37 = vrot.slane %v1572_v50, %v2282_v38 }
 0x3cc   :  { %v1557_v51 = vpop.xlane.xlu0 %1556 }
 0x3cd   :  { %v1573_v62 = vmul.f32 0.125, %v1557_v51  ;;  %v1622_v63 = vrot.slane %v1576_v49, %v2282_v38 }
 0x3ce   :  { %v1569_v46 = vpop.xlane.xlu1 %1568 }
 0x3cf   :  { %v1577_v61 = vmul.f32 0.125, %v1569_v46  ;;  %v1623_v38 = vsel %vm98_vm3, %v1622_v63, %v1618_v1 }
 0x415   :  { %v898_v13 = vpop.f32.mrb[4].mxu1 }
 0x416   :  { %v899_v3 = vadd.f32 %v1854_v12, %v898_v13  ;;  %v1999_v4 = vpop.f32.mrb[5].mxu1  ;;  %v1627_v12 = vrot.slane %v1577_v61, %v2286_v47  ;;  %v1608_v13 = vrot.slane %v1573_v62, %v2286_v47 }
 0x417   :  { %v2103_v4 = vpack.c.bf16 %v1887_v9, %v1886_v8 }
 0x418   :  { %903 = vst [vmem:[#allocation2 + $0x4] sm:$0x3] %v899_v3  ;;  %v1604_v3 = vsel %vm98_vm3, %v1603_v37, %v1599_v33 }
 0x41d   :  { %v1096_v7 = vpop.f32.mrb[6].mxu1 }
 0x41e   :  { %v1108_v11 = vmul.f32 %v1862_v6, %v1096_v7  ;;  %v2010_v14 = vpop.f32.mrb[7].mxu1  ;;  %v1628_v6 = vsel %vm105_vm4, %v1627_v12, %v1623_v38  ;;  %v1609_v7 = vsel %vm105_vm4, %v1608_v13, %v1604_v3 }
 0x41f   :  { %v1629_v47 = vsel %vm126_vm5, %v1628_v6, %v1609_v7 }
 0x420   :  { %v1117_v17 = vadd.f32 %v1864_v10, %v1108_v11  ;;  %v1893_v10 = vld [vmem:[%s2661_s5 + $0x50] sm:$0xff]  ;;  %v1894_v11 = vld [vmem:[%s2661_s5 + $0x58] sm:$0xff]  ;;  %s2151_s5 = smov [#allocation2]  }
 0x421   :  { %s1812_s1 = sshll.u32 %s2151_s5, 4  ;;  %s1813_s1 = int_to_ptr.vmem [resolvable:$true] %s1812_s1 }
 0x422   :  { %v1118_v20 = vmax.f32 %v1117_v17, 0.0  ;;  %v1890_v17 = vld [vmem:[%s2659_s3 + $0x5] ss:$0 sm:$0xff]  ;;  %s2119_s3 = scalar_lea.vmem %s1813_s1, 192  ;;  %p2124_p1 = scmp.lt.s32.totalorder %s1813_s1, %s1813_s1 }
 0x423   :  { %p2120_p0 = scmp.ne.s32.totalorder %s1813_s1, %s2119_s3  ;;  %p2125_p2 = scmp.lt.s32.totalorder %s2119_s3, %s2119_s3 }
 0x424   :  { %2016 = vmatmul.mubr.msk.f32.vlgmr.msra.gmra.mrb[6].mxu0 %vm227_vm7, %v1118_v20  ;;  %v1892_v20 = vld [vmem:[%s2660_s4 + $0x5] ss:$0 sm:$0xff] }
 0x425   :  { %2092 = vmatpush3.bf16.msra.mxu0 %v2091_v18  ;;  %2026 = vmatprep.mubr.msk.f32.mxu0 %vm2145_vm1, %v2146_v23  ;;  %p2126_p3 = por %p2125_p2, %p2124_p1 }
 0x426   :  { %2093 = vmatprep.subr.bf16.mxu0 %v2143_v19 }
 0x427   :  { %p2127_p4 = pnand %p2126_p3, %p2120_p0 }
 0x429   :  { %2095 = vmatpush3.bf16.msra.mxu0 %v2094_v24 }
 0x42a   :  { %2105 = vmatprep.subr.bf16.mxu0 %v2143_v19 }
 0x42c   :  { %2027 = vmatmul.mubr.msk.f32.vlgmr.msra.gmra.mrb[8].mxu0 %vm128_vm6, %v1328_v52 }
 0x42d   :  { %2051 = vmatprep.mubr.msk.f32.mxu0 %vm2145_vm1, %v2146_v23 }
 0x4f7   :  { %v1199_v34 = vpop.f32.mrb[6].mxu0 }
 0x4f8   :  { %v1200_v36 = vadd.f32 %v1868_v32, %v1199_v34  ;;  %v2017_v39 = vpop.f32.mrb[7].mxu0 }
 0x4fa   :  { %1204 = vst [vmem:[#allocation2 + $0x6] sm:$0x3] %v1200_v36 }
 0x4ff   :  { %v1397_v52 = vpop.f32.mrb[8].mxu0 }
 0x500   :  { %v1409_v57 = vmul.f32 %v1876_v45, %v1397_v52  ;;  %v2028_v58 = vpop.f32.mrb[9].mxu0 }
 0x502   :  { %v1418_v5 = vadd.f32 %v1878_v53, %v1409_v57 }
 0x504   :  { %v1419_v2 = vmax.f32 %v1418_v5, 0.0 }
 0x506   :  { %2034 = vmatmul.mubr.msk.f32.vlgmr.msra.gmra.mrb[8].mxu1 %vm227_vm7, %v1419_v2 }
 0x507   :  { %2101 = vmatpush3.bf16.msra.mxu1 %v2100_v0  ;;  %2044 = vmatprep.mubr.msk.f32.mxu1 %vm2145_vm1, %v2146_v23  ;;  %v2106_v23 = vpack.c.bf16 %v1894_v11, %v1893_v10 }
 0x508   :  { %2102 = vmatprep.subr.bf16.mxu1 %v2143_v19  ;;  %v1882_v19 = vld [vmem:[%s2662_s6 + $0x4] ss:$0 sm:$0xff] }
 0x509   :  { %2107 = vmatpush3.bf16.msra.mxu0 %v2106_v23 }
 0x50b   :  { %2104 = vmatpush3.bf16.msra.mxu1 %v2103_v4 }
 0x50e   :  { %2045 = vmatmul.mubr.msk.f32.vlgmr.msra.gmra.mrb[10].mxu1 %vm128_vm6, %v1629_v47 }
 0x5d9   :  { %v1500_v14 = vpop.f32.mrb[8].mxu1 }
 0x5da   :  { %v1501_v15 = vadd.f32 %v1882_v19, %v1500_v14  ;;  %v2035_v16 = vpop.f32.mrb[9].mxu1 }
 0x5dc   :  { %1505 = vst [vmem:[#allocation2 + $0x8] sm:$0x3] %v1501_v15 }
 0x5e1   :  { %v1698_v18 = vpop.f32.mrb[10].mxu1 }
 0x5e2   :  { %v1710_v21 = vmul.f32 %v1890_v17, %v1698_v18  ;;  %v2046_v22 = vpop.f32.mrb[11].mxu1 }
 0x5e4   :  { %v1719_v24 = vadd.f32 %v1892_v20, %v1710_v21 }
 0x5e6   :  { %v1720_v25 = vmax.f32 %v1719_v24, 0.0 }
 0x5e8   :  { %2052 = vmatmul.mubr.msk.f32.vlgmr.msra.gmra.mrb[10].mxu0 %vm227_vm7, %v1720_v25 }
 0x6bb   :  { %v1801_v27 = vpop.f32.mrb[10].mxu0 }
 0x6bc   :  { %v1802_v28 = vadd.f32 %v1896_v26, %v1801_v27  ;;  %v2053_v29 = vpop.f32.mrb[11].mxu0 }
 0x6be   :  { %1806 = vst [vmem:[#allocation2 + $0xa] sm:$0x3] %v1802_v28 }
 0x6bf   :  { %2130 = shalt.err (!%p2127_p4)
}
 0x6c0   :  { %s2131_s28 = scalar_lea.hbm %s2663_s7, 192 }
 0x6c1   :  { %p2132_p5 = scmp.ne.s32.totalorder %s2663_s7, %s2131_s28  ;;  %p2135_p6 = scmp.lt.u32.totalorder %s2131_s28, %s2663_s7 }
 0x6c3   :  { %p2137_p7 = pnand %p2135_p6, %p2132_p5 }
 0x6c5   :  { %2140 = shalt.err (!%p2137_p7)
}
 0x6c6   :  { %s2152_s9 = smov 32   ;;  %s2153_s10 = smov 2  }
 0x6c7   :  { %1818 = dma.vmem_to_hbm [thread:$0]  %s1813_s1, 192, %s2663_s7, [#allocation3], %s2152_s9, %s2152_s9, %s2153_s10  }
 0x6c8   :  { %2141 = dma.done.wait [#allocation3], 192  }
 0x6c9   :  { %2142 = vsyncadd [#allocation3], 4294967104 }
 0x6ca   :  { %1822 = vsyncpa [#allocation3], 1 }

</bundles_post_ra>
